<compile_context>
chip_gen: v7x
topology: tpu7x:2x2x1
jax: 0.10.0
libtpu: 0.0.40
codegen_flags: <defaults>
</compile_context>

<pallas_src>
import functools

import jax
import jax.numpy as jnp
from jax.experimental import pallas as pl
from jax.experimental.pallas import tpu as pltpu


# ----------------------------- helpers --------------------------------------

def _round_up(v, m):
    return (v + m - 1) // m * m


def _vmem_limit(need_bytes):
    # Never below the 32 MiB default-ish floor (an over-estimate is harmless,
    # an under-estimate fails compilation); cap well under physical VMEM.
    return int(min(max(int(need_bytes * 1.5) + (4 << 20), 32 << 20), 100 << 20))


# ------------------- resident variant: one fused kernel ---------------------

def ppnp_resident_kernel(x_ref, w1_ref, b1_ref, w2_ref, b2_ref, a_hbm_ref,
                         out_ref, a_vmem, preds_ref, aloc_ref, dma_sem,
                         *, alpha, niter):
    # Kick off the (large) A HBM->VMEM transfer first so it overlaps the MLP.
    a_copy = pltpu.make_async_copy(a_hbm_ref, a_vmem, dma_sem)
    a_copy.start()

    # --- MLP: Linear -> ReLU -> Linear (dropout == identity in eval mode) ---
    h = jnp.dot(x_ref[...], w1_ref[...], preferred_element_type=jnp.float32)
    h = jnp.maximum(h + b1_ref[...], 0.0)
    local = jnp.dot(h.astype(jnp.bfloat16), w2_ref[...],
                    preferred_element_type=jnp.float32) + b2_ref[...]

    # Park propagation state in VMEM scratch -> no big vreg live ranges.
    preds_ref[0] = local.astype(preds_ref.dtype)
    aloc_ref[...] = alpha * local
    if niter == 0:
        out_ref[...] = local.astype(out_ref.dtype)

    a_copy.wait()

    # --- APPNP propagation: preds <- A' @ preds + alpha * local,
    #     with A' = (1 - alpha) * D^-1/2 A D^-1/2 (pre-scaled in the wrapper).
    # Fully unrolled (niter is a small static count).  A is read from the VMEM
    # ref inside every step (never hoisted into a persistent vreg value).
    for t in range(niter):
        r, w = t % 2, (t + 1) % 2
        new = jnp.dot(a_vmem[...], preds_ref[r],
                      preferred_element_type=jnp.float32) + aloc_ref[...]
        preds_ref[w] = new.astype(preds_ref.dtype)
        if t == niter - 1:
            out_ref[...] = new.astype(out_ref.dtype)


def ppnp_forward_resident(x, w1, b1, w2p, b2p, a_scaled, *, alpha, niter):
    n, f = x.shape
    h = w1.shape[1]
    cpad = w2p.shape[1]

    kernel = functools.partial(ppnp_resident_kernel,
                               alpha=float(alpha), niter=int(niter))

    need = (2 * n * f + 2 * f * h + 4 * h + 2 * h * cpad + 4 * cpad  # x,W,b
            + 2 * n * n                    # A landing buffer (bf16)
            + 4 * n * cpad                 # out (f32)
            + 2 * 2 * n * cpad             # preds ping-pong (bf16)
            + 4 * n * cpad)                # alpha*local (f32)

    return pl.pallas_call(
        kernel,
        out_shape=jax.ShapeDtypeStruct((n, cpad), jnp.float32),
        in_specs=[
            pl.BlockSpec(memory_space=pltpu.MemorySpace.VMEM),   # x
            pl.BlockSpec(memory_space=pltpu.MemorySpace.VMEM),   # W1
            pl.BlockSpec(memory_space=pltpu.MemorySpace.VMEM),   # b1
            pl.BlockSpec(memory_space=pltpu.MemorySpace.VMEM),   # W2 (padded)
            pl.BlockSpec(memory_space=pltpu.MemorySpace.VMEM),   # b2 (padded)
            pl.BlockSpec(memory_space=pl.ANY),                   # A stays in HBM
        ],
        out_specs=pl.BlockSpec(memory_space=pltpu.MemorySpace.VMEM),
        scratch_shapes=[
            pltpu.VMEM((n, n), jnp.bfloat16),        # A landing buffer
            pltpu.VMEM((2, n, cpad), jnp.bfloat16),  # preds ping-pong
            pltpu.VMEM((n, cpad), jnp.float32),      # alpha * local
            pltpu.SemaphoreType.DMA(()),             # A DMA completion
        ],
        compiler_params=pltpu.CompilerParams(vmem_limit_bytes=_vmem_limit(need)),
    )(x, w1, b1, w2p, b2p, a_scaled)


# ---------------- tiled / streamed variant (large graphs, v7x) ---------------

def mlp_tiled_kernel(x_ref, w1_ref, b1_ref, w2_ref, b2_ref, local_ref):
    h = jnp.dot(x_ref[...], w1_ref[...], preferred_element_type=jnp.float32)
    h = jnp.maximum(h + b1_ref[...], 0.0)
    local_ref[...] = (jnp.dot(h.astype(jnp.bfloat16), w2_ref[...],
                              preferred_element_type=jnp.float32)
                      + b2_ref[...]).astype(local_ref.dtype)


def ppnp_prop_kernel(a_ref, local_ref, out_ref, preds_ref, *, alpha, tm):
    # grid = (niter, row_tiles); a_ref: (tm, N) bf16 pre-scaled by (1-alpha);
    # local_ref: (N, CPAD) f32 resident block; preds_ref: (2, N, CPAD) bf16.
    t = pl.program_id(0)
    i = pl.program_id(1)

    @pl.when((t == 0) & (i == 0))
    def _():  # preds_0 = local
        preds_ref[0] = local_ref[...].astype(preds_ref.dtype)

    r = t % 2
    w = 1 - r
    row0 = pl.multiple_of(i * tm, tm)

    new = (jnp.dot(a_ref[...], preds_ref[r],
                   preferred_element_type=jnp.float32)
           + alpha * local_ref[pl.ds(row0, tm), :])
    preds_ref[w, pl.ds(row0, tm), :] = new.astype(preds_ref.dtype)
    # Written every step; the last (t == niter-1) writeback is what lands.
    out_ref[...] = new.astype(out_ref.dtype)


def ppnp_forward_tiled(x, w1, b1, w2p, b2p, a_scaled, *, alpha, niter, row_tile):
    n, f = x.shape
    h = w1.shape[1]
    cpad = w2p.shape[1]

    tm = min(int(row_tile), _round_up(n, 8))
    n_pad = _round_up(n, tm)
    if n_pad != n:
        x = jnp.pad(x, ((0, n_pad - n), (0, 0)))
        a_scaled = jnp.pad(a_scaled, ((0, n_pad - n), (0, n_pad - n)))
    n_tiles = n_pad // tm

    # Stage 1: tiled MLP over node-row tiles (megacore-parallel row axis).
    mlp_need = 2 * (2 * tm * f + 4 * tm * cpad) + 2 * f * h + 2 * h * cpad
    local = pl.pallas_call(
        mlp_tiled_kernel,
        out_shape=jax.ShapeDtypeStruct((n_pad, cpad), jnp.float32),
        grid=(n_tiles,),
        in_specs=[
            pl.BlockSpec((tm, f), lambda i: (i, 0)),
            pl.BlockSpec((f, h), lambda i: (0, 0)),
            pl.BlockSpec((1, h), lambda i: (0, 0)),
            pl.BlockSpec((h, cpad), lambda i: (0, 0)),
            pl.BlockSpec((1, cpad), lambda i: (0, 0)),
        ],
        out_specs=pl.BlockSpec((tm, cpad), lambda i: (i, 0)),
        compiler_params=pltpu.CompilerParams(
            dimension_semantics=("parallel",),
            vmem_limit_bytes=_vmem_limit(mlp_need)),
    )(x, w1, b1, w2p, b2p)

    if niter == 0:
        return local[:n]

    # Stage 2: propagation, streaming lane-dense (tm, N) row tiles of A'.
    prop = functools.partial(ppnp_prop_kernel, alpha=float(alpha), tm=tm)
    prop_need = (2 * 2 * tm * n_pad       # A row tile, double-buffered (bf16)
                 + 2 * 4 * n_pad * cpad   # local block (f32)
                 + 2 * 4 * tm * cpad      # out tile (f32)
                 + 2 * 2 * n_pad * cpad)  # preds ping-pong scratch (bf16)
    out = pl.pallas_call(
        prop,
        out_shape=jax.ShapeDtypeStruct((n_pad, cpad), jnp.float32),
        grid=(niter, n_tiles),
        in_specs=[
            pl.BlockSpec((tm, n_pad), lambda t, i: (i, 0)),    # A' row tile
            pl.BlockSpec((n_pad, cpad), lambda t, i: (0, 0)),  # local (resident)
        ],
        out_specs=pl.BlockSpec((tm, cpad), lambda t, i: (i, 0)),
        scratch_shapes=[pltpu.VMEM((2, n_pad, cpad), jnp.bfloat16)],
        compiler_params=pltpu.CompilerParams(
            dimension_semantics=("arbitrary", "arbitrary"),
            vmem_limit_bytes=_vmem_limit(prop_need)),
    )(a_scaled, local)
    return out[:n]


# ------------------------------ dispatcher -----------------------------------

def ppnp_forward(x, w1, b1, w2, b2, a_norm, *, alpha=0.5, niter=6,
                 variant="auto", row_tile=256,
                 resident_vmem_budget=48 * 1024 * 1024):
    n, f = x.shape
    h = w1.shape[1]
    c = w2.shape[1]
    cpad = _round_up(c, 128)

    # bf16 MXU operands (accumulation stays f32 inside the kernels).
    xb = x.astype(jnp.bfloat16)
    w1b = w1.astype(jnp.bfloat16)
    b1f = b1.astype(jnp.float32)
    # Lane-pad the class dim to 128 so all stores are full-lane vectors.
    w2p = jnp.zeros((h, cpad), jnp.bfloat16).at[:, :c].set(w2.astype(jnp.bfloat16))
    b2p = jnp.zeros((1, cpad), jnp.float32).at[:, :c].set(b2.astype(jnp.float32))
    # Fold (1 - alpha) into the normalized adjacency once, cast to bf16.
    a_scaled = ((1.0 - alpha) * a_norm).astype(jnp.bfloat16)

    if variant == "auto":
        resident_need = 2 * n * n + 10 * n * cpad + 2 * n * f
        variant = ("resident"
                   if resident_need + (2 << 20) <= resident_vmem_budget
                   else "tiled")

    if variant == "resident":
        out = ppnp_forward_resident(xb, w1b, b1f, w2p, b2p, a_scaled,
                                    alpha=alpha, niter=niter)
    elif variant == "tiled":
        out = ppnp_forward_tiled(xb, w1b, b1f, w2p, b2p, a_scaled,
                                 alpha=alpha, niter=niter, row_tile=row_tile)
    else:
        raise ValueError(f"unknown variant {variant}")
    return out[:, :c]


# ------------------------------ JAX glue -------------------------------------

def build_sym_norm_adj(edge_index, num_nodes):
    """Dense symmetric-normalized adjacency D^-1/2 A D^-1/2.

    The edge list is treated as a *set* (duplicates are dropped via .max),
    matching set_symmetric semantics; edge weights are all ones."""
    src, dst = edge_index[0], edge_index[1]
    adj = jnp.zeros((num_nodes, num_nodes), jnp.float32).at[src, dst].max(1.0)
    deg = adj.sum(axis=1)
    d_inv_sqrt = jnp.where(deg > 0, 1.0 / jnp.sqrt(deg), 0.0)
    return d_inv_sqrt[:, None] * adj * d_inv_sqrt[None, :]


def init_linear(key, fan_in, fan_out):
    """PyTorch nn.Linear default init: U(-1/sqrt(fan_in), 1/sqrt(fan_in))."""
    kw, kb = jax.random.split(key)
    bound = 1.0 / jnp.sqrt(fan_in)
    w = jax.random.uniform(kw, (fan_in, fan_out), jnp.float32, -bound, bound)
    b = jax.random.uniform(kb, (1, fan_out), jnp.float32, -bound, bound)
    return w, b


def ppnp_reference(x, w1, b1, w2, b2, a_norm, alpha, niter):
    """Pure-JAX reference mirroring the kernels' bf16 operand quantization."""
    f32 = jnp.float32
    xb = x.astype(jnp.bfloat16).astype(f32)
    w1b = w1.astype(jnp.bfloat16).astype(f32)
    w2b = w2.astype(jnp.bfloat16).astype(f32)
    ab = ((1.0 - alpha) * a_norm).astype(jnp.bfloat16).astype(f32)
    h = jnp.maximum(xb @ w1b + b1, 0.0)
    local = h.astype(jnp.bfloat16).astype(f32) @ w2b + b2
    alocal = alpha * local
    preds = local
    preds_q = local.astype(jnp.bfloat16).astype(f32)
    for _ in range(niter):
        preds = ab @ preds_q + alocal
        preds_q = preds.astype(jnp.bfloat16).astype(f32)
    return preds


# --------------------------------- main ---------------------------------------

if __name__ == "__main__":
    # Small shapes: N=256 nodes, nfeat=32, nhid=32, nclass=8, niter=6, alpha=0.5
    N, NFEAT, NHID, NCLASS = 256, 32, 32, 8
    ALPHA, NITER = 0.5, 6

    key = jax.random.PRNGKey(0)
    kx, ke, k1, k2 = jax.random.split(key, 4)

    # Node features.
    x = jax.random.normal(kx, (N, NFEAT), jnp.float32)

    # Random symmetric edge set (undirected ring + random chords).
    ring_src = jnp.arange(N, dtype=jnp.int32)
    ring_dst = (ring_src + 1) % N
    rnd_src = jax.random.randint(ke, (64,), 0, N, dtype=jnp.int32)
    rnd_dst = (rnd_src + jax.random.randint(jax.random.fold_in(ke, 1),
                                            (64,), 1, N, dtype=jnp.int32)) % N
    src = jnp.concatenate([ring_src, ring_dst, rnd_src, rnd_dst])
    dst = jnp.concatenate([ring_dst, ring_src, rnd_dst, rnd_src])
    edge_index = jnp.stack([src, dst])  # (2, E), symmetric

    # MLP parameters (num_layers=2): Linear(NFEAT, NHID), Linear(NHID, NCLASS)
    w1, b1 = init_linear(k1, NFEAT, NHID)
    w2, b2 = init_linear(k2, NHID, NCLASS)

    # Graph preprocessing (plain JAX glue); dropout p=0.001 is identity in eval.
    a_norm = build_sym_norm_adj(edge_index, N)

    # Run both variants: resident (A in VMEM, fused MLP+prop) and the
    # tiled/streamed variant (grid over niter x row-tiles).
    out_res = ppnp_forward(x, w1, b1, w2, b2, a_norm,
                           alpha=ALPHA, niter=NITER, variant="resident")
    out_til = ppnp_forward(x, w1, b1, w2, b2, a_norm,
                           alpha=ALPHA, niter=NITER, variant="tiled",
                           row_tile=128)
    out_res, out_til = jax.block_until_ready((out_res, out_til))

    ref = ppnp_reference(x, w1, b1, w2, b2, a_norm, ALPHA, NITER)
    assert out_res.shape == (N, NCLASS)
    assert out_til.shape == (N, NCLASS)
    assert jnp.allclose(out_res, ref, atol=1e-2, rtol=1e-2), \
        float(jnp.max(jnp.abs(out_res - ref)))
    assert jnp.allclose(out_til, ref, atol=1e-2, rtol=1e-2), \
        float(jnp.max(jnp.abs(out_til - ref)))

    print("KERNEL_OK")
</pallas_src>

<mosaic_0001>
module attributes {stable_mosaic.version = 11 : i64} {
  func.func @ppnp_resident_kernel(%arg0: memref<256x32xbf16, #tpu.memory_space<vmem>>, %arg1: memref<32x32xbf16, #tpu.memory_space<vmem>>, %arg2: memref<1x32xf32, #tpu.memory_space<vmem>>, %arg3: memref<32x128xbf16, #tpu.memory_space<vmem>>, %arg4: memref<1x128xf32, #tpu.memory_space<vmem>>, %arg5: memref<256x256xbf16, #tpu.memory_space<any>>, %arg6: memref<256x128xf32, #tpu.memory_space<vmem>>, %arg7: memref<256x256xbf16, #tpu.memory_space<vmem>>, %arg8: memref<2x256x128xbf16, #tpu.memory_space<vmem>>, %arg9: memref<256x128xf32, #tpu.memory_space<vmem>>, %arg10: memref<!tpu.dma_semaphore, #tpu.memory_space<semaphore_mem>>) attributes {dimension_semantics = [], scalar_prefetch = 0 : i64, scratch_operands = 4 : i64, tpu.core_type = #tpu.core_type<tc>} {
    tpu.enqueue_dma source(%arg5 : memref<256x256xbf16, #tpu.memory_space<any>>) target(%arg7 : memref<256x256xbf16, #tpu.memory_space<vmem>>) target_semaphore(%arg10 : memref<!tpu.dma_semaphore, #tpu.memory_space<semaphore_mem>>)
    %c0 = arith.constant 0 : index
    %c0_0 = arith.constant 0 : index
    %0 = vector.load %arg0[%c0, %c0_0] : memref<256x32xbf16, #tpu.memory_space<vmem>>, vector<256x32xbf16>
    %c0_1 = arith.constant 0 : index
    %c0_2 = arith.constant 0 : index
    %1 = vector.load %arg1[%c0_1, %c0_2] : memref<32x32xbf16, #tpu.memory_space<vmem>>, vector<32x32xbf16>
    %cst = arith.constant dense<0.000000e+00> : vector<256x32xf32>
    %2 = tpu.matmul %0, %1, %cst {dimension_numbers = #tpu.dot_dimension_numbers<[1], [0], [0], [1], [0, 0, 1, 1], [], []>} : vector<256x32xbf16>, vector<32x32xbf16>, vector<256x32xf32> -> vector<256x32xf32>
    %c0_3 = arith.constant 0 : index
    %c0_4 = arith.constant 0 : index
    %3 = vector.load %arg2[%c0_3, %c0_4] : memref<1x32xf32, #tpu.memory_space<vmem>>, vector<1x32xf32>
    %4 = vector.broadcast %3 : vector<1x32xf32> to vector<256x32xf32>
    %5 = arith.addf %2, %4 : vector<256x32xf32>
    %cst_5 = arith.constant 0.000000e+00 : f32
    %6 = vector.broadcast %cst_5 : f32 to vector<256x32xf32>
    %7 = arith.maximumf %5, %6 : vector<256x32xf32>
    %8 = arith.truncf %7 : vector<256x32xf32> to vector<256x32xbf16>
    %c0_6 = arith.constant 0 : index
    %c0_7 = arith.constant 0 : index
    %9 = vector.load %arg3[%c0_6, %c0_7] : memref<32x128xbf16, #tpu.memory_space<vmem>>, vector<32x128xbf16>
    %cst_8 = arith.constant dense<0.000000e+00> : vector<256x128xf32>
    %10 = tpu.matmul %8, %9, %cst_8 {dimension_numbers = #tpu.dot_dimension_numbers<[1], [0], [0], [1], [0, 0, 1, 1], [], []>} : vector<256x32xbf16>, vector<32x128xbf16>, vector<256x128xf32> -> vector<256x128xf32>
    %c0_9 = arith.constant 0 : index
    %c0_10 = arith.constant 0 : index
    %11 = vector.load %arg4[%c0_9, %c0_10] : memref<1x128xf32, #tpu.memory_space<vmem>>, vector<1x128xf32>
    %12 = vector.broadcast %11 : vector<1x128xf32> to vector<256x128xf32>
    %13 = arith.addf %10, %12 : vector<256x128xf32>
    %14 = arith.truncf %13 : vector<256x128xf32> to vector<256x128xbf16>
    %c0_11 = arith.constant 0 : index
    %c0_12 = arith.constant 0 : index
    %c0_13 = arith.constant 0 : index
    %15 = vector.load %arg8[%c0_11, %c0_12, %c0_13] : memref<2x256x128xbf16, #tpu.memory_space<vmem>>, vector<1x256x128xbf16>
    %16 = vector.shape_cast %15 : vector<1x256x128xbf16> to vector<256x128xbf16>
    %17 = vector.shape_cast %14 : vector<256x128xbf16> to vector<1x256x128xbf16>
    tpu.vector_store %arg8[%c0_11, %c0_12, %c0_13], %17 {strides = array<i32>} : memref<2x256x128xbf16, #tpu.memory_space<vmem>>, vector<1x256x128xbf16>,
    %cst_14 = arith.constant 5.000000e-01 : f32
    %18 = vector.broadcast %cst_14 : f32 to vector<256x128xf32>
    %19 = arith.mulf %18, %13 : vector<256x128xf32>
    %c0_15 = arith.constant 0 : index
    %c0_16 = arith.constant 0 : index
    %20 = vector.load %arg9[%c0_15, %c0_16] : memref<256x128xf32, #tpu.memory_space<vmem>>, vector<256x128xf32>
    tpu.vector_store %arg9[%c0_15, %c0_16], %19 {strides = array<i32>} : memref<256x128xf32, #tpu.memory_space<vmem>>, vector<256x128xf32>,
    tpu.wait_dma2 semaphore(%arg10 : memref<!tpu.dma_semaphore, #tpu.memory_space<semaphore_mem>>) src(%arg5 : memref<256x256xbf16, #tpu.memory_space<any>>) dst(%arg7 : memref<256x256xbf16, #tpu.memory_space<vmem>>)
    %c0_17 = arith.constant 0 : index
    %c0_18 = arith.constant 0 : index
    %21 = vector.load %arg7[%c0_17, %c0_18] : memref<256x256xbf16, #tpu.memory_space<vmem>>, vector<256x256xbf16>
    %c0_19 = arith.constant 0 : index
    %c0_20 = arith.constant 0 : index
    %c0_21 = arith.constant 0 : index
    %22 = vector.load %arg8[%c0_19, %c0_20, %c0_21] : memref<2x256x128xbf16, #tpu.memory_space<vmem>>, vector<1x256x128xbf16>
    %23 = vector.shape_cast %22 : vector<1x256x128xbf16> to vector<256x128xbf16>
    %cst_22 = arith.constant dense<0.000000e+00> : vector<256x128xf32>
    %24 = tpu.matmul %21, %23, %cst_22 {dimension_numbers = #tpu.dot_dimension_numbers<[1], [0], [0], [1], [0, 0, 1, 1], [], []>} : vector<256x256xbf16>, vector<256x128xbf16>, vector<256x128xf32> -> vector<256x128xf32>
    %c0_23 = arith.constant 0 : index
    %c0_24 = arith.constant 0 : index
    %25 = vector.load %arg9[%c0_23, %c0_24] : memref<256x128xf32, #tpu.memory_space<vmem>>, vector<256x128xf32>
    %26 = arith.addf %24, %25 : vector<256x128xf32>
    %27 = arith.truncf %26 : vector<256x128xf32> to vector<256x128xbf16>
    %c1 = arith.constant 1 : index
    %c0_25 = arith.constant 0 : index
    %c0_26 = arith.constant 0 : index
    %28 = vector.load %arg8[%c1, %c0_25, %c0_26] : memref<2x256x128xbf16, #tpu.memory_space<vmem>>, vector<1x256x128xbf16>
    %29 = vector.shape_cast %28 : vector<1x256x128xbf16> to vector<256x128xbf16>
    %30 = vector.shape_cast %27 : vector<256x128xbf16> to vector<1x256x128xbf16>
    tpu.vector_store %arg8[%c1, %c0_25, %c0_26], %30 {strides = array<i32>} : memref<2x256x128xbf16, #tpu.memory_space<vmem>>, vector<1x256x128xbf16>,
    %c0_27 = arith.constant 0 : index
    %c0_28 = arith.constant 0 : index
    %31 = vector.load %arg7[%c0_27, %c0_28] : memref<256x256xbf16, #tpu.memory_space<vmem>>, vector<256x256xbf16>
    %c1_29 = arith.constant 1 : index
    %c0_30 = arith.constant 0 : index
    %c0_31 = arith.constant 0 : index
    %32 = vector.load %arg8[%c1_29, %c0_30, %c0_31] : memref<2x256x128xbf16, #tpu.memory_space<vmem>>, vector<1x256x128xbf16>
    %33 = vector.shape_cast %32 : vector<1x256x128xbf16> to vector<256x128xbf16>
    %cst_32 = arith.constant dense<0.000000e+00> : vector<256x128xf32>
    %34 = tpu.matmul %31, %33, %cst_32 {dimension_numbers = #tpu.dot_dimension_numbers<[1], [0], [0], [1], [0, 0, 1, 1], [], []>} : vector<256x256xbf16>, vector<256x128xbf16>, vector<256x128xf32> -> vector<256x128xf32>
    %c0_33 = arith.constant 0 : index
    %c0_34 = arith.constant 0 : index
    %35 = vector.load %arg9[%c0_33, %c0_34] : memref<256x128xf32, #tpu.memory_space<vmem>>, vector<256x128xf32>
    %36 = arith.addf %34, %35 : vector<256x128xf32>
    %37 = arith.truncf %36 : vector<256x128xf32> to vector<256x128xbf16>
    %c0_35 = arith.constant 0 : index
    %c0_36 = arith.constant 0 : index
    %c0_37 = arith.constant 0 : index
    %38 = vector.load %arg8[%c0_35, %c0_36, %c0_37] : memref<2x256x128xbf16, #tpu.memory_space<vmem>>, vector<1x256x128xbf16>
    %39 = vector.shape_cast %38 : vector<1x256x128xbf16> to vector<256x128xbf16>
    %40 = vector.shape_cast %37 : vector<256x128xbf16> to vector<1x256x128xbf16>
    tpu.vector_store %arg8[%c0_35, %c0_36, %c0_37], %40 {strides = array<i32>} : memref<2x256x128xbf16, #tpu.memory_space<vmem>>, vector<1x256x128xbf16>,
    %c0_38 = arith.constant 0 : index
    %c0_39 = arith.constant 0 : index
    %41 = vector.load %arg7[%c0_38, %c0_39] : memref<256x256xbf16, #tpu.memory_space<vmem>>, vector<256x256xbf16>
    %c0_40 = arith.constant 0 : index
    %c0_41 = arith.constant 0 : index
    %c0_42 = arith.constant 0 : index
    %42 = vector.load %arg8[%c0_40, %c0_41, %c0_42] : memref<2x256x128xbf16, #tpu.memory_space<vmem>>, vector<1x256x128xbf16>
    %43 = vector.shape_cast %42 : vector<1x256x128xbf16> to vector<256x128xbf16>
    %cst_43 = arith.constant dense<0.000000e+00> : vector<256x128xf32>
    %44 = tpu.matmul %41, %43, %cst_43 {dimension_numbers = #tpu.dot_dimension_numbers<[1], [0], [0], [1], [0, 0, 1, 1], [], []>} : vector<256x256xbf16>, vector<256x128xbf16>, vector<256x128xf32> -> vector<256x128xf32>
    %c0_44 = arith.constant 0 : index
    %c0_45 = arith.constant 0 : index
    %45 = vector.load %arg9[%c0_44, %c0_45] : memref<256x128xf32, #tpu.memory_space<vmem>>, vector<256x128xf32>
    %46 = arith.addf %44, %45 : vector<256x128xf32>
    %47 = arith.truncf %46 : vector<256x128xf32> to vector<256x128xbf16>
    %c1_46 = arith.constant 1 : index
    %c0_47 = arith.constant 0 : index
    %c0_48 = arith.constant 0 : index
    %48 = vector.load %arg8[%c1_46, %c0_47, %c0_48] : memref<2x256x128xbf16, #tpu.memory_space<vmem>>, vector<1x256x128xbf16>
    %49 = vector.shape_cast %48 : vector<1x256x128xbf16> to vector<256x128xbf16>
    %50 = vector.shape_cast %47 : vector<256x128xbf16> to vector<1x256x128xbf16>
    tpu.vector_store %arg8[%c1_46, %c0_47, %c0_48], %50 {strides = array<i32>} : memref<2x256x128xbf16, #tpu.memory_space<vmem>>, vector<1x256x128xbf16>,
    %c0_49 = arith.constant 0 : index
    %c0_50 = arith.constant 0 : index
    %51 = vector.load %arg7[%c0_49, %c0_50] : memref<256x256xbf16, #tpu.memory_space<vmem>>, vector<256x256xbf16>
    %c1_51 = arith.constant 1 : index
    %c0_52 = arith.constant 0 : index
    %c0_53 = arith.constant 0 : index
    %52 = vector.load %arg8[%c1_51, %c0_52, %c0_53] : memref<2x256x128xbf16, #tpu.memory_space<vmem>>, vector<1x256x128xbf16>
    %53 = vector.shape_cast %52 : vector<1x256x128xbf16> to vector<256x128xbf16>
    %cst_54 = arith.constant dense<0.000000e+00> : vector<256x128xf32>
    %54 = tpu.matmul %51, %53, %cst_54 {dimension_numbers = #tpu.dot_dimension_numbers<[1], [0], [0], [1], [0, 0, 1, 1], [], []>} : vector<256x256xbf16>, vector<256x128xbf16>, vector<256x128xf32> -> vector<256x128xf32>
    %c0_55 = arith.constant 0 : index
    %c0_56 = arith.constant 0 : index
    %55 = vector.load %arg9[%c0_55, %c0_56] : memref<256x128xf32, #tpu.memory_space<vmem>>, vector<256x128xf32>
    %56 = arith.addf %54, %55 : vector<256x128xf32>
    %57 = arith.truncf %56 : vector<256x128xf32> to vector<256x128xbf16>
    %c0_57 = arith.constant 0 : index
    %c0_58 = arith.constant 0 : index
    %c0_59 = arith.constant 0 : index
    %58 = vector.load %arg8[%c0_57, %c0_58, %c0_59] : memref<2x256x128xbf16, #tpu.memory_space<vmem>>, vector<1x256x128xbf16>
    %59 = vector.shape_cast %58 : vector<1x256x128xbf16> to vector<256x128xbf16>
    %60 = vector.shape_cast %57 : vector<256x128xbf16> to vector<1x256x128xbf16>
    tpu.vector_store %arg8[%c0_57, %c0_58, %c0_59], %60 {strides = array<i32>} : memref<2x256x128xbf16, #tpu.memory_space<vmem>>, vector<1x256x128xbf16>,
    %c0_60 = arith.constant 0 : index
    %c0_61 = arith.constant 0 : index
    %61 = vector.load %arg7[%c0_60, %c0_61] : memref<256x256xbf16, #tpu.memory_space<vmem>>, vector<256x256xbf16>
    %c0_62 = arith.constant 0 : index
    %c0_63 = arith.constant 0 : index
    %c0_64 = arith.constant 0 : index
    %62 = vector.load %arg8[%c0_62, %c0_63, %c0_64] : memref<2x256x128xbf16, #tpu.memory_space<vmem>>, vector<1x256x128xbf16>
    %63 = vector.shape_cast %62 : vector<1x256x128xbf16> to vector<256x128xbf16>
    %cst_65 = arith.constant dense<0.000000e+00> : vector<256x128xf32>
    %64 = tpu.matmul %61, %63, %cst_65 {dimension_numbers = #tpu.dot_dimension_numbers<[1], [0], [0], [1], [0, 0, 1, 1], [], []>} : vector<256x256xbf16>, vector<256x128xbf16>, vector<256x128xf32> -> vector<256x128xf32>
    %c0_66 = arith.constant 0 : index
    %c0_67 = arith.constant 0 : index
    %65 = vector.load %arg9[%c0_66, %c0_67] : memref<256x128xf32, #tpu.memory_space<vmem>>, vector<256x128xf32>
    %66 = arith.addf %64, %65 : vector<256x128xf32>
    %67 = arith.truncf %66 : vector<256x128xf32> to vector<256x128xbf16>
    %c1_68 = arith.constant 1 : index
    %c0_69 = arith.constant 0 : index
    %c0_70 = arith.constant 0 : index
    %68 = vector.load %arg8[%c1_68, %c0_69, %c0_70] : memref<2x256x128xbf16, #tpu.memory_space<vmem>>, vector<1x256x128xbf16>
    %69 = vector.shape_cast %68 : vector<1x256x128xbf16> to vector<256x128xbf16>
    %70 = vector.shape_cast %67 : vector<256x128xbf16> to vector<1x256x128xbf16>
    tpu.vector_store %arg8[%c1_68, %c0_69, %c0_70], %70 {strides = array<i32>} : memref<2x256x128xbf16, #tpu.memory_space<vmem>>, vector<1x256x128xbf16>,
    %c0_71 = arith.constant 0 : index
    %c0_72 = arith.constant 0 : index
    %71 = vector.load %arg7[%c0_71, %c0_72] : memref<256x256xbf16, #tpu.memory_space<vmem>>, vector<256x256xbf16>
    %c1_73 = arith.constant 1 : index
    %c0_74 = arith.constant 0 : index
    %c0_75 = arith.constant 0 : index
    %72 = vector.load %arg8[%c1_73, %c0_74, %c0_75] : memref<2x256x128xbf16, #tpu.memory_space<vmem>>, vector<1x256x128xbf16>
    %73 = vector.shape_cast %72 : vector<1x256x128xbf16> to vector<256x128xbf16>
    %cst_76 = arith.constant dense<0.000000e+00> : vector<256x128xf32>
    %74 = tpu.matmul %71, %73, %cst_76 {dimension_numbers = #tpu.dot_dimension_numbers<[1], [0], [0], [1], [0, 0, 1, 1], [], []>} : vector<256x256xbf16>, vector<256x128xbf16>, vector<256x128xf32> -> vector<256x128xf32>
    %c0_77 = arith.constant 0 : index
    %c0_78 = arith.constant 0 : index
    %75 = vector.load %arg9[%c0_77, %c0_78] : memref<256x128xf32, #tpu.memory_space<vmem>>, vector<256x128xf32>
    %76 = arith.addf %74, %75 : vector<256x128xf32>
    %77 = arith.truncf %76 : vector<256x128xf32> to vector<256x128xbf16>
    %c0_79 = arith.constant 0 : index
    %c0_80 = arith.constant 0 : index
    %c0_81 = arith.constant 0 : index
    %78 = vector.load %arg8[%c0_79, %c0_80, %c0_81] : memref<2x256x128xbf16, #tpu.memory_space<vmem>>, vector<1x256x128xbf16>
    %79 = vector.shape_cast %78 : vector<1x256x128xbf16> to vector<256x128xbf16>
    %80 = vector.shape_cast %77 : vector<256x128xbf16> to vector<1x256x128xbf16>
    tpu.vector_store %arg8[%c0_79, %c0_80, %c0_81], %80 {strides = array<i32>} : memref<2x256x128xbf16, #tpu.memory_space<vmem>>, vector<1x256x128xbf16>,
    %c0_82 = arith.constant 0 : index
    %c0_83 = arith.constant 0 : index
    %81 = vector.load %arg6[%c0_82, %c0_83] : memref<256x128xf32, #tpu.memory_space<vmem>>, vector<256x128xf32>
    tpu.vector_store %arg6[%c0_82, %c0_83], %76 {strides = array<i32>} : memref<256x128xf32, #tpu.memory_space<vmem>>, vector<256x128xf32>,
    return
  }
}

</mosaic_0001>

<bundles_post_ra>
// kernel: tpu_custom_call.1
= control target key start
LH: loop header
LB: loop body
LE: loop exit
PB: predicated region body
PF: predicated region fallthrough
CT: control target
= control target key end

     0   :  { %11 = vsyncpa [#allocation7], 0  ;;  %s27_s21 = sld [smem:[#allocation0]]   ;;  %s3369_s22 = smov [#allocation2]   ;;  %vm193_vm0 = vcmask 261120   ;;  %s4623_s0 = inlined_call_operand.vmem [shape: bf16[256,32], index: 0, kind: input, shape index: {}]   ;;  %s4624_s1 = inlined_call_operand.vmem [shape: bf16[32,32], index: 1, kind: input, shape index: {}]   ;;  %s4625_s2 = inlined_call_operand.vmem [shape: f32[1,32], index: 2, kind: input, shape index: {}]   ;;  %s4626_s3 = inlined_call_operand.vmem [shape: bf16[32,128], index: 3, kind: input, shape index: {}]   ;;  %s4627_s4 = inlined_call_operand.vmem [shape: f32[1,128], index: 4, kind: input, shape index: {}]   ;;  %s4628_s5 = inlined_call_operand.hbm [shape: bf16[256,256], index: 5, kind: input, shape index: {}]   ;;  %s4629_s6 = inlined_call_operand.hbm [shape: f32[256,128], index: 6, kind: output, shape index: {}]  }
   0x1   :  { %s35_s23 = sshll.u32 %s3369_s22, 4  ;;  %s3370_s24 = smov 256   ;;  %s36_s23 = int_to_ptr.vmem [resolvable:$true] %s35_s23 }
   0x2   :  { %39 = sst [smem:[#allocation9]] %s3370_s24  ;;  %s3371_s25 = smov 2  }
   0x3   :  { %41 = sst [smem:[#allocation9 + $0x1]] %s3370_s24  ;;  %s3372_s26 = smov 64  }
   0x4   :  { %43 = sst [smem:[#allocation9 + $0x2]] %s3371_s25  ;;  %s3373_s28 = smov 128  }
   0x5   :  { %45 = sst [smem:[#allocation9 + $0x3]] %s3372_s26  ;;  %s3374_s30 = smov 4  }
   0x6   :  { %s2476_s27 = sshll.u32 %s27_s21, 26  ;;  %47 = sst [smem:[#allocation9 + $0x4]] %s3373_s28 }
   0x7   :  { %s2477_s29 = sadd.s32 134217728, %s2476_s27  ;;  %49 = sst [smem:[#allocation9 + $0x5]] %s3371_s25 }
   0x8   :  { %51 = sst [smem:[#allocation9 + $0x6]] %s3373_s28  ;;  %s3375_s7 = smov [#allocation5]  }
   0x9   :  { %53 = sst [smem:[#allocation9 + $0x7]] %s3372_s26  ;;  %s3376_s8 = smov [#allocation8]  }
   0xa   :  { %55 = sst [smem:[#allocation9 + $0x8]] %s3374_s30 }
   0xb   :  { %57 = dma.general %s4628_s5, 4096, %s36_s23, %s3375_s7, %s3376_s8, [#allocation9], %s2477_s29, 0  }
   0xc   :  { %v3323_v0 = vld [vmem:[%s4624_s1] sm:$0xff]   ;;  %v3324_v1 = vld [vmem:[%s4624_s1 + $0x8] sm:$0xff]   ;;  %v3327_v4 = vld [vmem:[%s4623_s0 + $0x10] sm:$0xff]  }
   0xd   :  { %3241 = vmatprep.subr.bf16.mxu0 %v3323_v0  ;;  %v3325_v2 = vld [vmem:[%s4623_s0] sm:$0xff]   ;;  %v3326_v3 = vld [vmem:[%s4623_s0 + $0x8] sm:$0xff]   ;;  %v3328_v5 = vld [vmem:[%s4623_s0 + $0x18] sm:$0xff]  }
   0xe   :  { %3242 = vmatpush3.bf16.msra.mxu0 %v3323_v0  ;;  %3245 = vmatprep.mubr.msk.bf16.mxu0 %vm193_vm0, %v3325_v2  ;;  %v3329_v6 = vld [vmem:[%s4623_s0 + $0x20] sm:$0xff]   ;;  %v3330_v7 = vld [vmem:[%s4623_s0 + $0x28] sm:$0xff]   ;;  %v3331_v8 = vld [vmem:[%s4623_s0 + $0x30] sm:$0xff]  }
   0xf   :  { %3243 = vmatprep.subr.bf16.mxu0 %v3324_v1  ;;  %v3332_v9 = vld [vmem:[%s4623_s0 + $0x38] sm:$0xff]   ;;  %v3333_v10 = vld [vmem:[%s4623_s0 + $0x40] sm:$0xff]   ;;  %v3334_v11 = vld [vmem:[%s4623_s0 + $0x48] sm:$0xff]  }
  0x10   :  { %v3335_v12 = vld [vmem:[%s4623_s0 + $0x50] sm:$0xff]   ;;  %v3336_v13 = vld [vmem:[%s4623_s0 + $0x58] sm:$0xff]   ;;  %v3337_v14 = vld [vmem:[%s4623_s0 + $0x60] sm:$0xff]  }
  0x11   :  { %v3338_v15 = vld [vmem:[%s4623_s0 + $0x68] sm:$0xff]   ;;  %v3339_v16 = vld [vmem:[%s4623_s0 + $0x70] sm:$0xff]   ;;  %v3340_v17 = vld [vmem:[%s4623_s0 + $0x78] sm:$0xff]  }
  0x12   :  { %3244 = vmatpush3.bf16.msra.mxu0 %v3324_v1  ;;  %v3341_v18 = vld [vmem:[%s4626_s3] sm:$0xff]   ;;  %v3342_v19 = vld [vmem:[%s4626_s3 + $0x8] sm:$0xff]  }
  0x13   :  { %3277 = vmatprep.subr.bf16.mxu1 %v3341_v18  ;;  %v3498_v20 = vld [vmem:[%s4625_s2] ss:$0 sm:$0xff] }
  0x14   :  { %3278 = vmatpush3.bf16.msra.mxu1 %v3341_v18 }
  0x15   :  { %3246 = vmatmul.mubr.msk.bf16.vlgmr.msra.gmra.mrb[0].mxu0 %vm193_vm0, %v3326_v3  ;;  %3279 = vmatprep.subr.bf16.mxu1 %v3342_v19 }
  0x16   :  { %3249 = vmatprep.mubr.msk.bf16.mxu0 %vm193_vm0, %v3327_v4 }
  0x18   :  { %3280 = vmatpush3.bf16.msra.mxu1 %v3342_v19 }
  0x1d   :  { %3250 = vmatmul.mubr.msk.bf16.gmra.mrb[4].mxu0 %vm193_vm0, %v3328_v5 }
  0x1e   :  { %3253 = vmatprep.mubr.msk.bf16.mxu0 %vm193_vm0, %v3329_v6 }
  0x25   :  { %3254 = vmatmul.mubr.msk.bf16.gmra.mrb[8].mxu0 %vm193_vm0, %v3330_v7 }
  0x26   :  { %3257 = vmatprep.mubr.msk.bf16.mxu0 %vm193_vm0, %v3331_v8 }
  0x2d   :  { %3258 = vmatmul.mubr.msk.bf16.gmra.mrb[12].mxu0 %vm193_vm0, %v3332_v9 }
  0x2e   :  { %3261 = vmatprep.mubr.msk.bf16.mxu0 %vm193_vm0, %v3333_v10 }
  0x35   :  { %3262 = vmatmul.mubr.msk.bf16.gmra.mrb[16].mxu0 %vm193_vm0, %v3334_v11 }
  0x36   :  { %3265 = vmatprep.mubr.msk.bf16.mxu0 %vm193_vm0, %v3335_v12 }
  0x3d   :  { %3266 = vmatmul.mubr.msk.bf16.gmra.mrb[20].mxu0 %vm193_vm0, %v3336_v13 }
  0x3e   :  { %3269 = vmatprep.mubr.msk.bf16.mxu0 %vm193_vm0, %v3337_v14 }
  0x45   :  { %3270 = vmatmul.mubr.msk.bf16.gmra.mrb[24].mxu0 %vm193_vm0, %v3338_v15 }
  0x46   :  { %3273 = vmatprep.mubr.msk.bf16.mxu0 %vm193_vm0, %v3339_v16 }
  0x4d   :  { %3274 = vmatmul.mubr.msk.bf16.gmra.mrb[28].mxu0 %vm193_vm0, %v3340_v17 }
  0xe8   :  { %v3247_v21 = vpop.f32.mrb[0].mxu0 }
  0xe9   :  { %v285_v22 = vadd.f32 %v3247_v21, %v3498_v20  ;;  %v276_v23 = vpop.f32.mrb[1].mxu0 }
  0xea   :  { %v277_v24 = vadd.f32 %v3498_v20, %v276_v23  ;;  %v3248_v25 = vpop.f32.mrb[2].mxu0 }
  0xeb   :  { %v288_v26 = vadd.f32 %v3248_v25, %v3498_v20  ;;  %v279_v27 = vpop.f32.mrb[3].mxu0  ;;  %v405_v29 = vmax.f32 %v285_v22, 0.0 }
  0xec   :  { %v280_v28 = vadd.f32 %v3498_v20, %v279_v27  ;;  %v403_v31 = vmax.f32 %v277_v24, 0.0 }
  0xed   :  { %v406_v30 = vmax.f32 %v288_v26, 0.0 }
  0xee   :  { %v404_v32 = vmax.f32 %v280_v28, 0.0 }
  0xef   :  { %v436_v33 = vpack.c.bf16 %v406_v30, %v405_v29 }
  0xf0   :  { %v3251_v34 = vpop.f32.mrb[4].mxu0  ;;  %v435_v35 = vpack.c.bf16 %v404_v32, %v403_v31 }
  0xf1   :  { %v301_v36 = vadd.f32 %v3251_v34, %v3498_v20  ;;  %v292_v37 = vpop.f32.mrb[5].mxu0 }
  0xf2   :  { %v293_v38 = vadd.f32 %v3498_v20, %v292_v37  ;;  %v3252_v39 = vpop.f32.mrb[6].mxu0  ;;  %3281 = vmatprep.mubr.msk.bf16.mxu1 %vm193_vm0, %v435_v35 }
  0xf3   :  { %v304_v40 = vadd.f32 %v3252_v39, %v3498_v20  ;;  %v295_v41 = vpop.f32.mrb[7].mxu0  ;;  %3282 = vmatmul.mubr.msk.bf16.vlgmr.msra.gmra.mrb[0].mxu1 %vm193_vm0, %v436_v33  ;;  %v409_v43 = vmax.f32 %v301_v36, 0.0 }
  0xf4   :  { %v296_v42 = vadd.f32 %v3498_v20, %v295_v41  ;;  %v407_v45 = vmax.f32 %v293_v38, 0.0 }
  0xf5   :  { %v410_v44 = vmax.f32 %v304_v40, 0.0 }
  0xf6   :  { %v408_v46 = vmax.f32 %v296_v42, 0.0 }
  0xf7   :  { %v438_v47 = vpack.c.bf16 %v410_v44, %v409_v43 }
  0xf8   :  { %v437_v48 = vpack.c.bf16 %v408_v46, %v407_v45  ;;  %v3255_v49 = vpop.f32.mrb[8].mxu0 }
  0xf9   :  { %v317_v50 = vadd.f32 %v3255_v49, %v3498_v20  ;;  %v308_v51 = vpop.f32.mrb[9].mxu0 }
  0xfa   :  { %v309_v52 = vadd.f32 %v3498_v20, %v308_v51  ;;  %v3256_v53 = vpop.f32.mrb[10].mxu0  ;;  %3285 = vmatprep.mubr.msk.bf16.mxu1 %vm193_vm0, %v437_v48 }
  0xfb   :  { %v320_v54 = vadd.f32 %v3256_v53, %v3498_v20  ;;  %v311_v55 = vpop.f32.mrb[11].mxu0  ;;  %3286 = vmatmul.mubr.msk.bf16.gmra.mrb[4].mxu1 %vm193_vm0, %v438_v47  ;;  %v413_v57 = vmax.f32 %v317_v50, 0.0 }
  0xfc   :  { %v312_v56 = vadd.f32 %v3498_v20, %v311_v55  ;;  %v411_v59 = vmax.f32 %v309_v52, 0.0 }
  0xfd   :  { %v414_v58 = vmax.f32 %v320_v54, 0.0 }
  0xfe   :  { %v412_v60 = vmax.f32 %v312_v56, 0.0 }
  0xff   :  { %v440_v61 = vpack.c.bf16 %v414_v58, %v413_v57 }
 0x100   :  { %v439_v62 = vpack.c.bf16 %v412_v60, %v411_v59  ;;  %v3259_v63 = vpop.f32.mrb[12].mxu0 }
 0x101   :  { %v333_v0 = vadd.f32 %v3259_v63, %v3498_v20  ;;  %v324_v1 = vpop.f32.mrb[13].mxu0 }
 0x102   :  { %v325_v2 = vadd.f32 %v3498_v20, %v324_v1  ;;  %v3260_v3 = vpop.f32.mrb[14].mxu0  ;;  %3289 = vmatprep.mubr.msk.bf16.mxu1 %vm193_vm0, %v439_v62 }
 0x103   :  { %v336_v4 = vadd.f32 %v3260_v3, %v3498_v20  ;;  %v327_v5 = vpop.f32.mrb[15].mxu0  ;;  %3290 = vmatmul.mubr.msk.bf16.gmra.mrb[8].mxu1 %vm193_vm0, %v440_v61  ;;  %v417_v7 = vmax.f32 %v333_v0, 0.0 }
 0x104   :  { %v328_v6 = vadd.f32 %v3498_v20, %v327_v5  ;;  %v415_v9 = vmax.f32 %v325_v2, 0.0 }
 0x105   :  { %v418_v8 = vmax.f32 %v336_v4, 0.0 }
 0x106   :  { %v416_v10 = vmax.f32 %v328_v6, 0.0  ;;  %v3551_v6 = vld [vmem:[%s4627_s4] ss:$0 sm:$0xff] }
 0x107   :  { %v442_v11 = vpack.c.bf16 %v418_v8, %v417_v7 }
 0x108   :  { %v441_v12 = vpack.c.bf16 %v416_v10, %v415_v9  ;;  %v3263_v13 = vpop.f32.mrb[16].mxu0 }
 0x109   :  { %v349_v14 = vadd.f32 %v3263_v13, %v3498_v20  ;;  %v340_v15 = vpop.f32.mrb[17].mxu0 }
 0x10a   :  { %v341_v16 = vadd.f32 %v3498_v20, %v340_v15  ;;  %v3264_v17 = vpop.f32.mrb[18].mxu0  ;;  %3293 = vmatprep.mubr.msk.bf16.mxu1 %vm193_vm0, %v441_v12 }
 0x10b   :  { %v352_v18 = vadd.f32 %v3264_v17, %v3498_v20  ;;  %v343_v19 = vpop.f32.mrb[19].mxu0  ;;  %3294 = vmatmul.mubr.msk.bf16.gmra.mrb[12].mxu1 %vm193_vm0, %v442_v11  ;;  %v421_v22 = vmax.f32 %v349_v14, 0.0 }
 0x10c   :  { %v344_v21 = vadd.f32 %v3498_v20, %v343_v19  ;;  %v419_v24 = vmax.f32 %v341_v16, 0.0 }
 0x10d   :  { %v422_v23 = vmax.f32 %v352_v18, 0.0 }
 0x10e   :  { %v420_v25 = vmax.f32 %v344_v21, 0.0 }
 0x10f   :  { %v444_v26 = vpack.c.bf16 %v422_v23, %v421_v22 }
 0x110   :  { %v443_v27 = vpack.c.bf16 %v420_v25, %v419_v24  ;;  %v3267_v28 = vpop.f32.mrb[20].mxu0 }
 0x111   :  { %v365_v29 = vadd.f32 %v3267_v28, %v3498_v20  ;;  %v356_v30 = vpop.f32.mrb[21].mxu0 }
 0x112   :  { %v357_v31 = vadd.f32 %v3498_v20, %v356_v30  ;;  %v3268_v32 = vpop.f32.mrb[22].mxu0  ;;  %3297 = vmatprep.mubr.msk.bf16.mxu1 %vm193_vm0, %v443_v27 }
 0x113   :  { %v368_v33 = vadd.f32 %v3268_v32, %v3498_v20  ;;  %v359_v34 = vpop.f32.mrb[23].mxu0  ;;  %3298 = vmatmul.mubr.msk.bf16.gmra.mrb[16].mxu1 %vm193_vm0, %v444_v26  ;;  %v425_v36 = vmax.f32 %v365_v29, 0.0 }
 0x114   :  { %v360_v35 = vadd.f32 %v3498_v20, %v359_v34  ;;  %v423_v38 = vmax.f32 %v357_v31, 0.0 }
 0x115   :  { %v426_v37 = vmax.f32 %v368_v33, 0.0 }
 0x116   :  { %v424_v39 = vmax.f32 %v360_v35, 0.0 }
 0x117   :  { %v446_v40 = vpack.c.bf16 %v426_v37, %v425_v36 }
 0x118   :  { %v445_v41 = vpack.c.bf16 %v424_v39, %v423_v38  ;;  %v3271_v42 = vpop.f32.mrb[24].mxu0 }
 0x119   :  { %v381_v43 = vadd.f32 %v3271_v42, %v3498_v20  ;;  %v372_v44 = vpop.f32.mrb[25].mxu0 }
 0x11a   :  { %v373_v45 = vadd.f32 %v3498_v20, %v372_v44  ;;  %v3272_v46 = vpop.f32.mrb[26].mxu0  ;;  %3301 = vmatprep.mubr.msk.bf16.mxu1 %vm193_vm0, %v445_v41 }
 0x11b   :  { %v384_v47 = vadd.f32 %v3272_v46, %v3498_v20  ;;  %v375_v48 = vpop.f32.mrb[27].mxu0  ;;  %3302 = vmatmul.mubr.msk.bf16.gmra.mrb[20].mxu1 %vm193_vm0, %v446_v40  ;;  %v429_v50 = vmax.f32 %v381_v43, 0.0 }
 0x11c   :  { %v376_v49 = vadd.f32 %v3498_v20, %v375_v48  ;;  %v427_v52 = vmax.f32 %v373_v45, 0.0 }
 0x11d   :  { %v430_v51 = vmax.f32 %v384_v47, 0.0 }
 0x11e   :  { %v428_v53 = vmax.f32 %v376_v49, 0.0 }
 0x11f   :  { %v448_v54 = vpack.c.bf16 %v430_v51, %v429_v50 }
 0x120   :  { %v447_v55 = vpack.c.bf16 %v428_v53, %v427_v52  ;;  %v3275_v56 = vpop.f32.mrb[28].mxu0 }
 0x121   :  { %v397_v57 = vadd.f32 %v3275_v56, %v3498_v20  ;;  %v388_v58 = vpop.f32.mrb[29].mxu0 }
 0x122   :  { %v389_v59 = vadd.f32 %v3498_v20, %v388_v58  ;;  %v3276_v60 = vpop.f32.mrb[30].mxu0  ;;  %3305 = vmatprep.mubr.msk.bf16.mxu1 %vm193_vm0, %v447_v55 }
 0x123   :  { %v400_v61 = vadd.f32 %v3276_v60, %v3498_v20  ;;  %v391_v62 = vpop.f32.mrb[31].mxu0  ;;  %3306 = vmatmul.mubr.msk.bf16.gmra.mrb[24].mxu1 %vm193_vm0, %v448_v54  ;;  %v433_v0 = vmax.f32 %v397_v57, 0.0 }
 0x124   :  { %v392_v63 = vadd.f32 %v3498_v20, %v391_v62  ;;  %v431_v2 = vmax.f32 %v389_v59, 0.0 }
 0x125   :  { %v434_v1 = vmax.f32 %v400_v61, 0.0 }
 0x126   :  { %v432_v3 = vmax.f32 %v392_v63, 0.0 }
 0x127   :  { %v450_v4 = vpack.c.bf16 %v434_v1, %v433_v0 }
 0x128   :  { %v449_v5 = vpack.c.bf16 %v432_v3, %v431_v2 }
 0x12a   :  { %3309 = vmatprep.mubr.msk.bf16.mxu1 %vm193_vm0, %v449_v5 }
 0x12b   :  { %3310 = vmatmul.mubr.msk.bf16.gmra.mrb[28].mxu1 %vm193_vm0, %v450_v4 }
 0x1c6   :  { %v3283_v7 = vpop.f32.mrb[0].mxu1 }
 0x1c7   :  { %v3554_v8 = vadd.f32 %v3283_v7, %v3551_v6  ;;  %v556_v20 = vpop.f32.mrb[1].mxu1 }
 0x1c8   :  { %v3557_v9 = vadd.f32 %v3551_v6, %v556_v20  ;;  %v3284_v10 = vpop.f32.mrb[2].mxu1 }
 0x1c9   :  { %v3560_v11 = vmul.f32 0.5, %v3554_v8  ;;  %v3563_v12 = vadd.f32 %v3284_v10, %v3551_v6  ;;  %v559_v13 = vpop.f32.mrb[3].mxu1 }
 0x1ca   :  { %v3566_v14 = vmul.f32 0.5, %v3557_v9  ;;  %v3569_v15 = vadd.f32 %v3551_v6, %v559_v13 }
 0x1cb   :  { %4739 = vst [vmem:[#allocation12_spill] sm:$0xff] %v3560_v11  ;;  %v3574_v17 = vmul.f32 0.5, %v3563_v12 }
 0x1cc   :  { %4740 = vst [vmem:[#allocation13_spill] sm:$0xff] %v3566_v14  ;;  %v3579_v19 = vmul.f32 0.5, %v3569_v15 }
 0x1cd   :  { %4741 = vst [vmem:[#allocation14_spill] sm:$0xff] %v3574_v17 }
 0x1ce   :  { %4742 = vst [vmem:[#allocation15_spill] sm:$0xff] %v3579_v19  ;;  %v3287_v21 = vpop.f32.mrb[4].mxu1 }
 0x1cf   :  { %v3582_v22 = vadd.f32 %v3287_v21, %v3551_v6  ;;  %v572_v23 = vpop.f32.mrb[5].mxu1 }
 0x1d0   :  { %v3585_v24 = vadd.f32 %v3551_v6, %v572_v23  ;;  %v3288_v25 = vpop.f32.mrb[6].mxu1 }
 0x1d1   :  { %v3588_v26 = vmul.f32 0.5, %v3582_v22  ;;  %v3591_v27 = vadd.f32 %v3288_v25, %v3551_v6  ;;  %v575_v28 = vpop.f32.mrb[7].mxu1 }
 0x1d2   :  { %v3594_v29 = vmul.f32 0.5, %v3585_v24  ;;  %v3597_v30 = vadd.f32 %v3551_v6, %v575_v28 }
 0x1d3   :  { %4743 = vst [vmem:[#allocation16_spill] sm:$0xff] %v3588_v26  ;;  %v3602_v32 = vmul.f32 0.5, %v3591_v27 }
 0x1d4   :  { %4744 = vst [vmem:[#allocation17_spill] sm:$0xff] %v3594_v29  ;;  %v3607_v34 = vmul.f32 0.5, %v3597_v30 }
 0x1d5   :  { %4745 = vst [vmem:[#allocation18_spill] sm:$0xff] %v3602_v32 }
 0x1d6   :  { %4746 = vst [vmem:[#allocation19_spill] sm:$0xff] %v3607_v34  ;;  %v3291_v35 = vpop.f32.mrb[8].mxu1 }
 0x1d7   :  { %v3610_v36 = vadd.f32 %v3291_v35, %v3551_v6  ;;  %v588_v37 = vpop.f32.mrb[9].mxu1 }
 0x1d8   :  { %v3613_v38 = vadd.f32 %v3551_v6, %v588_v37  ;;  %v3292_v39 = vpop.f32.mrb[10].mxu1 }
 0x1d9   :  { %v3616_v40 = vmul.f32 0.5, %v3610_v36  ;;  %v3619_v41 = vadd.f32 %v3292_v39, %v3551_v6  ;;  %v591_v42 = vpop.f32.mrb[11].mxu1 }
 0x1da   :  { %v3622_v43 = vmul.f32 0.5, %v3613_v38  ;;  %v3625_v44 = vadd.f32 %v3551_v6, %v591_v42 }
 0x1db   :  { %4747 = vst [vmem:[#allocation20_spill] sm:$0xff] %v3616_v40  ;;  %v3630_v46 = vmul.f32 0.5, %v3619_v41 }
 0x1dc   :  { %4748 = vst [vmem:[#allocation21_spill] sm:$0xff] %v3622_v43  ;;  %v3635_v48 = vmul.f32 0.5, %v3625_v44 }
 0x1dd   :  { %4749 = vst [vmem:[#allocation22_spill] sm:$0xff] %v3630_v46 }
 0x1de   :  { %4750 = vst [vmem:[#allocation23_spill] sm:$0xff] %v3635_v48  ;;  %v3295_v49 = vpop.f32.mrb[12].mxu1 }
 0x1df   :  { %v3638_v50 = vadd.f32 %v3295_v49, %v3551_v6  ;;  %v604_v51 = vpop.f32.mrb[13].mxu1 }
 0x1e0   :  { %v3641_v52 = vadd.f32 %v3551_v6, %v604_v51  ;;  %v3296_v53 = vpop.f32.mrb[14].mxu1 }
 0x1e1   :  { %v3644_v54 = vmul.f32 0.5, %v3638_v50  ;;  %v3647_v55 = vadd.f32 %v3296_v53, %v3551_v6  ;;  %v607_v56 = vpop.f32.mrb[15].mxu1 }
 0x1e2   :  { %v3650_v57 = vmul.f32 0.5, %v3641_v52  ;;  %v3653_v58 = vadd.f32 %v3551_v6, %v607_v56 }
 0x1e3   :  { %4751 = vst [vmem:[#allocation24_spill] sm:$0xff] %v3644_v54  ;;  %v3658_v60 = vmul.f32 0.5, %v3647_v55 }
 0x1e4   :  { %4752 = vst [vmem:[#allocation25_spill] sm:$0xff] %v3650_v57  ;;  %v3663_v62 = vmul.f32 0.5, %v3653_v58 }
 0x1e5   :  { %4753 = vst [vmem:[#allocation26_spill] sm:$0xff] %v3658_v60 }
 0x1e6   :  { %4754 = vst [vmem:[#allocation27_spill] sm:$0xff] %v3663_v62  ;;  %v3299_v63 = vpop.f32.mrb[16].mxu1 }
 0x1e7   :  { %v629_v0 = vadd.f32 %v3299_v63, %v3551_v6  ;;  %v620_v1 = vpop.f32.mrb[17].mxu1 }
 0x1e8   :  { %v621_v2 = vadd.f32 %v3551_v6, %v620_v1  ;;  %v3300_v3 = vpop.f32.mrb[18].mxu1 }
 0x1e9   :  { %v3667_v4 = vmul.f32 0.5, %v629_v0  ;;  %v632_v5 = vadd.f32 %v3300_v3, %v3551_v6  ;;  %v623_v7 = vpop.f32.mrb[19].mxu1 }
 0x1ea   :  { %v3670_v20 = vmul.f32 0.5, %v621_v2  ;;  %v624_v10 = vadd.f32 %v3551_v6, %v623_v7 }
 0x1eb   :  { %v692_v13 = vpack.c.bf16 %v632_v5, %v629_v0  ;;  %v3673_v21 = vmul.f32 0.5, %v632_v5 }
 0x1ec   :  { %v691_v23 = vpack.c.bf16 %v624_v10, %v621_v2  ;;  %v3675_v25 = vmul.f32 0.5, %v624_v10 }
 0x1ee   :  { %4755 = vst [vmem:[#allocation28_spill] sm:$0xff] %v3675_v25  ;;  %v3303_v28 = vpop.f32.mrb[20].mxu1  ;;  %2569 = vmatprep.subr.bf16.mxu0 %v691_v23 }
 0x1ef   :  { %v645_v35 = vadd.f32 %v3303_v28, %v3551_v6  ;;  %v636_v37 = vpop.f32.mrb[21].mxu1 }
 0x1f0   :  { %v637_v39 = vadd.f32 %v3551_v6, %v636_v37  ;;  %v3304_v42 = vpop.f32.mrb[22].mxu1 }
 0x1f1   :  { %v3679_v49 = vmul.f32 0.5, %v645_v35  ;;  %v648_v51 = vadd.f32 %v3304_v42, %v3551_v6  ;;  %v639_v53 = vpop.f32.mrb[23].mxu1 }
 0x1f2   :  { %v3682_v56 = vmul.f32 0.5, %v637_v39  ;;  %v640_v63 = vadd.f32 %v3551_v6, %v639_v53 }
 0x1f3   :  { %v694_v0 = vpack.c.bf16 %v648_v51, %v645_v35  ;;  %v3685_v1 = vmul.f32 0.5, %v648_v51 }
 0x1f4   :  { %v693_v2 = vpack.c.bf16 %v640_v63, %v637_v39  ;;  %v3687_v3 = vmul.f32 0.5, %v640_v63 }
 0x1f6   :  { %v3307_v5 = vpop.f32.mrb[24].mxu1 }
 0x1f7   :  { %v661_v7 = vadd.f32 %v3307_v5, %v3551_v6  ;;  %v652_v10 = vpop.f32.mrb[25].mxu1 }
 0x1f8   :  { %v653_v28 = vadd.f32 %v3551_v6, %v652_v10  ;;  %v3308_v37 = vpop.f32.mrb[26].mxu1 }
 0x1f9   :  { %v3691_v59 = vmul.f32 0.5, %v661_v7  ;;  %v664_v42 = vadd.f32 %v3308_v37, %v3551_v6  ;;  %v655_v61 = vpop.f32.mrb[27].mxu1 }
 0x1fa   :  { %v3694_v45 = vmul.f32 0.5, %v653_v28  ;;  %v656_v35 = vadd.f32 %v3551_v6, %v655_v61 }
 0x1fb   :  { %4756 = vst [vmem:[#allocation29_spill] sm:$0xff] %v3691_v59  ;;  %v696_v51 = vpack.c.bf16 %v664_v42, %v661_v7  ;;  %v3697_v39 = vmul.f32 0.5, %v664_v42 }
 0x1fc   :  { %v695_v53 = vpack.c.bf16 %v656_v35, %v653_v28  ;;  %v3699_v63 = vmul.f32 0.5, %v656_v35 }
 0x1fe   :  { %v3311_v5 = vpop.f32.mrb[28].mxu1 }
 0x1ff   :  { %v677_v47 = vadd.f32 %v3311_v5, %v3551_v6  ;;  %v668_v10 = vpop.f32.mrb[29].mxu1 }
 0x200   :  { %v669_v31 = vadd.f32 %v3551_v6, %v668_v10  ;;  %v3312_v33 = vpop.f32.mrb[30].mxu1 }
 0x201   :  { %v3703_v16 = vmul.f32 0.5, %v677_v47  ;;  %v680_v37 = vadd.f32 %v3312_v33, %v3551_v6  ;;  %v671_v18 = vpop.f32.mrb[31].mxu1 }
 0x202   :  { %v3706_v59 = vmul.f32 0.5, %v669_v31  ;;  %v672_v61 = vadd.f32 %v3551_v6, %v671_v18 }
 0x203   :  { %v698_v7 = vpack.c.bf16 %v680_v37, %v677_v47  ;;  %v3709_v28 = vmul.f32 0.5, %v680_v37 }
 0x204   :  { %v697_v42 = vpack.c.bf16 %v672_v61, %v669_v31  ;;  %v3711_v35 = vmul.f32 0.5, %v672_v61 }
 0x205   :  { %3365 = dma.done.wait [#allocation5], 4096 }
 0x206   :  { %3366 = vsyncadd [#allocation5], 4294963200  ;;  %v4757_v5 = vpack.c.bf16 %v3569_v15, %v3557_v9  ;;  %v4758_v33 = vpack.c.bf16 %v3563_v12, %v3554_v8  ;;  %v3719_v6 = vld [vmem:[#allocation2 + $0x8] sm:$0xff]  ;;  %v4759_v18 = vpack.c.bf16 %v3597_v30, %v3585_v24  ;;  %v4760_v9 = vpack.c.bf16 %v3591_v27, %v3582_v22  ;;  %v3741_v24 = vld [vmem:[#allocation2] sm:$0xff]  ;;  %s3377_s3 = smov [#allocation6]  }
 0x207   :  { %895 = vmatprep.mubr.bf16.mxu0 %v3719_v6  ;;  %1169 = vmatprep.mubr.bf16.mxu1 %v3719_v6  ;;  %v4761_v8 = vpack.c.bf16 %v3625_v44, %v3613_v38  ;;  %v4762_v12 = vpack.c.bf16 %v3619_v41, %v3610_v36  ;;  %v4763_v15 = vpack.c.bf16 %v3653_v58, %v3641_v52  ;;  %v3743_v27 = vld [vmem:[#allocation2 + $0x18] sm:$0xff]  ;;  %v3747_v30 = vld [vmem:[#allocation2 + $0x10] sm:$0xff]  ;;  %v3749_v31 = vld [vmem:[#allocation2 + $0x28] sm:$0xff]  ;;  %s2459_s4 = sshll.u32 %s3377_s3, 4  ;;  %s2460_s4 = int_to_ptr.vmem [resolvable:$true] %s2459_s4 }
 0x208   :  { %2570 = vmatpush3.bf16.msra.mxu0 %v4757_v5  ;;  %v4764_v22 = vpack.c.bf16 %v3647_v55, %v3638_v50  ;;  %v3753_v36 = vld [vmem:[#allocation2 + $0x20] sm:$0xff]  ;;  %v3755_v38 = vld [vmem:[#allocation2 + $0x38] sm:$0xff]  ;;  %v3759_v41 = vld [vmem:[#allocation2 + $0x30] sm:$0xff]  ;;  %s3343_s26 = scalar_lea.vmem %s2460_s4, 4096  ;;  %p3348_p1 = scmp.lt.s32.totalorder %s2460_s4, %s2460_s4 }
 0x209   :  { %2571 = vmatprep.subr.bf16.mxu0 %v692_v13  ;;  %v3761_v44 = vld [vmem:[#allocation2 + $0x48] sm:$0xff]  ;;  %v3765_v47 = vld [vmem:[#allocation2 + $0x40] sm:$0xff]  ;;  %v3767_v50 = vld [vmem:[#allocation2 + $0x58] sm:$0xff]  ;;  %p3344_p0 = scmp.ne.s32.totalorder %s2460_s4, %s3343_s26  ;;  %p3349_p2 = scmp.lt.s32.totalorder %s3343_s26, %s3343_s26 }
 0x20a   :  { %v3771_v52 = vld [vmem:[#allocation2 + $0x50] sm:$0xff]  ;;  %v3773_v55 = vld [vmem:[#allocation2 + $0x68] sm:$0xff]  ;;  %v3777_v58 = vld [vmem:[#allocation2 + $0x60] sm:$0xff] }
 0x20b   :  { %v3779_v13 = vld [vmem:[#allocation2 + $0x78] sm:$0xff]  ;;  %v3783_v23 = vld [vmem:[#allocation2 + $0x70] sm:$0xff]  ;;  %v3797_v10 = vld [vmem:[#allocation2 + $0xa8] sm:$0xff]  ;;  %p3350_p3 = por %p3349_p2, %p3348_p1 }
 0x20c   :  { %2572 = vmatpush3.bf16.msra.mxu0 %v4758_v33  ;;  %4768 = vst [vmem:[#allocation33_spill] sm:$0xff] %v3797_v10  ;;  %v3801_v37 = vld [vmem:[#allocation2 + $0xa0] sm:$0xff]  ;;  %v3803_v61 = vld [vmem:[#allocation2 + $0xb8] sm:$0xff] }
 0x20d   :  { %2573 = vmatprep.subr.bf16.mxu0 %v693_v2  ;;  %v3789_v2 = vld [vmem:[#allocation2 + $0x80] sm:$0xff]  ;;  %4769 = vst [vmem:[#allocation34_spill] sm:$0xff] %v3801_v37  ;;  %4770 = vst [vmem:[#allocation35_spill] sm:$0xff] %v3803_v61  ;;  %v3815_v33 = vld [vmem:[#allocation2 + $0xd8] sm:$0xff]  ;;  %p3351_p4 = pnand %p3350_p3, %p3344_p0 }
 0x20e   :  { %4765 = vst [vmem:[#allocation30_spill] sm:$0xff] %v3789_v2  ;;  %v3813_v5 = vld [vmem:[#allocation2 + $0xc0] sm:$0xff]  ;;  %4774 = vst [vmem:[#allocation39_spill] sm:$0xff] %v3815_v33 }
 0x20f   :  { %4773 = vst [vmem:[#allocation38_spill] sm:$0xff] %v3813_v5 }
 0x210   :  { %2574 = vmatpush3.bf16.msra.mxu0 %v4759_v18  ;;  %v3819_v18 = vld [vmem:[#allocation2 + $0xd0] sm:$0xff] }
 0x211   :  { %2575 = vmatprep.subr.bf16.mxu0 %v694_v0  ;;  %v3785_v0 = vld [vmem:[#allocation2 + $0x88] sm:$0xff]  ;;  %4775 = vst [vmem:[#allocation40_spill] sm:$0xff] %v3819_v18 }
 0x214   :  { %2576 = vmatpush3.bf16.msra.mxu0 %v4760_v9  ;;  %v3821_v9 = vld [vmem:[#allocation2 + $0xe8] sm:$0xff] }
 0x215   :  { %2577 = vmatprep.subr.bf16.mxu0 %v695_v53  ;;  %v3795_v53 = vld [vmem:[#allocation2 + $0x90] sm:$0xff]  ;;  %4776 = vst [vmem:[#allocation41_spill] sm:$0xff] %v3821_v9 }
 0x216   :  { %4767 = vst [vmem:[#allocation32_spill] sm:$0xff] %v3795_v53 }
 0x218   :  { %2578 = vmatpush3.bf16.msra.mxu0 %v4761_v8  ;;  %v3825_v8 = vld [vmem:[#allocation2 + $0xe0] sm:$0xff] }
 0x219   :  { %2579 = vmatprep.subr.bf16.mxu0 %v696_v51  ;;  %v3791_v51 = vld [vmem:[#allocation2 + $0x98] sm:$0xff]  ;;  %4777 = vst [vmem:[#allocation42_spill] sm:$0xff] %v3825_v8 }
 0x21a   :  { %4766 = vst [vmem:[#allocation31_spill] sm:$0xff] %v3791_v51 }
 0x21c   :  { %2580 = vmatpush3.bf16.msra.mxu0 %v4762_v12  ;;  %v3827_v12 = vld [vmem:[#allocation2 + $0xf8] sm:$0xff] }
 0x21d   :  { %2581 = vmatprep.subr.bf16.mxu0 %v697_v42  ;;  %v3809_v42 = vld [vmem:[#allocation2 + $0xc8] sm:$0xff]  ;;  %4778 = vst [vmem:[#allocation43_spill] sm:$0xff] %v3827_v12 }
 0x21e   :  { %4772 = vst [vmem:[#allocation37_spill] sm:$0xff] %v3809_v42 }
 0x220   :  { %2582 = vmatpush3.bf16.msra.mxu0 %v4763_v15  ;;  %v3831_v15 = vld [vmem:[#allocation2 + $0xf0] sm:$0xff] }
 0x221   :  { %2583 = vmatprep.subr.bf16.mxu0 %v698_v7  ;;  %v3807_v7 = vld [vmem:[#allocation2 + $0xb0] sm:$0xff]  ;;  %4779 = vst [vmem:[#allocation44_spill] sm:$0xff] %v3831_v15 }
 0x222   :  { %4771 = vst [vmem:[#allocation36_spill] sm:$0xff] %v3807_v7 }
 0x224   :  { %2584 = vmatpush3.bf16.msra.mxu0 %v4764_v22 }
 0x227   :  { %896 = vmatmul.mubr.bf16.vlgmr.msra.gmra.mrb[32].mxu0 %v3741_v24 }
 0x228   :  { %903 = vmatprep.mubr.bf16.mxu0 %v3743_v27 }
 0x22f   :  { %904 = vmatmul.mubr.bf16.gmra.mrb[36].mxu0 %v3747_v30 }
 0x230   :  { %911 = vmatprep.mubr.bf16.mxu0 %v3749_v31 }
 0x237   :  { %912 = vmatmul.mubr.bf16.gmra.mrb[40].mxu0 %v3753_v36 }
 0x238   :  { %919 = vmatprep.mubr.bf16.mxu0 %v3755_v38 }
 0x23f   :  { %920 = vmatmul.mubr.bf16.gmra.mrb[44].mxu0 %v3759_v41 }
 0x240   :  { %927 = vmatprep.mubr.bf16.mxu0 %v3761_v44 }
 0x247   :  { %928 = vmatmul.mubr.bf16.gmra.mrb[48].mxu0 %v3765_v47 }
 0x248   :  { %935 = vmatprep.mubr.bf16.mxu0 %v3767_v50 }
 0x24f   :  { %936 = vmatmul.mubr.bf16.gmra.mrb[52].mxu0 %v3771_v52 }
 0x250   :  { %943 = vmatprep.mubr.bf16.mxu0 %v3773_v55 }
 0x257   :  { %944 = vmatmul.mubr.bf16.gmra.mrb[56].mxu0 %v3777_v58 }
 0x258   :  { %951 = vmatprep.mubr.bf16.mxu0 %v3779_v13 }
 0x25f   :  { %952 = vmatmul.mubr.bf16.gmra.mrb[60].mxu0 %v3783_v23 }
 0x260   :  { %959 = vmatprep.mubr.bf16.mxu0 %v3785_v0 }
 0x267   :  { %960 = vmatmul.mubr.bf16.gmra.mrb[64].mxu0 %v3789_v2 }
 0x268   :  { %967 = vmatprep.mubr.bf16.mxu0 %v3791_v51 }
 0x26f   :  { %968 = vmatmul.mubr.bf16.gmra.mrb[68].mxu0 %v3795_v53 }
 0x270   :  { %975 = vmatprep.mubr.bf16.mxu0 %v3797_v10 }
 0x277   :  { %976 = vmatmul.mubr.bf16.gmra.mrb[72].mxu0 %v3801_v37 }
 0x278   :  { %983 = vmatprep.mubr.bf16.mxu0 %v3803_v61 }
 0x27f   :  { %984 = vmatmul.mubr.bf16.gmra.mrb[76].mxu0 %v3807_v7 }
 0x280   :  { %991 = vmatprep.mubr.bf16.mxu0 %v3809_v42 }
 0x287   :  { %992 = vmatmul.mubr.bf16.gmra.mrb[80].mxu0 %v3813_v5 }
 0x288   :  { %999 = vmatprep.mubr.bf16.mxu0 %v3815_v33 }
 0x28f   :  { %1000 = vmatmul.mubr.bf16.gmra.mrb[84].mxu0 %v3819_v18 }
 0x290   :  { %1007 = vmatprep.mubr.bf16.mxu0 %v3821_v9 }
 0x297   :  { %1008 = vmatmul.mubr.bf16.gmra.mrb[88].mxu0 %v3825_v8 }
 0x298   :  { %1015 = vmatprep.mubr.bf16.mxu0 %v3827_v12 }
 0x29f   :  { %1016 = vmatmul.mubr.bf16.gmra.mrb[92].mxu0 %v3831_v15 }
 0x2a0   :  { %1442 = vmatprep.mubr.bf16.mxu0 %v3719_v6 }
 0x2fa   :  { %v2585_v22 = vpop.f32.mrb[32].mxu0 }
 0x2fb   :  { %v2586_v33 = vpop.f32.mrb[33].mxu0 }
 0x2fc   :  { %v2587_v5 = vadd.f32 %v2586_v33, %v2585_v22  ;;  %v2588_v18 = vpop.f32.mrb[34].mxu0 }
 0x2fd   :  { %v2589_v42 = vpop.f32.mrb[35].mxu0 }
 0x2fe   :  { %v2590_v9 = vadd.f32 %v2589_v42, %v2588_v18  ;;  %v3836_v7 = vadd.f32 %v2587_v5, %v3566_v14 }
 0x300   :  { %v3839_v61 = vadd.f32 %v2590_v9, %v3579_v19 }
 0x302   :  { %v2591_v8 = vpop.f32.mrb[36].mxu0 }
 0x303   :  { %v2592_v37 = vpop.f32.mrb[37].mxu0 }
 0x304   :  { %v2593_v15 = vadd.f32 %v2592_v37, %v2591_v8  ;;  %v2594_v10 = vpop.f32.mrb[38].mxu0 }
 0x305   :  { %v2595_v6 = vpop.f32.mrb[39].mxu0 }
 0x306   :  { %v2596_v53 = vadd.f32 %v2595_v6, %v2594_v10  ;;  %v3844_v33 = vadd.f32 %v2593_v15, %v3560_v11 }
 0x308   :  { %v3847_v42 = vadd.f32 %v2596_v53, %v3574_v17 }
 0x30a   :  { %v2597_v18 = vpop.f32.mrb[40].mxu0 }
 0x30b   :  { %v2598_v9 = vpop.f32.mrb[41].mxu0 }
 0x30c   :  { %v2599_v22 = vadd.f32 %v2598_v9, %v2597_v18  ;;  %v2600_v19 = vpop.f32.mrb[42].mxu0 }
 0x30d   :  { %v2601_v14 = vpop.f32.mrb[43].mxu0 }
 0x30e   :  { %v2602_v12 = vadd.f32 %v2601_v14, %v2600_v19  ;;  %v3852_v37 = vadd.f32 %v2599_v22, %v3594_v29 }
 0x310   :  { %v3855_v10 = vadd.f32 %v2602_v12, %v3607_v34 }
 0x312   :  { %v2603_v53 = vpop.f32.mrb[44].mxu0 }
 0x313   :  { %v2604_v15 = vpop.f32.mrb[45].mxu0 }
 0x314   :  { %v2605_v6 = vadd.f32 %v2604_v15, %v2603_v53  ;;  %v2606_v17 = vpop.f32.mrb[46].mxu0 }
 0x315   :  { %v2607_v5 = vpop.f32.mrb[47].mxu0 }
 0x316   :  { %v2608_v11 = vadd.f32 %v2607_v5, %v2606_v17  ;;  %v3860_v18 = vadd.f32 %v2605_v6, %v3588_v26 }
 0x318   :  { %v3863_v14 = vadd.f32 %v2608_v11, %v3602_v32 }
 0x31a   :  { %v2609_v12 = vpop.f32.mrb[48].mxu0 }
 0x31b   :  { %v2610_v9 = vpop.f32.mrb[49].mxu0 }
 0x31c   :  { %v2611_v22 = vadd.f32 %v2610_v9, %v2609_v12  ;;  %v2612_v34 = vpop.f32.mrb[50].mxu0 }
 0x31d   :  { %v2613_v8 = vpop.f32.mrb[51].mxu0 }
 0x31e   :  { %v2614_v29 = vadd.f32 %v2613_v8, %v2612_v34  ;;  %v3868_v53 = vadd.f32 %v2611_v22, %v3622_v43 }
 0x320   :  { %v3871_v17 = vadd.f32 %v2614_v29, %v3635_v48 }
 0x322   :  { %v2615_v11 = vpop.f32.mrb[52].mxu0 }
 0x323   :  { %v2616_v15 = vpop.f32.mrb[53].mxu0 }
 0x324   :  { %v2617_v6 = vadd.f32 %v2616_v15, %v2615_v11  ;;  %v2618_v32 = vpop.f32.mrb[54].mxu0 }
 0x325   :  { %v2619_v19 = vpop.f32.mrb[55].mxu0 }
 0x326   :  { %v2620_v26 = vadd.f32 %v2619_v19, %v2618_v32  ;;  %v3876_v12 = vadd.f32 %v2617_v6, %v3616_v40 }
 0x328   :  { %v3879_v34 = vadd.f32 %v2620_v26, %v3630_v46 }
 0x32a   :  { %v2621_v29 = vpop.f32.mrb[56].mxu0 }
 0x32b   :  { %v2622_v9 = vpop.f32.mrb[57].mxu0 }
 0x32c   :  { %v2623_v22 = vadd.f32 %v2622_v9, %v2621_v29  ;;  %v2624_v48 = vpop.f32.mrb[58].mxu0 }
 0x32d   :  { %v2625_v5 = vpop.f32.mrb[59].mxu0 }
 0x32e   :  { %v2626_v43 = vadd.f32 %v2625_v5, %v2624_v48  ;;  %v3884_v11 = vadd.f32 %v2623_v22, %v3650_v57  ;;  %v4780_v5 = vpack.c.bf16 %v3839_v61, %v3836_v7 }
 0x330   :  { %v3887_v32 = vadd.f32 %v2626_v43, %v3663_v62 }
 0x332   :  { %v2627_v26 = vpop.f32.mrb[60].mxu0 }
 0x333   :  { %v2628_v15 = vpop.f32.mrb[61].mxu0 }
 0x334   :  { %v2629_v6 = vadd.f32 %v2628_v15, %v2627_v26  ;;  %v2630_v46 = vpop.f32.mrb[62].mxu0 }
 0x335   :  { %v2631_v8 = vpop.f32.mrb[63].mxu0 }
 0x336   :  { %v2632_v40 = vadd.f32 %v2631_v8, %v2630_v46  ;;  %v3892_v29 = vadd.f32 %v2629_v6, %v3644_v54 }
 0x338   :  { %v3895_v48 = vadd.f32 %v2632_v40, %v3658_v60 }
 0x33a   :  { %v2633_v43 = vpop.f32.mrb[64].mxu0 }
 0x33b   :  { %v2634_v9 = vpop.f32.mrb[65].mxu0 }
 0x33c   :  { %v2635_v22 = vadd.f32 %v2634_v9, %v2633_v43  ;;  %v2636_v62 = vpop.f32.mrb[66].mxu0 }
 0x33d   :  { %v2637_v19 = vpop.f32.mrb[67].mxu0 }
 0x33e   :  { %v2638_v57 = vadd.f32 %v2637_v19, %v2636_v62  ;;  %v962_v26 = vadd.f32 %v2635_v22, %v3670_v20 }
 0x340   :  { %v965_v15 = vadd.f32 %v2638_v57, %v3675_v25 }
 0x342   :  { %v2639_v46 = vpop.f32.mrb[68].mxu0  ;;  %v1032_v8 = vpack.c.bf16 %v965_v15, %v962_v26  ;;  %v4781_v15 = vpack.c.bf16 %v3847_v42, %v3844_v33 }
 0x343   :  { %v2640_v6 = vpop.f32.mrb[69].mxu0 }
 0x344   :  { %v2641_v54 = vadd.f32 %v2640_v6, %v2639_v46  ;;  %v2642_v51 = vpop.f32.mrb[70].mxu0  ;;  %2681 = vmatprep.subr.bf16.mxu1 %v1032_v8 }
 0x345   :  { %v2643_v40 = vpop.f32.mrb[71].mxu0  ;;  %2682 = vmatpush3.bf16.msra.mxu1 %v4780_v5 }
 0x346   :  { %v2644_v60 = vadd.f32 %v2643_v40, %v2642_v51  ;;  %v970_v43 = vadd.f32 %v2641_v54, %v3667_v4  ;;  %v4782_v40 = vpack.c.bf16 %v3855_v10, %v3852_v37 }
 0x348   :  { %v973_v62 = vadd.f32 %v2644_v60, %v3673_v21 }
 0x34a   :  { %v1033_v19 = vpack.c.bf16 %v973_v62, %v970_v43  ;;  %v2645_v9 = vpop.f32.mrb[72].mxu0 }
 0x34b   :  { %v2646_v22 = vpop.f32.mrb[73].mxu0 }
 0x34c   :  { %v2647_v57 = vadd.f32 %v2646_v22, %v2645_v9  ;;  %v2648_v25 = vpop.f32.mrb[74].mxu0  ;;  %2683 = vmatprep.subr.bf16.mxu1 %v1033_v19 }
 0x34d   :  { %v2649_v26 = vpop.f32.mrb[75].mxu0  ;;  %2684 = vmatpush3.bf16.msra.mxu1 %v4781_v15 }
 0x34e   :  { %v2650_v46 = vadd.f32 %v2649_v26, %v2648_v25  ;;  %v978_v61 = vadd.f32 %v2647_v57, %v3682_v56  ;;  %v4783_v26 = vpack.c.bf16 %v3863_v14, %v3860_v18 }
 0x350   :  { %v981_v51 = vadd.f32 %v2650_v46, %v3687_v3 }
 0x352   :  { %v1034_v7 = vpack.c.bf16 %v981_v51, %v978_v61  ;;  %v2651_v54 = vpop.f32.mrb[76].mxu0 }
 0x353   :  { %v2652_v5 = vpop.f32.mrb[77].mxu0 }
 0x354   :  { %v2653_v60 = vadd.f32 %v2652_v5, %v2651_v54  ;;  %v2654_v8 = vpop.f32.mrb[78].mxu0  ;;  %2685 = vmatprep.subr.bf16.mxu1 %v1034_v7 }
 0x355   :  { %v2655_v6 = vpop.f32.mrb[79].mxu0  ;;  %2686 = vmatpush3.bf16.msra.mxu1 %v4782_v40 }
 0x356   :  { %v2656_v43 = vadd.f32 %v2655_v6, %v2654_v8  ;;  %v986_v33 = vadd.f32 %v2653_v60, %v3679_v49  ;;  %v4784_v60 = vpack.c.bf16 %v3871_v17, %v3868_v53  ;;  %v4785_v6 = vld [vmem:[#allocation29_spill] sm:$0xff] }
 0x358   :  { %v989_v25 = vadd.f32 %v2656_v43, %v3685_v1 }
 0x35a   :  { %v1035_v42 = vpack.c.bf16 %v989_v25, %v986_v33  ;;  %v2657_v62 = vpop.f32.mrb[80].mxu0 }
 0x35b   :  { %v2658_v19 = vpop.f32.mrb[81].mxu0 }
 0x35c   :  { %v2659_v9 = vadd.f32 %v2658_v19, %v2657_v62  ;;  %v2660_v22 = vpop.f32.mrb[82].mxu0  ;;  %2687 = vmatprep.subr.bf16.mxu1 %v1035_v42  ;;  %v4786_v19 = vpack.c.bf16 %v3879_v34, %v3876_v12 }
 0x35d   :  { %v2661_v57 = vpop.f32.mrb[83].mxu0  ;;  %2688 = vmatpush3.bf16.msra.mxu1 %v4783_v26 }
 0x35e   :  { %v2662_v15 = vadd.f32 %v2661_v57, %v2660_v22  ;;  %v994_v37 = vadd.f32 %v2659_v9, %v3694_v45 }
 0x360   :  { %v997_v10 = vadd.f32 %v2662_v15, %v3699_v63 }
 0x362   :  { %v1036_v46 = vpack.c.bf16 %v997_v10, %v994_v37  ;;  %v2663_v61 = vpop.f32.mrb[84].mxu0 }
 0x363   :  { %v2664_v51 = vpop.f32.mrb[85].mxu0 }
 0x364   :  { %v2665_v7 = vadd.f32 %v2664_v51, %v2663_v61  ;;  %v2666_v54 = vpop.f32.mrb[86].mxu0  ;;  %2689 = vmatprep.subr.bf16.mxu1 %v1036_v46  ;;  %v4787_v46 = vpack.c.bf16 %v3887_v32, %v3884_v11  ;;  %v4789_v11 = vld [vmem:[#allocation31_spill] sm:$0xff]  ;;  %v4790_v32 = vld [vmem:[#allocation32_spill] sm:$0xff] }
 0x365   :  { %v2667_v5 = vpop.f32.mrb[87].mxu0  ;;  %2690 = vmatpush3.bf16.msra.mxu1 %v4784_v60  ;;  %v4795_v60 = vld [vmem:[#allocation37_spill] sm:$0xff] }
 0x366   :  { %v2668_v8 = vadd.f32 %v2667_v5, %v2666_v54  ;;  %v1002_v18 = vadd.f32 %v2665_v7, %v4785_v6  ;;  %v4788_v7 = vpack.c.bf16 %v3895_v48, %v3892_v29  ;;  %v4791_v29 = vld [vmem:[#allocation33_spill] sm:$0xff]  ;;  %v4792_v48 = vld [vmem:[#allocation34_spill] sm:$0xff]  ;;  %v4793_v54 = vld [vmem:[#allocation35_spill] sm:$0xff] }
 0x367   :  { %v4794_v5 = vld [vmem:[#allocation36_spill] sm:$0xff] }
 0x368   :  { %v1005_v14 = vadd.f32 %v2668_v8, %v3697_v39  ;;  %v4796_v8 = vld [vmem:[#allocation38_spill] sm:$0xff] }
 0x36a   :  { %v1037_v40 = vpack.c.bf16 %v1005_v14, %v1002_v18  ;;  %v2669_v43 = vpop.f32.mrb[88].mxu0  ;;  %v4797_v18 = vld [vmem:[#allocation39_spill] sm:$0xff]  ;;  %v4798_v14 = vld [vmem:[#allocation40_spill] sm:$0xff] }
 0x36b   :  { %v2670_v33 = vpop.f32.mrb[89].mxu0 }
 0x36c   :  { %v2671_v25 = vadd.f32 %v2670_v33, %v2669_v43  ;;  %v2672_v42 = vpop.f32.mrb[90].mxu0  ;;  %2691 = vmatprep.subr.bf16.mxu1 %v1037_v40  ;;  %v4799_v40 = vld [vmem:[#allocation41_spill] sm:$0xff]  ;;  %v4800_v43 = vld [vmem:[#allocation42_spill] sm:$0xff]  ;;  %v4801_v33 = vld [vmem:[#allocation43_spill] sm:$0xff] }
 0x36d   :  { %v2673_v62 = vpop.f32.mrb[91].mxu0  ;;  %2692 = vmatpush3.bf16.msra.mxu1 %v4786_v19 }
 0x36e   :  { %v2674_v9 = vadd.f32 %v2673_v62, %v2672_v42  ;;  %v1010_v53 = vadd.f32 %v2671_v25, %v3706_v59  ;;  %v4802_v25 = vld [vmem:[#allocation44_spill] sm:$0xff] }
 0x370   :  { %v1013_v17 = vadd.f32 %v2674_v9, %v3711_v35 }
 0x372   :  { %v1038_v22 = vpack.c.bf16 %v1013_v17, %v1010_v53  ;;  %v2675_v57 = vpop.f32.mrb[92].mxu0 }
 0x373   :  { %v2676_v26 = vpop.f32.mrb[93].mxu0 }
 0x374   :  { %v2677_v15 = vadd.f32 %v2676_v26, %v2675_v57  ;;  %v2678_v37 = vpop.f32.mrb[94].mxu0  ;;  %2693 = vmatprep.subr.bf16.mxu1 %v1038_v22  ;;  %v4803_v22 = vld [vmem:[#allocation13_spill] sm:$0xff]  ;;  %v4804_v26 = vld [vmem:[#allocation15_spill] sm:$0xff] }
 0x375   :  { %v2679_v10 = vpop.f32.mrb[95].mxu0  ;;  %2694 = vmatpush3.bf16.msra.mxu1 %v4787_v46 }
 0x376   :  { %v2680_v61 = vadd.f32 %v2679_v10, %v2678_v37  ;;  %v1018_v12 = vadd.f32 %v2677_v15, %v3703_v16 }
 0x378   :  { %v1021_v34 = vadd.f32 %v2680_v61, %v3709_v28 }
 0x37a   :  { %v1039_v51 = vpack.c.bf16 %v1021_v34, %v1018_v12 }
 0x37c   :  { %2695 = vmatprep.subr.bf16.mxu1 %v1039_v51 }
 0x37d   :  { %2696 = vmatpush3.bf16.msra.mxu1 %v4788_v7  ;;  %v4805_v7 = vld [vmem:[#allocation12_spill] sm:$0xff] }
 0x380   :  { %1170 = vmatmul.mubr.bf16.vlgmr.msra.gmra.mrb[32].mxu1 %v3741_v24 }
 0x381   :  { %1177 = vmatprep.mubr.bf16.mxu1 %v3743_v27 }
 0x388   :  { %1178 = vmatmul.mubr.bf16.gmra.mrb[36].mxu1 %v3747_v30 }
 0x389   :  { %1185 = vmatprep.mubr.bf16.mxu1 %v3749_v31 }
 0x390   :  { %1186 = vmatmul.mubr.bf16.gmra.mrb[40].mxu1 %v3753_v36 }
 0x391   :  { %1193 = vmatprep.mubr.bf16.mxu1 %v3755_v38 }
 0x398   :  { %1194 = vmatmul.mubr.bf16.gmra.mrb[44].mxu1 %v3759_v41 }
 0x399   :  { %1201 = vmatprep.mubr.bf16.mxu1 %v3761_v44 }
 0x3a0   :  { %1202 = vmatmul.mubr.bf16.gmra.mrb[48].mxu1 %v3765_v47 }
 0x3a1   :  { %1209 = vmatprep.mubr.bf16.mxu1 %v3767_v50 }
 0x3a8   :  { %1210 = vmatmul.mubr.bf16.gmra.mrb[52].mxu1 %v3771_v52 }
 0x3a9   :  { %1217 = vmatprep.mubr.bf16.mxu1 %v3773_v55 }
 0x3b0   :  { %1218 = vmatmul.mubr.bf16.gmra.mrb[56].mxu1 %v3777_v58 }
 0x3b1   :  { %1225 = vmatprep.mubr.bf16.mxu1 %v3779_v13 }
 0x3b8   :  { %1226 = vmatmul.mubr.bf16.gmra.mrb[60].mxu1 %v3783_v23 }
 0x3b9   :  { %1233 = vmatprep.mubr.bf16.mxu1 %v3785_v0 }
 0x3c0   :  { %1234 = vmatmul.mubr.bf16.gmra.mrb[64].mxu1 %v3789_v2 }
 0x3c1   :  { %1241 = vmatprep.mubr.bf16.mxu1 %v4789_v11 }
 0x3c8   :  { %1242 = vmatmul.mubr.bf16.gmra.mrb[68].mxu1 %v4790_v32 }
 0x3c9   :  { %1249 = vmatprep.mubr.bf16.mxu1 %v4791_v29  ;;  %v4817_v29 = vld [vmem:[#allocation24_spill] sm:$0xff] }
 0x3d0   :  { %1250 = vmatmul.mubr.bf16.gmra.mrb[72].mxu1 %v4792_v48 }
 0x3d1   :  { %1257 = vmatprep.mubr.bf16.mxu1 %v4793_v54  ;;  %v4815_v54 = vld [vmem:[#allocation25_spill] sm:$0xff] }
 0x3d8   :  { %1258 = vmatmul.mubr.bf16.gmra.mrb[76].mxu1 %v4794_v5 }
 0x3d9   :  { %1265 = vmatprep.mubr.bf16.mxu1 %v4795_v60  ;;  %v4813_v60 = vld [vmem:[#allocation20_spill] sm:$0xff] }
 0x3e0   :  { %1266 = vmatmul.mubr.bf16.gmra.mrb[80].mxu1 %v4796_v8 }
 0x3e1   :  { %1273 = vmatprep.mubr.bf16.mxu1 %v4797_v18  ;;  %v4811_v18 = vld [vmem:[#allocation21_spill] sm:$0xff] }
 0x3e8   :  { %1274 = vmatmul.mubr.bf16.gmra.mrb[84].mxu1 %v4798_v14 }
 0x3e9   :  { %1281 = vmatprep.mubr.bf16.mxu1 %v4799_v40  ;;  %v4809_v40 = vld [vmem:[#allocation16_spill] sm:$0xff] }
 0x3f0   :  { %1282 = vmatmul.mubr.bf16.gmra.mrb[88].mxu1 %v4800_v43 }
 0x3f1   :  { %1289 = vmatprep.mubr.bf16.mxu1 %v4801_v33  ;;  %v4807_v33 = vld [vmem:[#allocation17_spill] sm:$0xff] }
 0x3f8   :  { %1290 = vmatmul.mubr.bf16.gmra.mrb[92].mxu1 %v4802_v25 }
 0x453   :  { %v2697_v42 = vpop.f32.mrb[32].mxu1 }
 0x454   :  { %v2698_v62 = vpop.f32.mrb[33].mxu1 }
 0x455   :  { %v2699_v19 = vadd.f32 %v2698_v62, %v2697_v42  ;;  %v2700_v9 = vpop.f32.mrb[34].mxu1  ;;  %v4806_v62 = vld [vmem:[#allocation14_spill] sm:$0xff] }
 0x456   :  { %v2701_v53 = vpop.f32.mrb[35].mxu1 }
 0x457   :  { %v2702_v17 = vadd.f32 %v2701_v53, %v2700_v9  ;;  %v3971_v57 = vadd.f32 %v2699_v19, %v4803_v22 }
 0x459   :  { %v3974_v15 = vadd.f32 %v2702_v17, %v4804_v26 }
 0x45b   :  { %v2703_v10 = vpop.f32.mrb[36].mxu1 }
 0x45c   :  { %v2704_v46 = vpop.f32.mrb[37].mxu1 }
 0x45d   :  { %v2705_v61 = vadd.f32 %v2704_v46, %v2703_v10  ;;  %v2706_v12 = vpop.f32.mrb[38].mxu1  ;;  %v4808_v46 = vld [vmem:[#allocation19_spill] sm:$0xff] }
 0x45e   :  { %v2707_v34 = vpop.f32.mrb[39].mxu1 }
 0x45f   :  { %v2708_v51 = vadd.f32 %v2707_v34, %v2706_v12  ;;  %v3979_v42 = vadd.f32 %v2705_v61, %v4805_v7 }
 0x461   :  { %v3982_v9 = vadd.f32 %v2708_v51, %v4806_v62 }
 0x463   :  { %v2709_v53 = vpop.f32.mrb[40].mxu1 }
 0x464   :  { %v2710_v17 = vpop.f32.mrb[41].mxu1 }
 0x465   :  { %v2711_v26 = vadd.f32 %v2710_v17, %v2709_v53  ;;  %v2712_v22 = vpop.f32.mrb[42].mxu1  ;;  %v4810_v17 = vld [vmem:[#allocation18_spill] sm:$0xff] }
 0x466   :  { %v2713_v37 = vpop.f32.mrb[43].mxu1 }
 0x467   :  { %v2714_v25 = vadd.f32 %v2713_v37, %v2712_v22  ;;  %v3987_v10 = vadd.f32 %v2711_v26, %v4807_v33 }
 0x469   :  { %v3990_v12 = vadd.f32 %v2714_v25, %v4808_v46 }
 0x46b   :  { %v2715_v34 = vpop.f32.mrb[44].mxu1 }
 0x46c   :  { %v2716_v51 = vpop.f32.mrb[45].mxu1 }
 0x46d   :  { %v2717_v62 = vadd.f32 %v2716_v51, %v2715_v34  ;;  %v2718_v7 = vpop.f32.mrb[46].mxu1  ;;  %v4812_v51 = vld [vmem:[#allocation23_spill] sm:$0xff] }
 0x46e   :  { %v2719_v19 = vpop.f32.mrb[47].mxu1 }
 0x46f   :  { %v2720_v43 = vadd.f32 %v2719_v19, %v2718_v7  ;;  %v3995_v53 = vadd.f32 %v2717_v62, %v4809_v40 }
 0x471   :  { %v3998_v22 = vadd.f32 %v2720_v43, %v4810_v17 }
 0x473   :  { %v2721_v25 = vpop.f32.mrb[48].mxu1 }
 0x474   :  { %v2722_v37 = vpop.f32.mrb[49].mxu1 }
 0x475   :  { %v2723_v46 = vadd.f32 %v2722_v37, %v2721_v25  ;;  %v2724_v33 = vpop.f32.mrb[50].mxu1  ;;  %v4814_v37 = vld [vmem:[#allocation22_spill] sm:$0xff] }
 0x476   :  { %v2725_v61 = vpop.f32.mrb[51].mxu1 }
 0x477   :  { %v2726_v14 = vadd.f32 %v2725_v61, %v2724_v33  ;;  %v4003_v34 = vadd.f32 %v2723_v46, %v4811_v18 }
 0x479   :  { %v4006_v7 = vadd.f32 %v2726_v14, %v4812_v51 }
 0x47b   :  { %v2727_v43 = vpop.f32.mrb[52].mxu1 }
 0x47c   :  { %v2728_v19 = vpop.f32.mrb[53].mxu1 }
 0x47d   :  { %v2729_v17 = vadd.f32 %v2728_v19, %v2727_v43  ;;  %v2730_v40 = vpop.f32.mrb[54].mxu1  ;;  %v4816_v19 = vld [vmem:[#allocation27_spill] sm:$0xff] }
 0x47e   :  { %v2731_v26 = vpop.f32.mrb[55].mxu1 }
 0x47f   :  { %v2732_v8 = vadd.f32 %v2731_v26, %v2730_v40  ;;  %v4011_v25 = vadd.f32 %v2729_v17, %v4813_v60 }
 0x481   :  { %v4014_v33 = vadd.f32 %v2732_v8, %v4814_v37 }
 0x483   :  { %v2733_v14 = vpop.f32.mrb[56].mxu1 }
 0x484   :  { %v2734_v61 = vpop.f32.mrb[57].mxu1 }
 0x485   :  { %v2735_v51 = vadd.f32 %v2734_v61, %v2733_v14  ;;  %v2736_v18 = vpop.f32.mrb[58].mxu1  ;;  %v4818_v61 = vld [vmem:[#allocation26_spill] sm:$0xff] }
 0x486   :  { %v2737_v62 = vpop.f32.mrb[59].mxu1 }
 0x487   :  { %v2738_v5 = vadd.f32 %v2737_v62, %v2736_v18  ;;  %v4019_v43 = vadd.f32 %v2735_v51, %v4815_v54  ;;  %v4820_v51 = vpack.c.bf16 %v3974_v15, %v3971_v57 }
 0x489   :  { %v4022_v40 = vadd.f32 %v2738_v5, %v4816_v19 }
 0x48b   :  { %v2739_v8 = vpop.f32.mrb[60].mxu1 }
 0x48c   :  { %v2740_v26 = vpop.f32.mrb[61].mxu1 }
 0x48d   :  { %v2741_v37 = vadd.f32 %v2740_v26, %v2739_v8  ;;  %v2742_v60 = vpop.f32.mrb[62].mxu1  ;;  %v4819_v26 = vld [vmem:[#allocation28_spill] sm:$0xff] }
 0x48e   :  { %v2743_v46 = vpop.f32.mrb[63].mxu1 }
 0x48f   :  { %v2744_v48 = vadd.f32 %v2743_v46, %v2742_v60  ;;  %v4027_v14 = vadd.f32 %v2741_v37, %v4817_v29 }
 0x491   :  { %v4030_v18 = vadd.f32 %v2744_v48, %v4818_v61 }
 0x493   :  { %v2745_v5 = vpop.f32.mrb[64].mxu1 }
 0x494   :  { %v2746_v62 = vpop.f32.mrb[65].mxu1 }
 0x495   :  { %v2747_v19 = vadd.f32 %v2746_v62, %v2745_v5  ;;  %v2748_v54 = vpop.f32.mrb[66].mxu1 }
 0x496   :  { %v2749_v17 = vpop.f32.mrb[67].mxu1 }
 0x497   :  { %v2750_v32 = vadd.f32 %v2749_v17, %v2748_v54  ;;  %v1236_v8 = vadd.f32 %v2747_v19, %v3670_v20 }
 0x499   :  { %v1239_v11 = vadd.f32 %v2750_v32, %v4819_v26 }
 0x49b   :  { %v1306_v60 = vpack.c.bf16 %v1239_v11, %v1236_v8  ;;  %v2751_v46 = vpop.f32.mrb[68].mxu1 }
 0x49c   :  { %v2752_v37 = vpop.f32.mrb[69].mxu1 }
 0x49d   :  { %v2753_v29 = vadd.f32 %v2752_v37, %v2751_v46  ;;  %v2754_v2 = vpop.f32.mrb[70].mxu1  ;;  %2793 = vmatprep.subr.bf16.mxu0 %v1306_v60  ;;  %v4821_v60 = vpack.c.bf16 %v3982_v9, %v3979_v42 }
 0x49e   :  { %v2755_v48 = vpop.f32.mrb[71].mxu1  ;;  %2794 = vmatpush3.bf16.msra.mxu0 %v4820_v51 }
 0x49f   :  { %v2756_v61 = vadd.f32 %v2755_v48, %v2754_v2  ;;  %v1244_v5 = vadd.f32 %v2753_v29, %v3667_v4 }
 0x4a1   :  { %v1247_v54 = vadd.f32 %v2756_v61, %v3673_v21 }
 0x4a3   :  { %v1307_v17 = vpack.c.bf16 %v1247_v54, %v1244_v5  ;;  %v2757_v19 = vpop.f32.mrb[72].mxu1  ;;  %v4822_v5 = vpack.c.bf16 %v3990_v12, %v3987_v10 }
 0x4a4   :  { %v2758_v62 = vpop.f32.mrb[73].mxu1 }
 0x4a5   :  { %v2759_v32 = vadd.f32 %v2758_v62, %v2757_v19  ;;  %v2760_v11 = vpop.f32.mrb[74].mxu1  ;;  %2795 = vmatprep.subr.bf16.mxu0 %v1307_v17 }
 0x4a6   :  { %v2761_v8 = vpop.f32.mrb[75].mxu1  ;;  %2796 = vmatpush3.bf16.msra.mxu0 %v4821_v60  ;;  %v4823_v60 = vpack.c.bf16 %v3998_v22, %v3995_v53 }
 0x4a7   :  { %v2762_v46 = vadd.f32 %v2761_v8, %v2760_v11  ;;  %v1252_v57 = vadd.f32 %v2759_v32, %v3682_v56 }
 0x4a9   :  { %v1255_v2 = vadd.f32 %v2762_v46, %v3687_v3 }
 0x4ab   :  { %v1308_v15 = vpack.c.bf16 %v1255_v2, %v1252_v57  ;;  %v2763_v29 = vpop.f32.mrb[76].mxu1 }
 0x4ac   :  { %v2764_v51 = vpop.f32.mrb[77].mxu1 }
 0x4ad   :  { %v2765_v61 = vadd.f32 %v2764_v51, %v2763_v29  ;;  %v2766_v37 = vpop.f32.mrb[78].mxu1  ;;  %2797 = vmatprep.subr.bf16.mxu0 %v1308_v15 }
 0x4ae   :  { %v2767_v48 = vpop.f32.mrb[79].mxu1  ;;  %2798 = vmatpush3.bf16.msra.mxu0 %v4822_v5 }
 0x4af   :  { %v2768_v54 = vadd.f32 %v2767_v48, %v2766_v37  ;;  %v1260_v42 = vadd.f32 %v2765_v61, %v3679_v49  ;;  %v4824_v37 = vpack.c.bf16 %v4006_v7, %v4003_v34 }
 0x4b1   :  { %v1263_v9 = vadd.f32 %v2768_v54, %v3685_v1 }
 0x4b3   :  { %v1309_v17 = vpack.c.bf16 %v1263_v9, %v1260_v42  ;;  %v2769_v19 = vpop.f32.mrb[80].mxu1 }
 0x4b4   :  { %v2770_v62 = vpop.f32.mrb[81].mxu1 }
 0x4b5   :  { %v2771_v32 = vadd.f32 %v2770_v62, %v2769_v19  ;;  %v2772_v11 = vpop.f32.mrb[82].mxu1  ;;  %2799 = vmatprep.subr.bf16.mxu0 %v1309_v17  ;;  %v4825_v62 = vpack.c.bf16 %v4014_v33, %v4011_v25 }
 0x4b6   :  { %v2773_v8 = vpop.f32.mrb[83].mxu1  ;;  %2800 = vmatpush3.bf16.msra.mxu0 %v4823_v60 }
 0x4b7   :  { %v2774_v46 = vadd.f32 %v2773_v8, %v2772_v11  ;;  %v1268_v10 = vadd.f32 %v2771_v32, %v3694_v45 }
 0x4b9   :  { %v1271_v12 = vadd.f32 %v2774_v46, %v3699_v63 }
 0x4bb   :  { %v1310_v57 = vpack.c.bf16 %v1271_v12, %v1268_v10  ;;  %v2775_v2 = vpop.f32.mrb[84].mxu1 }
 0x4bc   :  { %v2776_v15 = vpop.f32.mrb[85].mxu1 }
 0x4bd   :  { %v2777_v29 = vadd.f32 %v2776_v15, %v2775_v2  ;;  %v2778_v51 = vpop.f32.mrb[86].mxu1  ;;  %2801 = vmatprep.subr.bf16.mxu0 %v1310_v57  ;;  %v4826_v57 = vpack.c.bf16 %v4022_v40, %v4019_v43 }
 0x4be   :  { %v2779_v61 = vpop.f32.mrb[87].mxu1  ;;  %2802 = vmatpush3.bf16.msra.mxu0 %v4824_v37  ;;  %v4843_v37 = vld [vmem:[#allocation13_spill] sm:$0xff] }
 0x4bf   :  { %v2780_v48 = vadd.f32 %v2779_v61, %v2778_v51  ;;  %v1276_v53 = vadd.f32 %v2777_v29, %v4785_v6  ;;  %v4827_v29 = vpack.c.bf16 %v4030_v18, %v4027_v14  ;;  %v4105_v51 = vld [vmem:[#allocation2 + $0x8] sm:$0xff] }
 0x4c0   :  { %1715 = vmatprep.mubr.bf16.mxu1 %v4105_v51 }
 0x4c1   :  { %v1279_v22 = vadd.f32 %v2780_v48, %v3697_v39 }
 0x4c3   :  { %v1311_v5 = vpack.c.bf16 %v1279_v22, %v1276_v53  ;;  %v2781_v54 = vpop.f32.mrb[88].mxu1  ;;  %v4844_v53 = vld [vmem:[#allocation15_spill] sm:$0xff] }
 0x4c4   :  { %v2782_v42 = vpop.f32.mrb[89].mxu1 }
 0x4c5   :  { %v2783_v9 = vadd.f32 %v2782_v42, %v2781_v54  ;;  %v2784_v17 = vpop.f32.mrb[90].mxu1  ;;  %2803 = vmatprep.subr.bf16.mxu0 %v1311_v5 }
 0x4c6   :  { %v2785_v19 = vpop.f32.mrb[91].mxu1  ;;  %2804 = vmatpush3.bf16.msra.mxu0 %v4825_v62 }
 0x4c7   :  { %v2786_v32 = vadd.f32 %v2785_v19, %v2784_v17  ;;  %v1284_v34 = vadd.f32 %v2783_v9, %v3706_v59 }
 0x4c9   :  { %v1287_v7 = vadd.f32 %v2786_v32, %v3711_v35  ;;  %v4845_v32 = vld [vmem:[#allocation12_spill] sm:$0xff] }
 0x4cb   :  { %v1312_v11 = vpack.c.bf16 %v1287_v7, %v1284_v34  ;;  %v2787_v8 = vpop.f32.mrb[92].mxu1  ;;  %v4846_v7 = vld [vmem:[#allocation14_spill] sm:$0xff] }
 0x4cc   :  { %v2788_v60 = vpop.f32.mrb[93].mxu1 }
 0x4cd   :  { %v2789_v46 = vadd.f32 %v2788_v60, %v2787_v8  ;;  %v2790_v10 = vpop.f32.mrb[94].mxu1  ;;  %2805 = vmatprep.subr.bf16.mxu0 %v1312_v11 }
 0x4ce   :  { %v2791_v12 = vpop.f32.mrb[95].mxu1  ;;  %2806 = vmatpush3.bf16.msra.mxu0 %v4826_v57 }
 0x4cf   :  { %v2792_v2 = vadd.f32 %v2791_v12, %v2790_v10  ;;  %v1292_v25 = vadd.f32 %v2789_v46, %v3703_v16 }
 0x4d1   :  { %v1295_v33 = vadd.f32 %v2792_v2, %v3709_v28 }
 0x4d3   :  { %v1313_v15 = vpack.c.bf16 %v1295_v33, %v1292_v25  ;;  %v4847_v25 = vld [vmem:[#allocation17_spill] sm:$0xff] }
 0x4d5   :  { %2807 = vmatprep.subr.bf16.mxu0 %v1313_v15  ;;  %v4848_v15 = vld [vmem:[#allocation19_spill] sm:$0xff] }
 0x4d6   :  { %2808 = vmatpush3.bf16.msra.mxu0 %v4827_v29 }
 0x4d9   :  { %1443 = vmatmul.mubr.bf16.vlgmr.msra.gmra.mrb[96].mxu0 %v3741_v24  ;;  %v4828_v24 = vld [vmem:[#allocation30_spill] sm:$0xff] }
 0x4da   :  { %1450 = vmatprep.mubr.bf16.mxu0 %v3743_v27  ;;  %v4829_v27 = vld [vmem:[#allocation31_spill] sm:$0xff] }
 0x4e1   :  { %1451 = vmatmul.mubr.bf16.gmra.mrb[100].mxu0 %v3747_v30  ;;  %v4830_v30 = vld [vmem:[#allocation32_spill] sm:$0xff] }
 0x4e2   :  { %1458 = vmatprep.mubr.bf16.mxu0 %v3749_v31  ;;  %v4831_v31 = vld [vmem:[#allocation33_spill] sm:$0xff] }
 0x4e9   :  { %1459 = vmatmul.mubr.bf16.gmra.mrb[104].mxu0 %v3753_v36  ;;  %v4832_v36 = vld [vmem:[#allocation34_spill] sm:$0xff] }
 0x4ea   :  { %1466 = vmatprep.mubr.bf16.mxu0 %v3755_v38  ;;  %v4833_v38 = vld [vmem:[#allocation35_spill] sm:$0xff] }
 0x4f1   :  { %1467 = vmatmul.mubr.bf16.gmra.mrb[108].mxu0 %v3759_v41  ;;  %v4834_v41 = vld [vmem:[#allocation36_spill] sm:$0xff] }
 0x4f2   :  { %1474 = vmatprep.mubr.bf16.mxu0 %v3761_v44  ;;  %v4835_v44 = vld [vmem:[#allocation37_spill] sm:$0xff] }
 0x4f9   :  { %1475 = vmatmul.mubr.bf16.gmra.mrb[112].mxu0 %v3765_v47  ;;  %v4836_v47 = vld [vmem:[#allocation38_spill] sm:$0xff] }
 0x4fa   :  { %1482 = vmatprep.mubr.bf16.mxu0 %v3767_v50  ;;  %v4837_v50 = vld [vmem:[#allocation39_spill] sm:$0xff] }
 0x501   :  { %1483 = vmatmul.mubr.bf16.gmra.mrb[116].mxu0 %v3771_v52  ;;  %v4838_v52 = vld [vmem:[#allocation40_spill] sm:$0xff] }
 0x502   :  { %1490 = vmatprep.mubr.bf16.mxu0 %v3773_v55  ;;  %v4839_v55 = vld [vmem:[#allocation41_spill] sm:$0xff] }
 0x509   :  { %1491 = vmatmul.mubr.bf16.gmra.mrb[120].mxu0 %v3777_v58  ;;  %v4840_v58 = vld [vmem:[#allocation42_spill] sm:$0xff] }
 0x50a   :  { %1498 = vmatprep.mubr.bf16.mxu0 %v3779_v13  ;;  %v4841_v13 = vld [vmem:[#allocation43_spill] sm:$0xff] }
 0x511   :  { %1499 = vmatmul.mubr.bf16.gmra.mrb[124].mxu0 %v3783_v23  ;;  %v4842_v23 = vld [vmem:[#allocation44_spill] sm:$0xff] }
 0x512   :  { %1506 = vmatprep.mubr.bf16.mxu0 %v3785_v0 }
 0x519   :  { %1507 = vmatmul.mubr.bf16.gmra.mrb[128].mxu0 %v4828_v24 }
 0x51a   :  { %1514 = vmatprep.mubr.bf16.mxu0 %v4829_v27 }
 0x521   :  { %1515 = vmatmul.mubr.bf16.gmra.mrb[132].mxu0 %v4830_v30 }
 0x522   :  { %1522 = vmatprep.mubr.bf16.mxu0 %v4831_v31 }
 0x529   :  { %1523 = vmatmul.mubr.bf16.gmra.mrb[136].mxu0 %v4832_v36 }
 0x52a   :  { %1530 = vmatprep.mubr.bf16.mxu0 %v4833_v38 }
 0x531   :  { %1531 = vmatmul.mubr.bf16.gmra.mrb[140].mxu0 %v4834_v41 }
 0x532   :  { %1538 = vmatprep.mubr.bf16.mxu0 %v4835_v44  ;;  %v4849_v44 = vld [vmem:[#allocation16_spill] sm:$0xff] }
 0x539   :  { %1539 = vmatmul.mubr.bf16.gmra.mrb[144].mxu0 %v4836_v47 }
 0x53a   :  { %1546 = vmatprep.mubr.bf16.mxu0 %v4837_v50  ;;  %v4850_v50 = vld [vmem:[#allocation18_spill] sm:$0xff] }
 0x541   :  { %1547 = vmatmul.mubr.bf16.gmra.mrb[148].mxu0 %v4838_v52 }
 0x542   :  { %1554 = vmatprep.mubr.bf16.mxu0 %v4839_v55 }
 0x549   :  { %1555 = vmatmul.mubr.bf16.gmra.mrb[152].mxu0 %v4840_v58 }
 0x54a   :  { %1562 = vmatprep.mubr.bf16.mxu0 %v4841_v13 }
 0x551   :  { %1563 = vmatmul.mubr.bf16.gmra.mrb[156].mxu0 %v4842_v23 }
 0x552   :  { %1988 = vmatprep.mubr.bf16.mxu0 %v4105_v51 }
 0x5ac   :  { %v2809_v0 = vpop.f32.mrb[96].mxu0 }
 0x5ad   :  { %v2810_v43 = vpop.f32.mrb[97].mxu0 }
 0x5ae   :  { %v2811_v40 = vadd.f32 %v2810_v43, %v2809_v0  ;;  %v2812_v14 = vpop.f32.mrb[98].mxu0 }
 0x5af   :  { %v2813_v18 = vpop.f32.mrb[99].mxu0 }
 0x5b0   :  { %v2814_v61 = vadd.f32 %v2813_v18, %v2812_v14  ;;  %v4110_v48 = vadd.f32 %v2811_v40, %v4843_v37  ;;  %v4851_v14 = vld [vmem:[#allocation21_spill] sm:$0xff] }
 0x5b2   :  { %v4113_v22 = vadd.f32 %v2814_v61, %v4844_v53  ;;  %v4852_v61 = vld [vmem:[#allocation23_spill] sm:$0xff] }
 0x5b4   :  { %v2815_v54 = vpop.f32.mrb[100].mxu0 }
 0x5b5   :  { %v2816_v42 = vpop.f32.mrb[101].mxu0 }
 0x5b6   :  { %v2817_v9 = vadd.f32 %v2816_v42, %v2815_v54  ;;  %v2818_v17 = vpop.f32.mrb[102].mxu0 }
 0x5b7   :  { %v2819_v19 = vpop.f32.mrb[103].mxu0 }
 0x5b8   :  { %v2820_v62 = vadd.f32 %v2819_v19, %v2818_v17  ;;  %v4118_v34 = vadd.f32 %v2817_v9, %v4845_v32 }
 0x5ba   :  { %v4121_v11 = vadd.f32 %v2820_v62, %v4846_v7 }
 0x5bc   :  { %v2821_v60 = vpop.f32.mrb[104].mxu0 }
 0x5bd   :  { %v2822_v46 = vpop.f32.mrb[105].mxu0 }
 0x5be   :  { %v2823_v10 = vadd.f32 %v2822_v46, %v2821_v60  ;;  %v2824_v12 = vpop.f32.mrb[106].mxu0 }
 0x5bf   :  { %v2825_v57 = vpop.f32.mrb[107].mxu0 }
 0x5c0   :  { %v2826_v2 = vadd.f32 %v2825_v57, %v2824_v12  ;;  %v4126_v33 = vadd.f32 %v2823_v10, %v4847_v25  ;;  %v4853_v10 = vld [vmem:[#allocation20_spill] sm:$0xff]  ;;  %v4854_v57 = vld [vmem:[#allocation22_spill] sm:$0xff] }
 0x5c2   :  { %v4129_v29 = vadd.f32 %v2826_v2, %v4848_v15 }
 0x5c4   :  { %v2827_v27 = vpop.f32.mrb[108].mxu0 }
 0x5c5   :  { %v2828_v30 = vpop.f32.mrb[109].mxu0 }
 0x5c6   :  { %v2829_v31 = vadd.f32 %v2828_v30, %v2827_v27  ;;  %v2830_v36 = vpop.f32.mrb[110].mxu0  ;;  %v4857_v27 = vld [vmem:[#allocation24_spill] sm:$0xff] }
 0x5c7   :  { %v2831_v38 = vpop.f32.mrb[111].mxu0 }
 0x5c8   :  { %v2832_v41 = vadd.f32 %v2831_v38, %v2830_v36  ;;  %v4134_v47 = vadd.f32 %v2829_v31, %v4849_v44 }
 0x5ca   :  { %v4137_v52 = vadd.f32 %v2832_v41, %v4850_v50 }
 0x5cc   :  { %v2833_v58 = vpop.f32.mrb[112].mxu0 }
 0x5cd   :  { %v2834_v13 = vpop.f32.mrb[113].mxu0 }
 0x5ce   :  { %v2835_v23 = vadd.f32 %v2834_v13, %v2833_v58  ;;  %v2836_v0 = vpop.f32.mrb[114].mxu0  ;;  %v4855_v13 = vld [vmem:[#allocation25_spill] sm:$0xff] }
 0x5cf   :  { %v2837_v43 = vpop.f32.mrb[115].mxu0 }
 0x5d0   :  { %v2838_v40 = vadd.f32 %v2837_v43, %v2836_v0  ;;  %v4142_v18 = vadd.f32 %v2835_v23, %v4851_v14  ;;  %v4856_v0 = vld [vmem:[#allocation27_spill] sm:$0xff] }
 0x5d2   :  { %v4145_v54 = vadd.f32 %v2838_v40, %v4852_v61 }
 0x5d4   :  { %v2839_v9 = vpop.f32.mrb[116].mxu0 }
 0x5d5   :  { %v2840_v17 = vpop.f32.mrb[117].mxu0 }
 0x5d6   :  { %v2841_v19 = vadd.f32 %v2840_v17, %v2839_v9  ;;  %v2842_v62 = vpop.f32.mrb[118].mxu0 }
 0x5d7   :  { %v2843_v60 = vpop.f32.mrb[119].mxu0 }
 0x5d8   :  { %v2844_v46 = vadd.f32 %v2843_v60, %v2842_v62  ;;  %v4150_v12 = vadd.f32 %v2841_v19, %v4853_v10 }
 0x5da   :  { %v4153_v2 = vadd.f32 %v2844_v46, %v4854_v57 }
 0x5dc   :  { %v2845_v30 = vpop.f32.mrb[120].mxu0 }
 0x5dd   :  { %v2846_v31 = vpop.f32.mrb[121].mxu0 }
 0x5de   :  { %v2847_v36 = vadd.f32 %v2846_v31, %v2845_v30  ;;  %v2848_v38 = vpop.f32.mrb[122].mxu0  ;;  %v4858_v31 = vld [vmem:[#allocation26_spill] sm:$0xff] }
 0x5df   :  { %v2849_v41 = vpop.f32.mrb[123].mxu0 }
 0x5e0   :  { %v2850_v58 = vadd.f32 %v2849_v41, %v2848_v38  ;;  %v4158_v23 = vadd.f32 %v2847_v36, %v4855_v13  ;;  %v4859_v36 = vpack.c.bf16 %v4113_v22, %v4110_v48 }
 0x5e2   :  { %v4161_v43 = vadd.f32 %v2850_v58, %v4856_v0 }
 0x5e4   :  { %v2851_v9 = vpop.f32.mrb[124].mxu0 }
 0x5e5   :  { %v2852_v17 = vpop.f32.mrb[125].mxu0 }
 0x5e6   :  { %v2853_v19 = vadd.f32 %v2852_v17, %v2851_v9  ;;  %v2854_v62 = vpop.f32.mrb[126].mxu0 }
 0x5e7   :  { %v2855_v60 = vpop.f32.mrb[127].mxu0 }
 0x5e8   :  { %v2856_v46 = vadd.f32 %v2855_v60, %v2854_v62  ;;  %v4166_v30 = vadd.f32 %v2853_v19, %v4857_v27 }
 0x5ea   :  { %v4169_v38 = vadd.f32 %v2856_v46, %v4858_v31 }
 0x5ec   :  { %v2857_v41 = vpop.f32.mrb[128].mxu0 }
 0x5ed   :  { %v2858_v58 = vpop.f32.mrb[129].mxu0 }
 0x5ee   :  { %v2859_v42 = vadd.f32 %v2858_v58, %v2857_v41  ;;  %v2860_v55 = vpop.f32.mrb[130].mxu0 }
 0x5ef   :  { %v2861_v40 = vpop.f32.mrb[131].mxu0 }
 0x5f0   :  { %v2862_v24 = vadd.f32 %v2861_v40, %v2860_v55  ;;  %v1509_v9 = vadd.f32 %v2859_v42, %v3670_v20 }
 0x5f2   :  { %v1512_v17 = vadd.f32 %v2862_v24, %v4819_v26 }
 0x5f4   :  { %v1579_v62 = vpack.c.bf16 %v1512_v17, %v1509_v9  ;;  %v2863_v60 = vpop.f32.mrb[132].mxu0 }
 0x5f5   :  { %v2864_v19 = vpop.f32.mrb[133].mxu0 }
 0x5f6   :  { %v2865_v8 = vadd.f32 %v2864_v19, %v2863_v60  ;;  %v2866_v5 = vpop.f32.mrb[134].mxu0  ;;  %2905 = vmatprep.subr.bf16.mxu1 %v1579_v62  ;;  %v4860_v62 = vpack.c.bf16 %v4121_v11, %v4118_v34 }
 0x5f7   :  { %v2867_v46 = vpop.f32.mrb[135].mxu0  ;;  %2906 = vmatpush3.bf16.msra.mxu1 %v4859_v36 }
 0x5f8   :  { %v2868_v31 = vadd.f32 %v2867_v46, %v2866_v5  ;;  %v1517_v41 = vadd.f32 %v2865_v8, %v3667_v4 }
 0x5fa   :  { %v1520_v55 = vadd.f32 %v2868_v31, %v3673_v21 }
 0x5fc   :  { %v1580_v40 = vpack.c.bf16 %v1520_v55, %v1517_v41  ;;  %v2869_v42 = vpop.f32.mrb[136].mxu0  ;;  %v4861_v41 = vpack.c.bf16 %v4129_v29, %v4126_v33 }
 0x5fd   :  { %v2870_v58 = vpop.f32.mrb[137].mxu0 }
 0x5fe   :  { %v2871_v24 = vadd.f32 %v2870_v58, %v2869_v42  ;;  %v2872_v9 = vpop.f32.mrb[138].mxu0  ;;  %2907 = vmatprep.subr.bf16.mxu1 %v1580_v40 }
 0x5ff   :  { %v2873_v17 = vpop.f32.mrb[139].mxu0  ;;  %2908 = vmatpush3.bf16.msra.mxu1 %v4860_v62  ;;  %v4862_v62 = vpack.c.bf16 %v4137_v52, %v4134_v47 }
 0x600   :  { %v2874_v60 = vadd.f32 %v2873_v17, %v2872_v9  ;;  %v1525_v48 = vadd.f32 %v2871_v24, %v3682_v56 }
 0x602   :  { %v1528_v22 = vadd.f32 %v2874_v60, %v3687_v3 }
 0x604   :  { %v1581_v5 = vpack.c.bf16 %v1528_v22, %v1525_v48  ;;  %v2875_v8 = vpop.f32.mrb[140].mxu0 }
 0x605   :  { %v2876_v36 = vpop.f32.mrb[141].mxu0 }
 0x606   :  { %v2877_v31 = vadd.f32 %v2876_v36, %v2875_v8  ;;  %v2878_v19 = vpop.f32.mrb[142].mxu0  ;;  %2909 = vmatprep.subr.bf16.mxu1 %v1581_v5 }
 0x607   :  { %v2879_v46 = vpop.f32.mrb[143].mxu0  ;;  %2910 = vmatpush3.bf16.msra.mxu1 %v4861_v41 }
 0x608   :  { %v2880_v55 = vadd.f32 %v2879_v46, %v2878_v19  ;;  %v1533_v34 = vadd.f32 %v2877_v31, %v3679_v49  ;;  %v4863_v19 = vpack.c.bf16 %v4145_v54, %v4142_v18 }
 0x60a   :  { %v1536_v11 = vadd.f32 %v2880_v55, %v3685_v1 }
 0x60c   :  { %v1582_v40 = vpack.c.bf16 %v1536_v11, %v1533_v34  ;;  %v2881_v42 = vpop.f32.mrb[144].mxu0 }
 0x60d   :  { %v2882_v58 = vpop.f32.mrb[145].mxu0 }
 0x60e   :  { %v2883_v24 = vadd.f32 %v2882_v58, %v2881_v42  ;;  %v2884_v9 = vpop.f32.mrb[146].mxu0  ;;  %2911 = vmatprep.subr.bf16.mxu1 %v1582_v40  ;;  %v4864_v58 = vpack.c.bf16 %v4153_v2, %v4150_v12 }
 0x60f   :  { %v2885_v17 = vpop.f32.mrb[147].mxu0  ;;  %2912 = vmatpush3.bf16.msra.mxu1 %v4862_v62 }
 0x610   :  { %v2886_v60 = vadd.f32 %v2885_v17, %v2884_v9  ;;  %v1541_v33 = vadd.f32 %v2883_v24, %v3694_v45 }
 0x612   :  { %v1544_v29 = vadd.f32 %v2886_v60, %v3699_v63 }
 0x614   :  { %v1583_v48 = vpack.c.bf16 %v1544_v29, %v1541_v33  ;;  %v2887_v22 = vpop.f32.mrb[148].mxu0 }
 0x615   :  { %v2888_v5 = vpop.f32.mrb[149].mxu0 }
 0x616   :  { %v2889_v8 = vadd.f32 %v2888_v5, %v2887_v22  ;;  %v2890_v36 = vpop.f32.mrb[150].mxu0  ;;  %2913 = vmatprep.subr.bf16.mxu1 %v1583_v48  ;;  %v4865_v48 = vpack.c.bf16 %v4161_v43, %v4158_v23  ;;  %v4219_v23 = vld [vmem:[#allocation2 + $0x10] sm:$0xff]  ;;  %v4221_v43 = vld [vmem:[#allocation2 + $0x28] sm:$0xff] }
 0x617   :  { %v2891_v31 = vpop.f32.mrb[151].mxu0  ;;  %2914 = vmatpush3.bf16.msra.mxu1 %v4863_v19  ;;  %v4225_v19 = vld [vmem:[#allocation2 + $0x20] sm:$0xff] }
 0x618   :  { %v2892_v46 = vadd.f32 %v2891_v31, %v2890_v36  ;;  %v1549_v47 = vadd.f32 %v2889_v8, %v4785_v6  ;;  %v4866_v8 = vpack.c.bf16 %v4169_v38, %v4166_v30  ;;  %v4213_v36 = vld [vmem:[#allocation2] sm:$0xff]  ;;  %v4215_v31 = vld [vmem:[#allocation2 + $0x18] sm:$0xff]  ;;  %v4231_v38 = vld [vmem:[#allocation2 + $0x30] sm:$0xff] }
 0x619   :  { %v4227_v30 = vld [vmem:[#allocation2 + $0x38] sm:$0xff] }
 0x61a   :  { %v1552_v52 = vadd.f32 %v2892_v46, %v3697_v39  ;;  %v4233_v46 = vld [vmem:[#allocation2 + $0x48] sm:$0xff] }
 0x61c   :  { %v1584_v41 = vpack.c.bf16 %v1552_v52, %v1549_v47  ;;  %v2893_v55 = vpop.f32.mrb[152].mxu0  ;;  %v4237_v47 = vld [vmem:[#allocation2 + $0x40] sm:$0xff]  ;;  %v4239_v52 = vld [vmem:[#allocation2 + $0x58] sm:$0xff] }
 0x61d   :  { %v2894_v34 = vpop.f32.mrb[153].mxu0 }
 0x61e   :  { %v2895_v11 = vadd.f32 %v2894_v34, %v2893_v55  ;;  %v2896_v40 = vpop.f32.mrb[154].mxu0  ;;  %2915 = vmatprep.subr.bf16.mxu1 %v1584_v41  ;;  %v4243_v41 = vld [vmem:[#allocation2 + $0x50] sm:$0xff]  ;;  %v4245_v55 = vld [vmem:[#allocation2 + $0x68] sm:$0xff]  ;;  %v4249_v34 = vld [vmem:[#allocation2 + $0x60] sm:$0xff] }
 0x61f   :  { %v2897_v42 = vpop.f32.mrb[155].mxu0  ;;  %2916 = vmatpush3.bf16.msra.mxu1 %v4864_v58  ;;  %v4261_v58 = vld [vmem:[#allocation2 + $0x80] sm:$0xff] }
 0x620   :  { %v2898_v24 = vadd.f32 %v2897_v42, %v2896_v40  ;;  %v1557_v18 = vadd.f32 %v2895_v11, %v3706_v59  ;;  %v4251_v11 = vld [vmem:[#allocation2 + $0x78] sm:$0xff]  ;;  %v4255_v40 = vld [vmem:[#allocation2 + $0x70] sm:$0xff]  ;;  %v4257_v42 = vld [vmem:[#allocation2 + $0x88] sm:$0xff]  ;;  %4867 = vst [vmem:[#allocation29_spill] sm:$0xff] %v4261_v58 }
 0x622   :  { %v1560_v54 = vadd.f32 %v2898_v24, %v3711_v35  ;;  %v4263_v24 = vld [vmem:[#allocation2 + $0x98] sm:$0xff] }
 0x623   :  { %4868 = vst [vmem:[#allocation28_spill] sm:$0xff] %v4263_v24 }
 0x624   :  { %v1585_v9 = vpack.c.bf16 %v1560_v54, %v1557_v18  ;;  %v2899_v17 = vpop.f32.mrb[156].mxu0  ;;  %v4267_v18 = vld [vmem:[#allocation2 + $0x90] sm:$0xff]  ;;  %v4269_v54 = vld [vmem:[#allocation2 + $0xa8] sm:$0xff] }
 0x625   :  { %v2900_v62 = vpop.f32.mrb[157].mxu0  ;;  %4869 = vst [vmem:[#allocation30_spill] sm:$0xff] %v4267_v18  ;;  %4870 = vst [vmem:[#allocation31_spill] sm:$0xff] %v4269_v54 }
 0x626   :  { %v2901_v60 = vadd.f32 %v2900_v62, %v2899_v17  ;;  %v2902_v33 = vpop.f32.mrb[158].mxu0  ;;  %2917 = vmatprep.subr.bf16.mxu1 %v1585_v9  ;;  %v4273_v9 = vld [vmem:[#allocation2 + $0xa0] sm:$0xff]  ;;  %v4275_v17 = vld [vmem:[#allocation2 + $0xb8] sm:$0xff]  ;;  %v4279_v62 = vld [vmem:[#allocation2 + $0xb0] sm:$0xff] }
 0x627   :  { %v2903_v29 = vpop.f32.mrb[159].mxu0  ;;  %2918 = vmatpush3.bf16.msra.mxu1 %v4865_v48  ;;  %4871 = vst [vmem:[#allocation32_spill] sm:$0xff] %v4273_v9  ;;  %4872 = vst [vmem:[#allocation33_spill] sm:$0xff] %v4275_v17  ;;  %v4291_v48 = vld [vmem:[#allocation2 + $0xd0] sm:$0xff] }
 0x628   :  { %v2904_v22 = vadd.f32 %v2903_v29, %v2902_v33  ;;  %v1565_v12 = vadd.f32 %v2901_v60, %v3703_v16  ;;  %4873 = vst [vmem:[#allocation34_spill] sm:$0xff] %v4279_v62  ;;  %v4281_v60 = vld [vmem:[#allocation2 + $0xc8] sm:$0xff]  ;;  %v4285_v33 = vld [vmem:[#allocation2 + $0xc0] sm:$0xff]  ;;  %v4287_v29 = vld [vmem:[#allocation2 + $0xd8] sm:$0xff] }
 0x629   :  { %4874 = vst [vmem:[#allocation35_spill] sm:$0xff] %v4281_v60  ;;  %4875 = vst [vmem:[#allocation36_spill] sm:$0xff] %v4285_v33 }
 0x62a   :  { %v1568_v2 = vadd.f32 %v2904_v22, %v3709_v28  ;;  %4876 = vst [vmem:[#allocation37_spill] sm:$0xff] %v4287_v29  ;;  %4877 = vst [vmem:[#allocation38_spill] sm:$0xff] %v4291_v48  ;;  %v4293_v22 = vld [vmem:[#allocation2 + $0xe8] sm:$0xff] }
 0x62b   :  { %4878 = vst [vmem:[#allocation39_spill] sm:$0xff] %v4293_v22 }
 0x62c   :  { %v1586_v5 = vpack.c.bf16 %v1568_v2, %v1565_v12  ;;  %v4297_v12 = vld [vmem:[#allocation2 + $0xe0] sm:$0xff]  ;;  %v4299_v2 = vld [vmem:[#allocation2 + $0xf8] sm:$0xff] }
 0x62d   :  { %4879 = vst [vmem:[#allocation40_spill] sm:$0xff] %v4297_v12  ;;  %4880 = vst [vmem:[#allocation41_spill] sm:$0xff] %v4299_v2 }
 0x62e   :  { %2919 = vmatprep.subr.bf16.mxu1 %v1586_v5  ;;  %v4303_v5 = vld [vmem:[#allocation2 + $0xf0] sm:$0xff] }
 0x62f   :  { %2920 = vmatpush3.bf16.msra.mxu1 %v4866_v8  ;;  %4881 = vst [vmem:[#allocation42_spill] sm:$0xff] %v4303_v5 }
 0x632   :  { %1716 = vmatmul.mubr.bf16.vlgmr.msra.gmra.mrb[96].mxu1 %v4213_v36 }
 0x633   :  { %1723 = vmatprep.mubr.bf16.mxu1 %v4215_v31 }
 0x63a   :  { %1724 = vmatmul.mubr.bf16.gmra.mrb[100].mxu1 %v4219_v23 }
 0x63b   :  { %1731 = vmatprep.mubr.bf16.mxu1 %v4221_v43 }
 0x642   :  { %1732 = vmatmul.mubr.bf16.gmra.mrb[104].mxu1 %v4225_v19 }
 0x643   :  { %1739 = vmatprep.mubr.bf16.mxu1 %v4227_v30 }
 0x64a   :  { %1740 = vmatmul.mubr.bf16.gmra.mrb[108].mxu1 %v4231_v38 }
 0x64b   :  { %1747 = vmatprep.mubr.bf16.mxu1 %v4233_v46 }
 0x652   :  { %1748 = vmatmul.mubr.bf16.gmra.mrb[112].mxu1 %v4237_v47 }
 0x653   :  { %1755 = vmatprep.mubr.bf16.mxu1 %v4239_v52 }
 0x65a   :  { %1756 = vmatmul.mubr.bf16.gmra.mrb[116].mxu1 %v4243_v41 }
 0x65b   :  { %1763 = vmatprep.mubr.bf16.mxu1 %v4245_v55 }
 0x662   :  { %1764 = vmatmul.mubr.bf16.gmra.mrb[120].mxu1 %v4249_v34 }
 0x663   :  { %1771 = vmatprep.mubr.bf16.mxu1 %v4251_v11 }
 0x66a   :  { %1772 = vmatmul.mubr.bf16.gmra.mrb[124].mxu1 %v4255_v40 }
 0x66b   :  { %1779 = vmatprep.mubr.bf16.mxu1 %v4257_v42 }
 0x672   :  { %1780 = vmatmul.mubr.bf16.gmra.mrb[128].mxu1 %v4261_v58 }
 0x673   :  { %1787 = vmatprep.mubr.bf16.mxu1 %v4263_v24 }
 0x67a   :  { %1788 = vmatmul.mubr.bf16.gmra.mrb[132].mxu1 %v4267_v18 }
 0x67b   :  { %1795 = vmatprep.mubr.bf16.mxu1 %v4269_v54 }
 0x682   :  { %1796 = vmatmul.mubr.bf16.gmra.mrb[136].mxu1 %v4273_v9 }
 0x683   :  { %1803 = vmatprep.mubr.bf16.mxu1 %v4275_v17 }
 0x68a   :  { %1804 = vmatmul.mubr.bf16.gmra.mrb[140].mxu1 %v4279_v62 }
 0x68b   :  { %1811 = vmatprep.mubr.bf16.mxu1 %v4281_v60 }
 0x692   :  { %1812 = vmatmul.mubr.bf16.gmra.mrb[144].mxu1 %v4285_v33 }
 0x693   :  { %1819 = vmatprep.mubr.bf16.mxu1 %v4287_v29 }
 0x69a   :  { %1820 = vmatmul.mubr.bf16.gmra.mrb[148].mxu1 %v4291_v48 }
 0x69b   :  { %1827 = vmatprep.mubr.bf16.mxu1 %v4293_v22 }
 0x6a2   :  { %1828 = vmatmul.mubr.bf16.gmra.mrb[152].mxu1 %v4297_v12 }
 0x6a3   :  { %1835 = vmatprep.mubr.bf16.mxu1 %v4299_v2 }
 0x6aa   :  { %1836 = vmatmul.mubr.bf16.gmra.mrb[156].mxu1 %v4303_v5 }
 0x6ab   :  { %2261 = vmatprep.mubr.bf16.mxu1 %v4105_v51 }
 0x705   :  { %v2921_v8 = vpop.f32.mrb[96].mxu1 }
 0x706   :  { %v2922_v29 = vpop.f32.mrb[97].mxu1 }
 0x707   :  { %v2923_v33 = vadd.f32 %v2922_v29, %v2921_v8  ;;  %v2924_v48 = vpop.f32.mrb[98].mxu1 }
 0x708   :  { %v2925_v60 = vpop.f32.mrb[99].mxu1 }
 0x709   :  { %v2926_v22 = vadd.f32 %v2925_v60, %v2924_v48  ;;  %v4308_v62 = vadd.f32 %v2923_v33, %v4843_v37 }
 0x70b   :  { %v4311_v17 = vadd.f32 %v2926_v22, %v4844_v53 }
 0x70d   :  { %v2927_v12 = vpop.f32.mrb[100].mxu1 }
 0x70e   :  { %v2928_v9 = vpop.f32.mrb[101].mxu1 }
 0x70f   :  { %v2929_v5 = vadd.f32 %v2928_v9, %v2927_v12  ;;  %v2930_v54 = vpop.f32.mrb[102].mxu1 }
 0x710   :  { %v2931_v51 = vpop.f32.mrb[103].mxu1 }
 0x711   :  { %v2932_v18 = vadd.f32 %v2931_v51, %v2930_v54  ;;  %v4316_v29 = vadd.f32 %v2929_v5, %v4845_v32 }
 0x713   :  { %v4319_v60 = vadd.f32 %v2932_v18, %v4846_v7 }
 0x715   :  { %v2933_v48 = vpop.f32.mrb[104].mxu1 }
 0x716   :  { %v2934_v22 = vpop.f32.mrb[105].mxu1 }
 0x717   :  { %v2935_v8 = vadd.f32 %v2934_v22, %v2933_v48  ;;  %v2936_v53 = vpop.f32.mrb[106].mxu1 }
 0x718   :  { %v2937_v2 = vpop.f32.mrb[107].mxu1 }
 0x719   :  { %v2938_v37 = vadd.f32 %v2937_v2, %v2936_v53  ;;  %v4324_v9 = vadd.f32 %v2935_v8, %v4847_v25 }
 0x71b   :  { %v4327_v54 = vadd.f32 %v2938_v37, %v4848_v15 }
 0x71d   :  { %v2939_v18 = vpop.f32.mrb[108].mxu1 }
 0x71e   :  { %v2940_v5 = vpop.f32.mrb[109].mxu1 }
 0x71f   :  { %v2941_v51 = vadd.f32 %v2940_v5, %v2939_v18  ;;  %v2942_v7 = vpop.f32.mrb[110].mxu1 }
 0x720   :  { %v2943_v33 = vpop.f32.mrb[111].mxu1 }
 0x721   :  { %v2944_v32 = vadd.f32 %v2943_v33, %v2942_v7  ;;  %v4332_v48 = vadd.f32 %v2941_v51, %v4849_v44 }
 0x723   :  { %v4335_v53 = vadd.f32 %v2944_v32, %v4850_v50 }
 0x725   :  { %v2945_v37 = vpop.f32.mrb[112].mxu1 }
 0x726   :  { %v2946_v22 = vpop.f32.mrb[113].mxu1 }
 0x727   :  { %v2947_v8 = vadd.f32 %v2946_v22, %v2945_v37  ;;  %v2948_v15 = vpop.f32.mrb[114].mxu1 }
 0x728   :  { %v2949_v12 = vpop.f32.mrb[115].mxu1 }
 0x729   :  { %v2950_v25 = vadd.f32 %v2949_v12, %v2948_v15  ;;  %v4340_v18 = vadd.f32 %v2947_v8, %v4851_v14 }
 0x72b   :  { %v4343_v7 = vadd.f32 %v2950_v25, %v4852_v61 }
 0x72d   :  { %v2951_v32 = vpop.f32.mrb[116].mxu1 }
 0x72e   :  { %v2952_v5 = vpop.f32.mrb[117].mxu1 }
 0x72f   :  { %v2953_v51 = vadd.f32 %v2952_v5, %v2951_v32  ;;  %v2954_v50 = vpop.f32.mrb[118].mxu1 }
 0x730   :  { %v2955_v2 = vpop.f32.mrb[119].mxu1 }
 0x731   :  { %v2956_v44 = vadd.f32 %v2955_v2, %v2954_v50  ;;  %v4348_v37 = vadd.f32 %v2953_v51, %v4853_v10 }
 0x733   :  { %v4351_v15 = vadd.f32 %v2956_v44, %v4854_v57 }
 0x735   :  { %v2957_v25 = vpop.f32.mrb[120].mxu1 }
 0x736   :  { %v2958_v22 = vpop.f32.mrb[121].mxu1 }
 0x737   :  { %v2959_v8 = vadd.f32 %v2958_v22, %v2957_v25  ;;  %v2960_v61 = vpop.f32.mrb[122].mxu1  ;;  %v4882_v22 = vld [vmem:[#allocation26_spill] sm:$0xff] }
 0x738   :  { %v2961_v33 = vpop.f32.mrb[123].mxu1 }
 0x739   :  { %v2962_v14 = vadd.f32 %v2961_v33, %v2960_v61  ;;  %v4356_v32 = vadd.f32 %v2959_v8, %v4855_v13  ;;  %v4883_v33 = vpack.c.bf16 %v4311_v17, %v4308_v62 }
 0x73b   :  { %v4359_v50 = vadd.f32 %v2962_v14, %v4856_v0 }
 0x73d   :  { %v2963_v44 = vpop.f32.mrb[124].mxu1 }
 0x73e   :  { %v2964_v5 = vpop.f32.mrb[125].mxu1 }
 0x73f   :  { %v2965_v51 = vadd.f32 %v2964_v5, %v2963_v44  ;;  %v2966_v57 = vpop.f32.mrb[126].mxu1 }
 0x740   :  { %v2967_v12 = vpop.f32.mrb[127].mxu1 }
 0x741   :  { %v2968_v10 = vadd.f32 %v2967_v12, %v2966_v57  ;;  %v4364_v25 = vadd.f32 %v2965_v51, %v4857_v27 }
 0x743   :  { %v4367_v61 = vadd.f32 %v2968_v10, %v4882_v22 }
 0x745   :  { %v2969_v14 = vpop.f32.mrb[128].mxu1 }
 0x746   :  { %v2970_v8 = vpop.f32.mrb[129].mxu1 }
 0x747   :  { %v2971_v0 = vadd.f32 %v2970_v8, %v2969_v14  ;;  %v2972_v13 = vpop.f32.mrb[130].mxu1 }
 0x748   :  { %v2973_v2 = vpop.f32.mrb[131].mxu1 }
 0x749   :  { %v2974_v24 = vadd.f32 %v2973_v2, %v2972_v13  ;;  %v1782_v44 = vadd.f32 %v2971_v0, %v3670_v20 }
 0x74b   :  { %v1785_v5 = vadd.f32 %v2974_v24, %v4819_v26 }
 0x74d   :  { %v1852_v57 = vpack.c.bf16 %v1785_v5, %v1782_v44  ;;  %v2975_v12 = vpop.f32.mrb[132].mxu1 }
 0x74e   :  { %v2976_v51 = vpop.f32.mrb[133].mxu1 }
 0x74f   :  { %v2977_v27 = vadd.f32 %v2976_v51, %v2975_v12  ;;  %v2978_v58 = vpop.f32.mrb[134].mxu1  ;;  %3017 = vmatprep.subr.bf16.mxu0 %v1852_v57  ;;  %v4884_v57 = vpack.c.bf16 %v4319_v60, %v4316_v29 }
 0x750   :  { %v2979_v10 = vpop.f32.mrb[135].mxu1  ;;  %3018 = vmatpush3.bf16.msra.mxu0 %v4883_v33 }
 0x751   :  { %v2980_v22 = vadd.f32 %v2979_v10, %v2978_v58  ;;  %v1790_v14 = vadd.f32 %v2977_v27, %v3667_v4 }
 0x753   :  { %v1793_v13 = vadd.f32 %v2980_v22, %v3673_v21 }
 0x755   :  { %v1853_v2 = vpack.c.bf16 %v1793_v13, %v1790_v14  ;;  %v2981_v0 = vpop.f32.mrb[136].mxu1  ;;  %v4885_v14 = vpack.c.bf16 %v4327_v54, %v4324_v9 }
 0x756   :  { %v2982_v8 = vpop.f32.mrb[137].mxu1 }
 0x757   :  { %v2983_v24 = vadd.f32 %v2982_v8, %v2981_v0  ;;  %v2984_v44 = vpop.f32.mrb[138].mxu1  ;;  %3019 = vmatprep.subr.bf16.mxu0 %v1853_v2 }
 0x758   :  { %v2985_v5 = vpop.f32.mrb[139].mxu1  ;;  %3020 = vmatpush3.bf16.msra.mxu0 %v4884_v57  ;;  %v4886_v57 = vpack.c.bf16 %v4335_v53, %v4332_v48 }
 0x759   :  { %v2986_v12 = vadd.f32 %v2985_v5, %v2984_v44  ;;  %v1798_v17 = vadd.f32 %v2983_v24, %v3682_v56 }
 0x75b   :  { %v1801_v58 = vadd.f32 %v2986_v12, %v3687_v3 }
 0x75d   :  { %v1854_v62 = vpack.c.bf16 %v1801_v58, %v1798_v17  ;;  %v2987_v27 = vpop.f32.mrb[140].mxu1 }
 0x75e   :  { %v2988_v33 = vpop.f32.mrb[141].mxu1 }
 0x75f   :  { %v2989_v22 = vadd.f32 %v2988_v33, %v2987_v27  ;;  %v2990_v51 = vpop.f32.mrb[142].mxu1  ;;  %3021 = vmatprep.subr.bf16.mxu0 %v1854_v62 }
 0x760   :  { %v2991_v10 = vpop.f32.mrb[143].mxu1  ;;  %3022 = vmatpush3.bf16.msra.mxu0 %v4885_v14 }
 0x761   :  { %v2992_v13 = vadd.f32 %v2991_v10, %v2990_v51  ;;  %v1806_v29 = vadd.f32 %v2989_v22, %v3679_v49  ;;  %v4887_v51 = vpack.c.bf16 %v4343_v7, %v4340_v18 }
 0x763   :  { %v1809_v60 = vadd.f32 %v2992_v13, %v3685_v1 }
 0x765   :  { %v1855_v2 = vpack.c.bf16 %v1809_v60, %v1806_v29  ;;  %v2993_v0 = vpop.f32.mrb[144].mxu1 }
 0x766   :  { %v2994_v8 = vpop.f32.mrb[145].mxu1 }
 0x767   :  { %v2995_v24 = vadd.f32 %v2994_v8, %v2993_v0  ;;  %v2996_v44 = vpop.f32.mrb[146].mxu1  ;;  %3023 = vmatprep.subr.bf16.mxu0 %v1855_v2  ;;  %v4888_v8 = vpack.c.bf16 %v4351_v15, %v4348_v37 }
 0x768   :  { %v2997_v5 = vpop.f32.mrb[147].mxu1  ;;  %3024 = vmatpush3.bf16.msra.mxu0 %v4886_v57 }
 0x769   :  { %v2998_v12 = vadd.f32 %v2997_v5, %v2996_v44  ;;  %v1814_v9 = vadd.f32 %v2995_v24, %v3694_v45 }
 0x76b   :  { %v1817_v54 = vadd.f32 %v2998_v12, %v3699_v63 }
 0x76d   :  { %v1856_v17 = vpack.c.bf16 %v1817_v54, %v1814_v9  ;;  %v2999_v58 = vpop.f32.mrb[148].mxu1 }
 0x76e   :  { %v3000_v62 = vpop.f32.mrb[149].mxu1 }
 0x76f   :  { %v3001_v27 = vadd.f32 %v3000_v62, %v2999_v58  ;;  %v3002_v33 = vpop.f32.mrb[150].mxu1  ;;  %3025 = vmatprep.subr.bf16.mxu0 %v1856_v17  ;;  %v4889_v17 = vpack.c.bf16 %v4359_v50, %v4356_v32  ;;  %v4891_v32 = vld [vmem:[#allocation29_spill] sm:$0xff]  ;;  %v4892_v50 = vld [vmem:[#allocation28_spill] sm:$0xff] }
 0x770   :  { %v3003_v22 = vpop.f32.mrb[151].mxu1  ;;  %3026 = vmatpush3.bf16.msra.mxu0 %v4887_v51  ;;  %v4897_v51 = vld [vmem:[#allocation34_spill] sm:$0xff] }
 0x771   :  { %v3004_v10 = vadd.f32 %v3003_v22, %v3002_v33  ;;  %v1822_v48 = vadd.f32 %v3001_v27, %v4785_v6  ;;  %v4890_v27 = vpack.c.bf16 %v4367_v61, %v4364_v25  ;;  %v4893_v25 = vld [vmem:[#allocation30_spill] sm:$0xff]  ;;  %v4894_v61 = vld [vmem:[#allocation31_spill] sm:$0xff]  ;;  %v4895_v33 = vld [vmem:[#allocation32_spill] sm:$0xff] }
 0x772   :  { %v4896_v22 = vld [vmem:[#allocation33_spill] sm:$0xff] }
 0x773   :  { %v1825_v53 = vadd.f32 %v3004_v10, %v3697_v39  ;;  %v4898_v10 = vld [vmem:[#allocation35_spill] sm:$0xff] }
 0x775   :  { %v1857_v14 = vpack.c.bf16 %v1825_v53, %v1822_v48  ;;  %v3005_v13 = vpop.f32.mrb[152].mxu1  ;;  %v4899_v48 = vld [vmem:[#allocation36_spill] sm:$0xff]  ;;  %v4900_v53 = vld [vmem:[#allocation37_spill] sm:$0xff] }
 0x776   :  { %v3006_v29 = vpop.f32.mrb[153].mxu1 }
 0x777   :  { %v3007_v60 = vadd.f32 %v3006_v29, %v3005_v13  ;;  %v3008_v2 = vpop.f32.mrb[154].mxu1  ;;  %3027 = vmatprep.subr.bf16.mxu0 %v1857_v14  ;;  %v4901_v14 = vld [vmem:[#allocation38_spill] sm:$0xff]  ;;  %v4902_v13 = vld [vmem:[#allocation39_spill] sm:$0xff]  ;;  %v4903_v29 = vld [vmem:[#allocation40_spill] sm:$0xff] }
 0x778   :  { %v3009_v0 = vpop.f32.mrb[155].mxu1  ;;  %3028 = vmatpush3.bf16.msra.mxu0 %v4888_v8 }
 0x779   :  { %v3010_v24 = vadd.f32 %v3009_v0, %v3008_v2  ;;  %v1830_v18 = vadd.f32 %v3007_v60, %v3706_v59  ;;  %v4904_v60 = vld [vmem:[#allocation41_spill] sm:$0xff]  ;;  %v4905_v2 = vld [vmem:[#allocation42_spill] sm:$0xff] }
 0x77b   :  { %v1833_v7 = vadd.f32 %v3010_v24, %v3711_v35 }
 0x77d   :  { %v1858_v44 = vpack.c.bf16 %v1833_v7, %v1830_v18  ;;  %v3011_v5 = vpop.f32.mrb[156].mxu1 }
 0x77e   :  { %v3012_v57 = vpop.f32.mrb[157].mxu1 }
 0x77f   :  { %v3013_v12 = vadd.f32 %v3012_v57, %v3011_v5  ;;  %v3014_v9 = vpop.f32.mrb[158].mxu1  ;;  %3029 = vmatprep.subr.bf16.mxu0 %v1858_v44  ;;  %v4906_v5 = vld [vmem:[#allocation13_spill] sm:$0xff] }
 0x780   :  { %v3015_v54 = vpop.f32.mrb[159].mxu1  ;;  %3030 = vmatpush3.bf16.msra.mxu0 %v4889_v17 }
 0x781   :  { %v3016_v58 = vadd.f32 %v3015_v54, %v3014_v9  ;;  %v1838_v37 = vadd.f32 %v3013_v12, %v3703_v16  ;;  %v4907_v12 = vld [vmem:[#allocation15_spill] sm:$0xff] }
 0x783   :  { %v1841_v15 = vadd.f32 %v3016_v58, %v3709_v28 }
 0x785   :  { %v1859_v62 = vpack.c.bf16 %v1841_v15, %v1838_v37 }
 0x787   :  { %3031 = vmatprep.subr.bf16.mxu0 %v1859_v62 }
 0x788   :  { %3032 = vmatpush3.bf16.msra.mxu0 %v4890_v27 }
 0x78b   :  { %1989 = vmatmul.mubr.bf16.vlgmr.msra.gmra.mrb[160].mxu0 %v4213_v36 }
 0x78c   :  { %1996 = vmatprep.mubr.bf16.mxu0 %v4215_v31 }
 0x793   :  { %1997 = vmatmul.mubr.bf16.gmra.mrb[164].mxu0 %v4219_v23 }
 0x794   :  { %2004 = vmatprep.mubr.bf16.mxu0 %v4221_v43 }
 0x79b   :  { %2005 = vmatmul.mubr.bf16.gmra.mrb[168].mxu0 %v4225_v19 }
 0x79c   :  { %2012 = vmatprep.mubr.bf16.mxu0 %v4227_v30 }
 0x7a3   :  { %2013 = vmatmul.mubr.bf16.gmra.mrb[172].mxu0 %v4231_v38 }
 0x7a4   :  { %2020 = vmatprep.mubr.bf16.mxu0 %v4233_v46 }
 0x7ab   :  { %2021 = vmatmul.mubr.bf16.gmra.mrb[176].mxu0 %v4237_v47 }
 0x7ac   :  { %2028 = vmatprep.mubr.bf16.mxu0 %v4239_v52 }
 0x7b3   :  { %2029 = vmatmul.mubr.bf16.gmra.mrb[180].mxu0 %v4243_v41 }
 0x7b4   :  { %2036 = vmatprep.mubr.bf16.mxu0 %v4245_v55 }
 0x7bb   :  { %2037 = vmatmul.mubr.bf16.gmra.mrb[184].mxu0 %v4249_v34 }
 0x7bc   :  { %2044 = vmatprep.mubr.bf16.mxu0 %v4251_v11 }
 0x7c3   :  { %2045 = vmatmul.mubr.bf16.gmra.mrb[188].mxu0 %v4255_v40 }
 0x7c4   :  { %2052 = vmatprep.mubr.bf16.mxu0 %v4257_v42 }
 0x7cb   :  { %2053 = vmatmul.mubr.bf16.gmra.mrb[192].mxu0 %v4891_v32 }
 0x7cc   :  { %2060 = vmatprep.mubr.bf16.mxu0 %v4892_v50 }
 0x7d3   :  { %2061 = vmatmul.mubr.bf16.gmra.mrb[196].mxu0 %v4893_v25  ;;  %v4920_v25 = vld [vmem:[#allocation24_spill] sm:$0xff] }
 0x7d4   :  { %2068 = vmatprep.mubr.bf16.mxu0 %v4894_v61 }
 0x7db   :  { %2069 = vmatmul.mubr.bf16.gmra.mrb[200].mxu0 %v4895_v33  ;;  %v4918_v33 = vld [vmem:[#allocation25_spill] sm:$0xff] }
 0x7dc   :  { %2076 = vmatprep.mubr.bf16.mxu0 %v4896_v22 }
 0x7e3   :  { %2077 = vmatmul.mubr.bf16.gmra.mrb[204].mxu0 %v4897_v51  ;;  %v4916_v51 = vld [vmem:[#allocation20_spill] sm:$0xff] }
 0x7e4   :  { %2084 = vmatprep.mubr.bf16.mxu0 %v4898_v10 }
 0x7eb   :  { %2085 = vmatmul.mubr.bf16.gmra.mrb[208].mxu0 %v4899_v48  ;;  %v4914_v48 = vld [vmem:[#allocation21_spill] sm:$0xff] }
 0x7ec   :  { %2092 = vmatprep.mubr.bf16.mxu0 %v4900_v53 }
 0x7f3   :  { %2093 = vmatmul.mubr.bf16.gmra.mrb[212].mxu0 %v4901_v14  ;;  %v4912_v14 = vld [vmem:[#allocation16_spill] sm:$0xff] }
 0x7f4   :  { %2100 = vmatprep.mubr.bf16.mxu0 %v4902_v13 }
 0x7fb   :  { %2101 = vmatmul.mubr.bf16.gmra.mrb[216].mxu0 %v4903_v29  ;;  %v4910_v29 = vld [vmem:[#allocation17_spill] sm:$0xff] }
 0x7fc   :  { %2108 = vmatprep.mubr.bf16.mxu0 %v4904_v60 }
 0x803   :  { %2109 = vmatmul.mubr.bf16.gmra.mrb[220].mxu0 %v4905_v2  ;;  %v4908_v2 = vld [vmem:[#allocation12_spill] sm:$0xff] }
 0x85e   :  { %v3033_v0 = vpop.f32.mrb[160].mxu0 }
 0x85f   :  { %v3034_v8 = vpop.f32.mrb[161].mxu0 }
 0x860   :  { %v3035_v24 = vadd.f32 %v3034_v8, %v3033_v0  ;;  %v3036_v18 = vpop.f32.mrb[162].mxu0  ;;  %v4909_v8 = vld [vmem:[#allocation14_spill] sm:$0xff] }
 0x861   :  { %v3037_v7 = vpop.f32.mrb[163].mxu0 }
 0x862   :  { %v3038_v44 = vadd.f32 %v3037_v7, %v3036_v18  ;;  %v4443_v57 = vadd.f32 %v3035_v24, %v4906_v5 }
 0x864   :  { %v4446_v9 = vadd.f32 %v3038_v44, %v4907_v12 }
 0x866   :  { %v3039_v17 = vpop.f32.mrb[164].mxu0 }
 0x867   :  { %v3040_v58 = vpop.f32.mrb[165].mxu0 }
 0x868   :  { %v3041_v37 = vadd.f32 %v3040_v58, %v3039_v17  ;;  %v3042_v15 = vpop.f32.mrb[166].mxu0  ;;  %v4911_v58 = vld [vmem:[#allocation19_spill] sm:$0xff] }
 0x869   :  { %v3043_v62 = vpop.f32.mrb[167].mxu0 }
 0x86a   :  { %v3044_v27 = vadd.f32 %v3043_v62, %v3042_v15  ;;  %v4451_v0 = vadd.f32 %v3041_v37, %v4908_v2 }
 0x86c   :  { %v4454_v18 = vadd.f32 %v3044_v27, %v4909_v8 }
 0x86e   :  { %v3045_v7 = vpop.f32.mrb[168].mxu0 }
 0x86f   :  { %v3046_v44 = vpop.f32.mrb[169].mxu0 }
 0x870   :  { %v3047_v12 = vadd.f32 %v3046_v44, %v3045_v7  ;;  %v3048_v5 = vpop.f32.mrb[170].mxu0  ;;  %v4913_v44 = vld [vmem:[#allocation18_spill] sm:$0xff] }
 0x871   :  { %v3049_v54 = vpop.f32.mrb[171].mxu0 }
 0x872   :  { %v3050_v60 = vadd.f32 %v3049_v54, %v3048_v5  ;;  %v4459_v17 = vadd.f32 %v3047_v12, %v4910_v29 }
 0x874   :  { %v4462_v15 = vadd.f32 %v3050_v60, %v4911_v58 }
 0x876   :  { %v3051_v62 = vpop.f32.mrb[172].mxu0 }
 0x877   :  { %v3052_v27 = vpop.f32.mrb[173].mxu0 }
 0x878   :  { %v3053_v8 = vadd.f32 %v3052_v27, %v3051_v62  ;;  %v3054_v2 = vpop.f32.mrb[174].mxu0  ;;  %v4915_v27 = vld [vmem:[#allocation23_spill] sm:$0xff] }
 0x879   :  { %v3055_v24 = vpop.f32.mrb[175].mxu0 }
 0x87a   :  { %v3056_v13 = vadd.f32 %v3055_v24, %v3054_v2  ;;  %v4467_v7 = vadd.f32 %v3053_v8, %v4912_v14 }
 0x87c   :  { %v4470_v5 = vadd.f32 %v3056_v13, %v4913_v44 }
 0x87e   :  { %v3057_v60 = vpop.f32.mrb[176].mxu0 }
 0x87f   :  { %v3058_v54 = vpop.f32.mrb[177].mxu0 }
 0x880   :  { %v3059_v58 = vadd.f32 %v3058_v54, %v3057_v60  ;;  %v3060_v29 = vpop.f32.mrb[178].mxu0  ;;  %v4917_v54 = vld [vmem:[#allocation22_spill] sm:$0xff] }
 0x881   :  { %v3061_v37 = vpop.f32.mrb[179].mxu0 }
 0x882   :  { %v3062_v53 = vadd.f32 %v3061_v37, %v3060_v29  ;;  %v4475_v62 = vadd.f32 %v3059_v58, %v4914_v48 }
 0x884   :  { %v4478_v2 = vadd.f32 %v3062_v53, %v4915_v27 }
 0x886   :  { %v3063_v13 = vpop.f32.mrb[180].mxu0 }
 0x887   :  { %v3064_v24 = vpop.f32.mrb[181].mxu0 }
 0x888   :  { %v3065_v44 = vadd.f32 %v3064_v24, %v3063_v13  ;;  %v3066_v14 = vpop.f32.mrb[182].mxu0  ;;  %v4919_v24 = vld [vmem:[#allocation27_spill] sm:$0xff] }
 0x889   :  { %v3067_v12 = vpop.f32.mrb[183].mxu0 }
 0x88a   :  { %v3068_v10 = vadd.f32 %v3067_v12, %v3066_v14  ;;  %v4483_v60 = vadd.f32 %v3065_v44, %v4916_v51 }
 0x88c   :  { %v4486_v29 = vadd.f32 %v3068_v10, %v4917_v54 }
 0x88e   :  { %v3069_v53 = vpop.f32.mrb[184].mxu0 }
 0x88f   :  { %v3070_v37 = vpop.f32.mrb[185].mxu0 }
 0x890   :  { %v3071_v27 = vadd.f32 %v3070_v37, %v3069_v53  ;;  %v3072_v48 = vpop.f32.mrb[186].mxu0  ;;  %v4921_v37 = vld [vmem:[#allocation26_spill] sm:$0xff] }
 0x891   :  { %v3073_v8 = vpop.f32.mrb[187].mxu0 }
 0x892   :  { %v3074_v22 = vadd.f32 %v3073_v8, %v3072_v48  ;;  %v4491_v13 = vadd.f32 %v3071_v27, %v4918_v33  ;;  %v4922_v27 = vpack.c.bf16 %v4446_v9, %v4443_v57 }
 0x894   :  { %v4494_v14 = vadd.f32 %v3074_v22, %v4919_v24 }
 0x896   :  { %v3075_v10 = vpop.f32.mrb[188].mxu0 }
 0x897   :  { %v3076_v12 = vpop.f32.mrb[189].mxu0 }
 0x898   :  { %v3077_v54 = vadd.f32 %v3076_v12, %v3075_v10  ;;  %v3078_v51 = vpop.f32.mrb[190].mxu0 }
 0x899   :  { %v3079_v58 = vpop.f32.mrb[191].mxu0 }
 0x89a   :  { %v3080_v61 = vadd.f32 %v3079_v58, %v3078_v51  ;;  %v4499_v53 = vadd.f32 %v3077_v54, %v4920_v25 }
 0x89c   :  { %v4502_v48 = vadd.f32 %v3080_v61, %v4921_v37 }
 0x89e   :  { %v3081_v22 = vpop.f32.mrb[192].mxu0 }
 0x89f   :  { %v3082_v8 = vpop.f32.mrb[193].mxu0 }
 0x8a0   :  { %v3083_v24 = vadd.f32 %v3082_v8, %v3081_v22  ;;  %v3084_v33 = vpop.f32.mrb[194].mxu0 }
 0x8a1   :  { %v3085_v44 = vpop.f32.mrb[195].mxu0 }
 0x8a2   :  { %v3086_v50 = vadd.f32 %v3085_v44, %v3084_v33  ;;  %v2055_v10 = vadd.f32 %v3083_v24, %v3670_v20 }
 0x8a4   :  { %v2058_v12 = vadd.f32 %v3086_v50, %v4819_v26 }
 0x8a6   :  { %v2125_v51 = vpack.c.bf16 %v2058_v12, %v2055_v10  ;;  %v3087_v58 = vpop.f32.mrb[196].mxu0 }
 0x8a7   :  { %v3088_v54 = vpop.f32.mrb[197].mxu0 }
 0x8a8   :  { %v3089_v25 = vadd.f32 %v3088_v54, %v3087_v58  ;;  %v3090_v32 = vpop.f32.mrb[198].mxu0  ;;  %3129 = vmatprep.subr.bf16.mxu1 %v2125_v51  ;;  %v4923_v51 = vpack.c.bf16 %v4454_v18, %v4451_v0 }
 0x8a9   :  { %v3091_v61 = vpop.f32.mrb[199].mxu0  ;;  %3130 = vmatpush3.bf16.msra.mxu1 %v4922_v27 }
 0x8aa   :  { %v3092_v37 = vadd.f32 %v3091_v61, %v3090_v32  ;;  %v2063_v22 = vadd.f32 %v3089_v25, %v3667_v4 }
 0x8ac   :  { %v2066_v33 = vadd.f32 %v3092_v37, %v3673_v21 }
 0x8ae   :  { %v2126_v44 = vpack.c.bf16 %v2066_v33, %v2063_v22  ;;  %v3093_v24 = vpop.f32.mrb[200].mxu0  ;;  %v4924_v22 = vpack.c.bf16 %v4462_v15, %v4459_v17 }
 0x8af   :  { %v3094_v8 = vpop.f32.mrb[201].mxu0 }
 0x8b0   :  { %v3095_v50 = vadd.f32 %v3094_v8, %v3093_v24  ;;  %v3096_v10 = vpop.f32.mrb[202].mxu0  ;;  %3131 = vmatprep.subr.bf16.mxu1 %v2126_v44 }
 0x8b1   :  { %v3097_v12 = vpop.f32.mrb[203].mxu0  ;;  %3132 = vmatpush3.bf16.msra.mxu1 %v4923_v51  ;;  %v4925_v51 = vpack.c.bf16 %v4470_v5, %v4467_v7 }
 0x8b2   :  { %v3098_v58 = vadd.f32 %v3097_v12, %v3096_v10  ;;  %v2071_v57 = vadd.f32 %v3095_v50, %v3682_v56 }
 0x8b4   :  { %v2074_v32 = vadd.f32 %v3098_v58, %v3687_v3 }
 0x8b6   :  { %v2127_v9 = vpack.c.bf16 %v2074_v32, %v2071_v57  ;;  %v3099_v25 = vpop.f32.mrb[204].mxu0 }
 0x8b7   :  { %v3100_v27 = vpop.f32.mrb[205].mxu0 }
 0x8b8   :  { %v3101_v37 = vadd.f32 %v3100_v27, %v3099_v25  ;;  %v3102_v54 = vpop.f32.mrb[206].mxu0  ;;  %3133 = vmatprep.subr.bf16.mxu1 %v2127_v9 }
 0x8b9   :  { %v3103_v61 = vpop.f32.mrb[207].mxu0  ;;  %3134 = vmatpush3.bf16.msra.mxu1 %v4924_v22 }
 0x8ba   :  { %v3104_v33 = vadd.f32 %v3103_v61, %v3102_v54  ;;  %v2079_v0 = vadd.f32 %v3101_v37, %v3679_v49  ;;  %v4926_v54 = vpack.c.bf16 %v4478_v2, %v4475_v62 }
 0x8bc   :  { %v2082_v18 = vadd.f32 %v3104_v33, %v3685_v1 }
 0x8be   :  { %v2128_v44 = vpack.c.bf16 %v2082_v18, %v2079_v0  ;;  %v3105_v24 = vpop.f32.mrb[208].mxu0 }
 0x8bf   :  { %v3106_v8 = vpop.f32.mrb[209].mxu0 }
 0x8c0   :  { %v3107_v50 = vadd.f32 %v3106_v8, %v3105_v24  ;;  %v3108_v10 = vpop.f32.mrb[210].mxu0  ;;  %3135 = vmatprep.subr.bf16.mxu1 %v2128_v44  ;;  %v4927_v8 = vpack.c.bf16 %v4486_v29, %v4483_v60 }
 0x8c1   :  { %v3109_v12 = vpop.f32.mrb[211].mxu0  ;;  %3136 = vmatpush3.bf16.msra.mxu1 %v4925_v51 }
 0x8c2   :  { %v3110_v58 = vadd.f32 %v3109_v12, %v3108_v10  ;;  %v2087_v17 = vadd.f32 %v3107_v50, %v3694_v45 }
 0x8c4   :  { %v2090_v15 = vadd.f32 %v3110_v58, %v3699_v63 }
 0x8c6   :  { %v2129_v57 = vpack.c.bf16 %v2090_v15, %v2087_v17  ;;  %v3111_v32 = vpop.f32.mrb[212].mxu0 }
 0x8c7   :  { %v3112_v9 = vpop.f32.mrb[213].mxu0 }
 0x8c8   :  { %v3113_v25 = vadd.f32 %v3112_v9, %v3111_v32  ;;  %v3114_v27 = vpop.f32.mrb[214].mxu0  ;;  %3137 = vmatprep.subr.bf16.mxu1 %v2129_v57  ;;  %v4928_v57 = vpack.c.bf16 %v4494_v14, %v4491_v13 }
 0x8c9   :  { %v3115_v37 = vpop.f32.mrb[215].mxu0  ;;  %3138 = vmatpush3.bf16.msra.mxu1 %v4926_v54 }
 0x8ca   :  { %v3116_v61 = vadd.f32 %v3115_v37, %v3114_v27  ;;  %v2095_v7 = vadd.f32 %v3113_v25, %v4785_v6  ;;  %v4929_v25 = vpack.c.bf16 %v4502_v48, %v4499_v53  ;;  %v4945_v27 = vld [vmem:[#allocation13_spill] sm:$0xff] }
 0x8cc   :  { %v2098_v5 = vadd.f32 %v3116_v61, %v3697_v39  ;;  %v4946_v61 = vld [vmem:[#allocation15_spill] sm:$0xff] }
 0x8ce   :  { %v2130_v22 = vpack.c.bf16 %v2098_v5, %v2095_v7  ;;  %v3117_v33 = vpop.f32.mrb[216].mxu0 }
 0x8cf   :  { %v3118_v0 = vpop.f32.mrb[217].mxu0 }
 0x8d0   :  { %v3119_v18 = vadd.f32 %v3118_v0, %v3117_v33  ;;  %v3120_v44 = vpop.f32.mrb[218].mxu0  ;;  %3139 = vmatprep.subr.bf16.mxu1 %v2130_v22 }
 0x8d1   :  { %v3121_v24 = vpop.f32.mrb[219].mxu0  ;;  %3140 = vmatpush3.bf16.msra.mxu1 %v4927_v8 }
 0x8d2   :  { %v3122_v50 = vadd.f32 %v3121_v24, %v3120_v44  ;;  %v2103_v62 = vadd.f32 %v3119_v18, %v3706_v59  ;;  %v4947_v44 = vld [vmem:[#allocation12_spill] sm:$0xff] }
 0x8d4   :  { %v2106_v2 = vadd.f32 %v3122_v50, %v3711_v35  ;;  %v4948_v50 = vld [vmem:[#allocation14_spill] sm:$0xff] }
 0x8d6   :  { %v2131_v10 = vpack.c.bf16 %v2106_v2, %v2103_v62  ;;  %v3123_v12 = vpop.f32.mrb[220].mxu0 }
 0x8d7   :  { %v3124_v51 = vpop.f32.mrb[221].mxu0 }
 0x8d8   :  { %v3125_v58 = vadd.f32 %v3124_v51, %v3123_v12  ;;  %v3126_v17 = vpop.f32.mrb[222].mxu0  ;;  %3141 = vmatprep.subr.bf16.mxu1 %v2131_v10 }
 0x8d9   :  { %v3127_v15 = vpop.f32.mrb[223].mxu0  ;;  %3142 = vmatpush3.bf16.msra.mxu1 %v4928_v57 }
 0x8da   :  { %v3128_v32 = vadd.f32 %v3127_v15, %v3126_v17  ;;  %v2111_v60 = vadd.f32 %v3125_v58, %v3703_v16  ;;  %v4949_v17 = vld [vmem:[#allocation17_spill] sm:$0xff] }
 0x8dc   :  { %v2114_v29 = vadd.f32 %v3128_v32, %v3709_v28  ;;  %v4950_v32 = vld [vmem:[#allocation19_spill] sm:$0xff] }
 0x8de   :  { %v2132_v9 = vpack.c.bf16 %v2114_v29, %v2111_v60 }
 0x8e0   :  { %3143 = vmatprep.subr.bf16.mxu1 %v2132_v9 }
 0x8e1   :  { %3144 = vmatpush3.bf16.msra.mxu1 %v4929_v25 }
 0x8e4   :  { %2262 = vmatmul.mubr.bf16.vlgmr.msra.gmra.mrb[160].mxu1 %v4213_v36  ;;  %v4930_v36 = vld [vmem:[#allocation29_spill] sm:$0xff] }
 0x8e5   :  { %2269 = vmatprep.mubr.bf16.mxu1 %v4215_v31  ;;  %v4931_v31 = vld [vmem:[#allocation28_spill] sm:$0xff] }
 0x8ec   :  { %2270 = vmatmul.mubr.bf16.gmra.mrb[164].mxu1 %v4219_v23  ;;  %v4932_v23 = vld [vmem:[#allocation30_spill] sm:$0xff] }
 0x8ed   :  { %2277 = vmatprep.mubr.bf16.mxu1 %v4221_v43  ;;  %v4933_v43 = vld [vmem:[#allocation31_spill] sm:$0xff] }
 0x8f4   :  { %2278 = vmatmul.mubr.bf16.gmra.mrb[168].mxu1 %v4225_v19  ;;  %v4934_v19 = vld [vmem:[#allocation32_spill] sm:$0xff] }
 0x8f5   :  { %2285 = vmatprep.mubr.bf16.mxu1 %v4227_v30  ;;  %v4935_v30 = vld [vmem:[#allocation33_spill] sm:$0xff] }
 0x8fc   :  { %2286 = vmatmul.mubr.bf16.gmra.mrb[172].mxu1 %v4231_v38  ;;  %v4936_v38 = vld [vmem:[#allocation34_spill] sm:$0xff] }
 0x8fd   :  { %2293 = vmatprep.mubr.bf16.mxu1 %v4233_v46  ;;  %v4937_v46 = vld [vmem:[#allocation35_spill] sm:$0xff] }
 0x904   :  { %2294 = vmatmul.mubr.bf16.gmra.mrb[176].mxu1 %v4237_v47  ;;  %v4938_v47 = vld [vmem:[#allocation36_spill] sm:$0xff] }
 0x905   :  { %2301 = vmatprep.mubr.bf16.mxu1 %v4239_v52  ;;  %v4939_v52 = vld [vmem:[#allocation37_spill] sm:$0xff] }
 0x90c   :  { %2302 = vmatmul.mubr.bf16.gmra.mrb[180].mxu1 %v4243_v41  ;;  %v4940_v41 = vld [vmem:[#allocation38_spill] sm:$0xff] }
 0x90d   :  { %2309 = vmatprep.mubr.bf16.mxu1 %v4245_v55  ;;  %v4941_v55 = vld [vmem:[#allocation39_spill] sm:$0xff] }
 0x914   :  { %2310 = vmatmul.mubr.bf16.gmra.mrb[184].mxu1 %v4249_v34  ;;  %v4942_v34 = vld [vmem:[#allocation40_spill] sm:$0xff] }
 0x915   :  { %2317 = vmatprep.mubr.bf16.mxu1 %v4251_v11  ;;  %v4943_v11 = vld [vmem:[#allocation41_spill] sm:$0xff] }
 0x91c   :  { %2318 = vmatmul.mubr.bf16.gmra.mrb[188].mxu1 %v4255_v40  ;;  %v4944_v40 = vld [vmem:[#allocation42_spill] sm:$0xff] }
 0x91d   :  { %2325 = vmatprep.mubr.bf16.mxu1 %v4257_v42 }
 0x924   :  { %2326 = vmatmul.mubr.bf16.gmra.mrb[192].mxu1 %v4930_v36 }
 0x925   :  { %2333 = vmatprep.mubr.bf16.mxu1 %v4931_v31 }
 0x92c   :  { %2334 = vmatmul.mubr.bf16.gmra.mrb[196].mxu1 %v4932_v23  ;;  %v4951_v23 = vld [vmem:[#allocation16_spill] sm:$0xff] }
 0x92d   :  { %2341 = vmatprep.mubr.bf16.mxu1 %v4933_v43 }
 0x934   :  { %2342 = vmatmul.mubr.bf16.gmra.mrb[200].mxu1 %v4934_v19 }
 0x935   :  { %2349 = vmatprep.mubr.bf16.mxu1 %v4935_v30  ;;  %v4952_v30 = vld [vmem:[#allocation18_spill] sm:$0xff] }
 0x93c   :  { %2350 = vmatmul.mubr.bf16.gmra.mrb[204].mxu1 %v4936_v38 }
 0x93d   :  { %2357 = vmatprep.mubr.bf16.mxu1 %v4937_v46 }
 0x944   :  { %2358 = vmatmul.mubr.bf16.gmra.mrb[208].mxu1 %v4938_v47 }
 0x945   :  { %2365 = vmatprep.mubr.bf16.mxu1 %v4939_v52 }
 0x94c   :  { %2366 = vmatmul.mubr.bf16.gmra.mrb[212].mxu1 %v4940_v41 }
 0x94d   :  { %2373 = vmatprep.mubr.bf16.mxu1 %v4941_v55 }
 0x954   :  { %2374 = vmatmul.mubr.bf16.gmra.mrb[216].mxu1 %v4942_v34  ;;  %v4953_v34 = vld [vmem:[#allocation21_spill] sm:$0xff] }
 0x955   :  { %2381 = vmatprep.mubr.bf16.mxu1 %v4943_v11 }
 0x95c   :  { %2382 = vmatmul.mubr.bf16.gmra.mrb[220].mxu1 %v4944_v40 }
 0x9b7   :  { %v3145_v42 = vpop.f32.mrb[160].mxu1 }
 0x9b8   :  { %v3146_v13 = vpop.f32.mrb[161].mxu1 }
 0x9b9   :  { %v3147_v14 = vadd.f32 %v3146_v13, %v3145_v42  ;;  %v3148_v53 = vpop.f32.mrb[162].mxu1  ;;  %v4954_v42 = vld [vmem:[#allocation23_spill] sm:$0xff] }
 0x9ba   :  { %v3149_v48 = vpop.f32.mrb[163].mxu1 }
 0x9bb   :  { %v2264_v37 = vadd.f32 %v3147_v14, %v4945_v27  ;;  %v3150_v54 = vadd.f32 %v3149_v48, %v3148_v53 }
 0x9bd   :  { %2422 = vst [vmem:[#allocation6] sm:$0xff] %v2264_v37  ;;  %v2267_v7 = vadd.f32 %v3150_v54, %v4946_v61  ;;  %v4955_v54 = vld [vmem:[#allocation20_spill] sm:$0xff] }
 0x9bf   :  { %2423 = vst [vmem:[#allocation6 + $0x8] sm:$0xff] %v2267_v7  ;;  %v3151_v5 = vpop.f32.mrb[164].mxu1 }
 0x9c0   :  { %v3152_v22 = vpop.f32.mrb[165].mxu1 }
 0x9c1   :  { %v3153_v33 = vadd.f32 %v3152_v22, %v3151_v5  ;;  %v3154_v0 = vpop.f32.mrb[166].mxu1  ;;  %v4956_v5 = vld [vmem:[#allocation22_spill] sm:$0xff] }
 0x9c2   :  { %v3155_v18 = vpop.f32.mrb[167].mxu1 }
 0x9c3   :  { %v2272_v24 = vadd.f32 %v3153_v33, %v4947_v44  ;;  %v3156_v8 = vadd.f32 %v3155_v18, %v3154_v0 }
 0x9c5   :  { %2424 = vst [vmem:[#allocation6 + $0x10] sm:$0xff] %v2272_v24  ;;  %v2275_v62 = vadd.f32 %v3156_v8, %v4948_v50  ;;  %v4957_v8 = vld [vmem:[#allocation25_spill] sm:$0xff] }
 0x9c7   :  { %2425 = vst [vmem:[#allocation6 + $0x18] sm:$0xff] %v2275_v62  ;;  %v3157_v2 = vpop.f32.mrb[168].mxu1 }
 0x9c8   :  { %v3158_v10 = vpop.f32.mrb[169].mxu1 }
 0x9c9   :  { %v3159_v12 = vadd.f32 %v3158_v10, %v3157_v2  ;;  %v3160_v51 = vpop.f32.mrb[170].mxu1  ;;  %v4958_v2 = vld [vmem:[#allocation27_spill] sm:$0xff] }
 0x9ca   :  { %v3161_v58 = vpop.f32.mrb[171].mxu1 }
 0x9cb   :  { %v2280_v15 = vadd.f32 %v3159_v12, %v4949_v17  ;;  %v3162_v57 = vadd.f32 %v3161_v58, %v3160_v51 }
 0x9cd   :  { %2426 = vst [vmem:[#allocation6 + $0x20] sm:$0xff] %v2280_v15  ;;  %v2283_v60 = vadd.f32 %v3162_v57, %v4950_v32  ;;  %v4959_v57 = vld [vmem:[#allocation24_spill] sm:$0xff] }
 0x9cf   :  { %2427 = vst [vmem:[#allocation6 + $0x28] sm:$0xff] %v2283_v60  ;;  %v3163_v29 = vpop.f32.mrb[172].mxu1 }
 0x9d0   :  { %v3164_v9 = vpop.f32.mrb[173].mxu1 }
 0x9d1   :  { %v3165_v25 = vadd.f32 %v3164_v9, %v3163_v29  ;;  %v3166_v36 = vpop.f32.mrb[174].mxu1  ;;  %v4960_v29 = vld [vmem:[#allocation26_spill] sm:$0xff] }
 0x9d2   :  { %v3167_v31 = vpop.f32.mrb[175].mxu1 }
 0x9d3   :  { %v2288_v43 = vadd.f32 %v3165_v25, %v4951_v23  ;;  %v3168_v19 = vadd.f32 %v3167_v31, %v3166_v36 }
 0x9d5   :  { %2428 = vst [vmem:[#allocation6 + $0x30] sm:$0xff] %v2288_v43  ;;  %v2291_v38 = vadd.f32 %v3168_v19, %v4952_v30 }
 0x9d7   :  { %2429 = vst [vmem:[#allocation6 + $0x38] sm:$0xff] %v2291_v38  ;;  %v3169_v46 = vpop.f32.mrb[176].mxu1 }
 0x9d8   :  { %v3170_v47 = vpop.f32.mrb[177].mxu1 }
 0x9d9   :  { %v3171_v52 = vadd.f32 %v3170_v47, %v3169_v46  ;;  %v3172_v41 = vpop.f32.mrb[178].mxu1 }
 0x9da   :  { %v3173_v55 = vpop.f32.mrb[179].mxu1 }
 0x9db   :  { %v2296_v11 = vadd.f32 %v3171_v52, %v4953_v34  ;;  %v3174_v40 = vadd.f32 %v3173_v55, %v3172_v41 }
 0x9dd   :  { %2430 = vst [vmem:[#allocation6 + $0x40] sm:$0xff] %v2296_v11  ;;  %v2299_v13 = vadd.f32 %v3174_v40, %v4954_v42 }
 0x9df   :  { %2431 = vst [vmem:[#allocation6 + $0x48] sm:$0xff] %v2299_v13  ;;  %v3175_v14 = vpop.f32.mrb[180].mxu1 }
 0x9e0   :  { %v3176_v53 = vpop.f32.mrb[181].mxu1 }
 0x9e1   :  { %v3177_v48 = vadd.f32 %v3176_v53, %v3175_v14  ;;  %v3178_v27 = vpop.f32.mrb[182].mxu1 }
 0x9e2   :  { %v3179_v37 = vpop.f32.mrb[183].mxu1 }
 0x9e3   :  { %v2304_v61 = vadd.f32 %v3177_v48, %v4955_v54  ;;  %v3180_v7 = vadd.f32 %v3179_v37, %v3178_v27 }
 0x9e5   :  { %2432 = vst [vmem:[#allocation6 + $0x50] sm:$0xff] %v2304_v61  ;;  %v2307_v22 = vadd.f32 %v3180_v7, %v4956_v5 }
 0x9e7   :  { %2433 = vst [vmem:[#allocation6 + $0x58] sm:$0xff] %v2307_v22  ;;  %v3181_v33 = vpop.f32.mrb[184].mxu1 }
 0x9e8   :  { %v3182_v0 = vpop.f32.mrb[185].mxu1 }
 0x9e9   :  { %v3183_v18 = vadd.f32 %v3182_v0, %v3181_v33  ;;  %v3184_v44 = vpop.f32.mrb[186].mxu1 }
 0x9ea   :  { %v3185_v24 = vpop.f32.mrb[187].mxu1 }
 0x9eb   :  { %v2312_v50 = vadd.f32 %v3183_v18, %v4957_v8  ;;  %v3186_v62 = vadd.f32 %v3185_v24, %v3184_v44 }
 0x9ed   :  { %2434 = vst [vmem:[#allocation6 + $0x60] sm:$0xff] %v2312_v50  ;;  %v2315_v10 = vadd.f32 %v3186_v62, %v4958_v2 }
 0x9ef   :  { %2435 = vst [vmem:[#allocation6 + $0x68] sm:$0xff] %v2315_v10  ;;  %v3187_v12 = vpop.f32.mrb[188].mxu1 }
 0x9f0   :  { %v3188_v51 = vpop.f32.mrb[189].mxu1 }
 0x9f1   :  { %v3189_v58 = vadd.f32 %v3188_v51, %v3187_v12  ;;  %v3190_v17 = vpop.f32.mrb[190].mxu1 }
 0x9f2   :  { %v3191_v15 = vpop.f32.mrb[191].mxu1 }
 0x9f3   :  { %v2320_v32 = vadd.f32 %v3189_v58, %v4959_v57  ;;  %v3192_v60 = vadd.f32 %v3191_v15, %v3190_v17 }
 0x9f5   :  { %2436 = vst [vmem:[#allocation6 + $0x70] sm:$0xff] %v2320_v32  ;;  %v2323_v9 = vadd.f32 %v3192_v60, %v4960_v29 }
 0x9f7   :  { %2437 = vst [vmem:[#allocation6 + $0x78] sm:$0xff] %v2323_v9  ;;  %v3193_v25 = vpop.f32.mrb[192].mxu1 }
 0x9f8   :  { %v3194_v36 = vpop.f32.mrb[193].mxu1 }
 0x9f9   :  { %v3195_v31 = vadd.f32 %v3194_v36, %v3193_v25  ;;  %v3196_v23 = vpop.f32.mrb[194].mxu1 }
 0x9fa   :  { %v3197_v43 = vpop.f32.mrb[195].mxu1 }
 0x9fb   :  { %v2328_v19 = vadd.f32 %v3195_v31, %v3670_v20  ;;  %v3198_v30 = vadd.f32 %v3197_v43, %v3196_v23 }
 0x9fd   :  { %2438 = vst [vmem:[#allocation6 + $0x80] sm:$0xff] %v2328_v19  ;;  %v2331_v38 = vadd.f32 %v3198_v30, %v4819_v26 }
 0x9ff   :  { %2439 = vst [vmem:[#allocation6 + $0x88] sm:$0xff] %v2331_v38  ;;  %v3199_v46 = vpop.f32.mrb[196].mxu1 }
 0xa00   :  { %v3200_v47 = vpop.f32.mrb[197].mxu1 }
 0xa01   :  { %v3201_v52 = vadd.f32 %v3200_v47, %v3199_v46  ;;  %v3202_v41 = vpop.f32.mrb[198].mxu1 }
 0xa02   :  { %v3203_v55 = vpop.f32.mrb[199].mxu1 }
 0xa03   :  { %v2336_v34 = vadd.f32 %v3201_v52, %v3667_v4  ;;  %v3204_v11 = vadd.f32 %v3203_v55, %v3202_v41 }
 0xa05   :  { %2440 = vst [vmem:[#allocation6 + $0x90] sm:$0xff] %v2336_v34  ;;  %v2339_v40 = vadd.f32 %v3204_v11, %v3673_v21 }
 0xa07   :  { %2441 = vst [vmem:[#allocation6 + $0x98] sm:$0xff] %v2339_v40  ;;  %v3205_v42 = vpop.f32.mrb[200].mxu1 }
 0xa08   :  { %v3206_v13 = vpop.f32.mrb[201].mxu1 }
 0xa09   :  { %v3207_v20 = vadd.f32 %v3206_v13, %v3205_v42  ;;  %v3208_v14 = vpop.f32.mrb[202].mxu1 }
 0xa0a   :  { %v3209_v53 = vpop.f32.mrb[203].mxu1 }
 0xa0b   :  { %v2344_v26 = vadd.f32 %v3207_v20, %v3682_v56  ;;  %v3210_v48 = vadd.f32 %v3209_v53, %v3208_v14 }
 0xa0d   :  { %2442 = vst [vmem:[#allocation6 + $0xa0] sm:$0xff] %v2344_v26  ;;  %v2347_v27 = vadd.f32 %v3210_v48, %v3687_v3 }
 0xa0f   :  { %2443 = vst [vmem:[#allocation6 + $0xa8] sm:$0xff] %v2347_v27  ;;  %v3211_v37 = vpop.f32.mrb[204].mxu1 }
 0xa10   :  { %v3212_v54 = vpop.f32.mrb[205].mxu1 }
 0xa11   :  { %v3213_v4 = vadd.f32 %v3212_v54, %v3211_v37  ;;  %v3214_v61 = vpop.f32.mrb[206].mxu1 }
 0xa12   :  { %v3215_v7 = vpop.f32.mrb[207].mxu1 }
 0xa13   :  { %v2352_v21 = vadd.f32 %v3213_v4, %v3679_v49  ;;  %v3216_v5 = vadd.f32 %v3215_v7, %v3214_v61 }
 0xa15   :  { %2444 = vst [vmem:[#allocation6 + $0xb0] sm:$0xff] %v2352_v21  ;;  %v2355_v22 = vadd.f32 %v3216_v5, %v3685_v1 }
 0xa17   :  { %2445 = vst [vmem:[#allocation6 + $0xb8] sm:$0xff] %v2355_v22  ;;  %v3217_v33 = vpop.f32.mrb[208].mxu1 }
 0xa18   :  { %v3218_v0 = vpop.f32.mrb[209].mxu1 }
 0xa19   :  { %v3219_v56 = vadd.f32 %v3218_v0, %v3217_v33  ;;  %v3220_v18 = vpop.f32.mrb[210].mxu1 }
 0xa1a   :  { %v3221_v44 = vpop.f32.mrb[211].mxu1 }
 0xa1b   :  { %v2360_v3 = vadd.f32 %v3219_v56, %v3694_v45  ;;  %v3222_v24 = vadd.f32 %v3221_v44, %v3220_v18 }
 0xa1d   :  { %2446 = vst [vmem:[#allocation6 + $0xc0] sm:$0xff] %v2360_v3  ;;  %v2363_v8 = vadd.f32 %v3222_v24, %v3699_v63 }
 0xa1f   :  { %2447 = vst [vmem:[#allocation6 + $0xc8] sm:$0xff] %v2363_v8  ;;  %v3223_v50 = vpop.f32.mrb[212].mxu1 }
 0xa20   :  { %v3224_v62 = vpop.f32.mrb[213].mxu1 }
 0xa21   :  { %v3225_v49 = vadd.f32 %v3224_v62, %v3223_v50  ;;  %v3226_v2 = vpop.f32.mrb[214].mxu1 }
 0xa22   :  { %v3227_v10 = vpop.f32.mrb[215].mxu1 }
 0xa23   :  { %v2368_v1 = vadd.f32 %v3225_v49, %v4785_v6  ;;  %v3228_v12 = vadd.f32 %v3227_v10, %v3226_v2 }
 0xa25   :  { %2448 = vst [vmem:[#allocation6 + $0xd0] sm:$0xff] %v2368_v1  ;;  %v2371_v51 = vadd.f32 %v3228_v12, %v3697_v39 }
 0xa27   :  { %2449 = vst [vmem:[#allocation6 + $0xd8] sm:$0xff] %v2371_v51  ;;  %v3229_v58 = vpop.f32.mrb[216].mxu1 }
 0xa28   :  { %v3230_v17 = vpop.f32.mrb[217].mxu1 }
 0xa29   :  { %v3231_v45 = vadd.f32 %v3230_v17, %v3229_v58  ;;  %v3232_v15 = vpop.f32.mrb[218].mxu1 }
 0xa2a   :  { %v3233_v57 = vpop.f32.mrb[219].mxu1 }
 0xa2b   :  { %v2376_v63 = vadd.f32 %v3231_v45, %v3706_v59  ;;  %v3234_v32 = vadd.f32 %v3233_v57, %v3232_v15 }
 0xa2d   :  { %2450 = vst [vmem:[#allocation6 + $0xe0] sm:$0xff] %v2376_v63  ;;  %v2379_v60 = vadd.f32 %v3234_v32, %v3711_v35 }
 0xa2f   :  { %2451 = vst [vmem:[#allocation6 + $0xe8] sm:$0xff] %v2379_v60  ;;  %v3235_v29 = vpop.f32.mrb[220].mxu1 }
 0xa30   :  { %v3236_v9 = vpop.f32.mrb[221].mxu1 }
 0xa31   :  { %v3237_v6 = vadd.f32 %v3236_v9, %v3235_v29  ;;  %v3238_v25 = vpop.f32.mrb[222].mxu1 }
 0xa32   :  { %v3239_v36 = vpop.f32.mrb[223].mxu1 }
 0xa33   :  { %v2384_v39 = vadd.f32 %v3237_v6, %v3703_v16  ;;  %v3240_v31 = vadd.f32 %v3239_v36, %v3238_v25 }
 0xa35   :  { %2452 = vst [vmem:[#allocation6 + $0xf0] sm:$0xff] %v2384_v39  ;;  %v2387_v23 = vadd.f32 %v3240_v31, %v3709_v28 }
 0xa37   :  { %2453 = vst [vmem:[#allocation6 + $0xf8] sm:$0xff] %v2387_v23 }
 0xa38   :  { %3354 = shalt.err (!%p3351_p4)
}
 0xa39   :  { %s3355_s30 = scalar_lea.hbm %s4629_s6, 4096 }
 0xa3a   :  { %p3356_p5 = scmp.ne.s32.totalorder %s4629_s6, %s3355_s30  ;;  %p3359_p6 = scmp.lt.u32.totalorder %s3355_s30, %s4629_s6 }
 0xa3c   :  { %p3361_p7 = pnand %p3359_p6, %p3356_p5 }
 0xa3e   :  { %3364 = shalt.err (!%p3361_p7)
}
 0xa3f   :  { %s3378_s11 = smov 8  }
 0xa40   :  { %2465 = dma.vmem_to_hbm [thread:$0]  %s2460_s4, 4096, %s4629_s6, [#allocation7], %s3373_s28, %s3373_s28, %s3378_s11  }
 0xa41   :  { %3367 = dma.done.wait [#allocation7], 4096  }
 0xa42   :  { %3368 = vsyncadd [#allocation7], 4294963200 }
 0xa43   :  { %2469 = vsyncpa [#allocation7], 1 }
 0xa44   :  { %2470 = vsyncmov [#allocation5] }
 0xa47   :  { %s2471_s14 = vpop.sfrf %2470 }
 0xa48   :  { %p2532_p8 = scmp.ne.s32.totalorder %s2471_s14, 0 }
 0xa4a   :  { %2475 = shalt.err (%p2532_p8)  }

</bundles_post_ra>
